<compile_context>
chip_gen: v7x
topology: tpu7x:2x2x1
jax: 0.10.0
libtpu: 0.0.40
codegen_flags: <defaults>
</compile_context>

<pallas_src>
import math
import numpy as np
import jax
import jax.numpy as jnp
from jax.experimental import pallas as pl
from jax.experimental.pallas import tpu as pltpu


def _rup(n, m=8):
    return ((n + m - 1) // m) * m


# ---------------- configuration (small shapes consistent with the module) -----------------
B = 2
NUM_ROW = 3
NUM_COL = 3
NUM_NODE = NUM_ROW * NUM_COL            # 9
CS = 8                                  # args.concept_size
NUM_CONCEPT = 2                         # args.num_concept
NUM_RULE = 3                            # args.num_rule
PRED_INNER_DIM = [16]                   # args.pred_inner_dim
HIDDEN = 64                             # RuleParser hidden_dim
Z_SIGMA = 1.0                           # BaseNetwork.z_sigma
TAU = 1.0                               # BaseNetwork.tau

C1 = PRED_INNER_DIM[0]                  # 16 conv hidden channels
RD = NUM_RULE * CS                      # 24 rule-concatenated conv output channels
RC1 = NUM_RULE * C1                     # 48 rule-concatenated conv hidden channels
CB = NUM_CONCEPT * B                    # 4 fused (concept, batch) groups
GROW = 4                                # padded encoder rows per group (3 real + 1 zero)
M_ENC = CB * GROW                       # 16 encoder rows
M_CONV = _rup(CB * NUM_NODE)            # 40 conv rows (36 real + 4 zero)
ROW_W = NUM_COL * CS                    # 24
COL_W = NUM_ROW * CS                    # 24
PATCH = 9 * CS                          # 72 im2col patch width
ENC_DIM = 512                           # RuleParser encoder width
INV2SIG = 1.0 / (2.0 * Z_SIGMA * Z_SIGMA)
OUT_ROWS = 16
OUT_LANES = 128


# ---------------- small glue helpers -------------------------------------------------------
def _im2col_3x3(x_nhwc):
    n, h, w, c = x_nhwc.shape
    xp = jnp.pad(x_nhwc, ((0, 0), (1, 1), (1, 1), (0, 0)))
    cols = [xp[:, ky:ky + h, kx:kx + w, :] for ky in range(3) for kx in range(3)]
    return jnp.concatenate(cols, axis=-1)        # (n, h, w, 9*c), (ky, kx, cin) order


def _block_diag(blocks):
    rows = []
    for i, blk in enumerate(blocks):
        pads = [jnp.zeros_like(blk) for _ in blocks]
        pads[i] = blk
        rows.append(jnp.concatenate(pads, axis=1))
    return jnp.concatenate(rows, axis=0)


def _pack_rows(arrs, width, dtype, align=8):
    """Stack 2-D arrays row-wise into one lane-padded slab; returns (slab, row_offsets)."""
    pieces, offs, r = [], [], 0
    for a in arrs:
        a = jnp.asarray(a)
        offs.append(r)
        rows = _rup(a.shape[0], align)
        p = jnp.zeros((rows, width), dtype)
        p = p.at[:a.shape[0], :a.shape[1]].set(a.astype(dtype))
        pieces.append(p)
        r += rows
    slab = jnp.concatenate(pieces, axis=0)
    tot = _rup(max(r, 8), 8)
    if tot > r:
        slab = jnp.concatenate([slab, jnp.zeros((tot - r, width), dtype)], axis=0)
    return slab, offs


# ---------------- NPPredictor.forward -------------------------------------------------------
def np_predictor_forward(params, x, mask_np):
    """x: (B, num_node, num_concept, concept_size); mask_np: static (num_node,) 0/1."""
    f32, bf16 = jnp.float32, jnp.bfloat16
    mask_np = np.asarray(mask_np)
    tgt_idx = np.where(mask_np == 1)[0]          # split_by_mask / combine_by_mask glue
    nt = len(tgt_idx)
    bnt = CB * nt                                # total target rows (concept x batch x nt)
    mask_f = jnp.asarray(mask_np, f32)
    rp = params['rule_parser']
    tps = params['target_predictor']

    # ---- per-call activations, concepts folded into the row dimension --------------------
    x_t = jnp.transpose(x.astype(f32), (2, 0, 1, 3))              # (C, B, 9, CS)
    # sample_slots() is all zeros -> combine(zeros_target, context) == zero-mask
    ctx = x_t * (1.0 - mask_f)[None, None, :, None]               # conv input
    rp_in = ctx + rp['init_val'].reshape(NUM_NODE, CS)[None, None] * mask_f[None, None, :, None]

    grid5 = rp_in.reshape(CB, NUM_ROW, NUM_COL, CS)
    row_in = grid5.reshape(CB, NUM_ROW, ROW_W)
    row_in = jnp.pad(row_in, ((0, 0), (0, GROW - NUM_ROW), (0, 0))).reshape(M_ENC, ROW_W)
    col_in = jnp.transpose(grid5, (0, 2, 1, 3)).reshape(CB, NUM_COL, COL_W)
    col_in = jnp.pad(col_in, ((0, 0), (0, GROW - NUM_COL), (0, 0))).reshape(M_ENC, COL_W)

    pat = _im2col_3x3(ctx.reshape(CB, NUM_ROW, NUM_COL, CS)).reshape(CB * NUM_NODE, PATCH)
    xdt = x_t[:, :, tgt_idx, :].reshape(bnt, CS)
    xdt3 = jnp.tile(xdt, (1, NUM_RULE))                           # exact rule replication

    data_slab, d_off = _pack_rows([row_in, col_in, pat, xdt3], 128, f32)
    d_row, d_col, d_pat, d_xdt = d_off

    # ---- packed weights (everything resident in VMEM for the single kernel run) ----------
    (rw1, rb1), (rw2, rb2), (rw3, rb3) = rp['enc_row']
    (ecw1, ecb1), (ecw2, ecb2), (ecw3, ecb3) = rp['enc_col']
    enc_w1 = jnp.concatenate([rw1, ecw1], axis=0).astype(bf16)    # (48, 512)
    enc_w2 = jnp.concatenate([rw2, ecw2], axis=0).astype(bf16)    # (1024, 512)
    enc_w3 = jnp.concatenate([rw3, ecw3], axis=1).astype(bf16)    # (512, 128)

    (k0w, k0b), (k1w, k1b), (k2w, k2b) = rp['comb']
    comb_w, cw_off = _pack_rows([k0w[:HIDDEN], k0w[HIDDEN:], k1w, k2w], HIDDEN, bf16)

    # conv layer 0: rule-concatenated (72,48); layer 1: 9 block-diagonal taps; 9 padded
    # shift-selection matrices -> all in one bf16 slab
    w0_cat = jnp.concatenate([tps[r][0][0].reshape(PATCH, C1) for r in range(NUM_RULE)], axis=1)
    b0_cat = jnp.concatenate([tps[r][0][1] for r in range(NUM_RULE)]).reshape(1, RC1)
    b1_cat = jnp.concatenate([tps[r][1][1] for r in range(NUM_RULE)]).reshape(1, RD)
    bd_taps = [_block_diag([tps[r][1][0][ky, kx] for r in range(NUM_RULE)])
               for ky in range(3) for kx in range(3)]             # 9 x (48, 24)

    sel = np.zeros((9, M_CONV, M_CONV), np.float32)
    for ky in range(3):
        for kx in range(3):
            k = ky * 3 + kx
            dy, dx = ky - 1, kx - 1
            for g in range(CB):
                for y in range(NUM_ROW):
                    for xc in range(NUM_COL):
                        yy, xx = y + dy, xc + dx
                        if 0 <= yy < NUM_ROW and 0 <= xx < NUM_COL:
                            sel[k, g * NUM_NODE + y * NUM_COL + xc,
                                g * NUM_NODE + yy * NUM_COL + xx] = 1.0
    conv_w, conv_off = _pack_rows([w0_cat] + bd_taps + [sel.reshape(9 * M_CONV, M_CONV)],
                                  RC1, bf16)
    w0_off = conv_off[0]
    bd_offs = conv_off[1:1 + 9]
    sel_off = conv_off[10]

    # ---- small constant selection / reduction matrices -> one f32 slab --------------------
    avg = np.zeros((CB, M_ENC), np.float32)
    for g in range(CB):
        avg[g, g * GROW:g * GROW + NUM_ROW] = 1.0 / NUM_ROW
    tgt_sel = np.zeros((bnt, M_CONV), np.float32)
    grp_sum = np.zeros((CB, bnt), np.float32)
    row_rep = np.zeros((bnt, CB), np.float32)
    for g in range(CB):
        grp_sum[g, g * nt:(g + 1) * nt] = 1.0
        for t, pos in enumerate(tgt_idx):
            tgt_sel[g * nt + t, g * NUM_NODE + int(pos)] = 1.0
            row_rep[g * nt + t, g] = 1.0
    rule_sum = np.zeros((RD, NUM_RULE), np.float32)
    col_rep = np.zeros((NUM_RULE, RD), np.float32)
    blk_sum = np.zeros((RD, CS), np.float32)
    for r in range(NUM_RULE):
        rule_sum[r * CS:(r + 1) * CS, r] = 1.0
        col_rep[r, r * CS:(r + 1) * CS] = 1.0
        blk_sum[r * CS:(r + 1) * CS, :] = np.eye(CS, dtype=np.float32)
    const_slab, c_off = _pack_rows(
        [avg, tgt_sel, grp_sum, rule_sum, row_rep, col_rep, blk_sum], 64, f32)
    c_avg, c_tgt, c_grp, c_rsum, c_rrep, c_crep, c_bsum = c_off

    # ---- all 1-row biases in one lane-dense slab ------------------------------------------
    bias_slab, b_off = _pack_rows(
        [rb1.reshape(1, -1), rb2.reshape(1, -1), rb3.reshape(1, -1),
         ecb1.reshape(1, -1), ecb2.reshape(1, -1), ecb3.reshape(1, -1),
         k0b.reshape(1, -1), k1b.reshape(1, -1), k2b.reshape(1, -1),
         b0_cat, b1_cat], ENC_DIM, f32, align=1)
    (b_rb1, b_rb2, b_rb3, b_cb1, b_cb2, b_cb3, b_k0, b_k1, b_k2, b_b0, b_b1) = b_off

    # ---- fused kernel ----------------------------------------------------------------------
    def kernel(data, cst, bias, ew1, ew2, ew3, cw, convw, out_ref):
        row_in_ = data[d_row:d_row + M_ENC, 0:ROW_W]
        col_in_ = data[d_col:d_col + M_ENC, 0:COL_W]
        pat_ = data[d_pat:d_pat + M_CONV, 0:PATCH]
        xdt3_ = data[d_xdt:d_xdt + bnt, 0:RD]

        def enc3(h, w1, b1, w2, b2, w3, b3):
            # bf16 MXU operands, f32 accumulation, f32 elementwise (v5e-friendly)
            h = jnp.maximum(jnp.dot(h.astype(bf16), w1, preferred_element_type=f32) + b1, 0.0)
            h = jnp.maximum(jnp.dot(h.astype(bf16), w2, preferred_element_type=f32) + b2, 0.0)
            return jnp.dot(h.astype(bf16), w3, preferred_element_type=f32) + b3

        # ---- RuleParser --------------------------------------------------------------------
        row_h = enc3(row_in_,
                     ew1[0:ROW_W], bias[b_rb1:b_rb1 + 1, 0:ENC_DIM],
                     ew2[0:ENC_DIM], bias[b_rb2:b_rb2 + 1, 0:ENC_DIM],
                     ew3[:, 0:HIDDEN], bias[b_rb3:b_rb3 + 1, 0:HIDDEN])
        col_h = enc3(col_in_,
                     ew1[ROW_W:2 * ROW_W], bias[b_cb1:b_cb1 + 1, 0:ENC_DIM],
                     ew2[ENC_DIM:2 * ENC_DIM], bias[b_cb2:b_cb2 + 1, 0:ENC_DIM],
                     ew3[:, HIDDEN:2 * HIDDEN], bias[b_cb3:b_cb3 + 1, 0:HIDDEN])

        avg_ = cst[c_avg:c_avg + CB, 0:M_ENC]
        row_repr = jnp.dot(avg_, row_h, preferred_element_type=f32)          # (CB, 64)
        col_repr = jnp.dot(avg_, col_h, preferred_element_type=f32)

        # rule_comb: concat([row, col]) @ W0 == row @ W0_top + col @ W0_bot
        h = (jnp.dot(row_repr.astype(bf16), cw[cw_off[0]:cw_off[0] + HIDDEN],
                     preferred_element_type=f32)
             + jnp.dot(col_repr.astype(bf16), cw[cw_off[1]:cw_off[1] + HIDDEN],
                       preferred_element_type=f32)
             + bias[b_k0:b_k0 + 1, 0:HIDDEN])
        h = jnp.maximum(h, 0.0)
        h = jnp.maximum(jnp.dot(h.astype(bf16), cw[cw_off[2]:cw_off[2] + HIDDEN],
                                preferred_element_type=f32)
                        + bias[b_k1:b_k1 + 1, 0:HIDDEN], 0.0)
        prior = (jnp.dot(h.astype(bf16), cw[cw_off[3]:cw_off[3] + HIDDEN, 0:NUM_RULE],
                         preferred_element_type=f32)
                 + bias[b_k2:b_k2 + 1, 0:NUM_RULE])                           # (CB, R)

        # ---- ConvTargetPredictor, all rules fused along the channel axis --------------------
        h1 = jnp.maximum(jnp.dot(pat_.astype(bf16), convw[w0_off:w0_off + PATCH],
                                 preferred_element_type=f32)
                         + bias[b_b0:b_b0 + 1, 0:RC1], 0.0)                   # (M_CONV, 48)
        h1b = h1.astype(bf16)
        # single stacked shift-selection matmul (exact 0/1 selection of bf16 h1 values)
        shifted = jnp.dot(convw[sel_off:sel_off + 9 * M_CONV, 0:M_CONV], h1b,
                          preferred_element_type=f32).astype(bf16)            # (360, 48)
        taps = []
        for k in range(9):
            taps.append(jnp.dot(shifted[k * M_CONV:(k + 1) * M_CONV],
                                convw[bd_offs[k]:bd_offs[k] + RC1, 0:RD],
                                preferred_element_type=f32))
        out_cat = (((taps[0] + taps[1]) + (taps[2] + taps[3]))
                   + ((taps[4] + taps[5]) + (taps[6] + taps[7]))
                   + taps[8] + bias[b_b1:b_b1 + 1, 0:RD])                     # (M_CONV, 24)

        # ---- target rows + Gaussian LL + log-softmax + relaxed sample + mix -----------------
        ztg = jnp.dot(cst[c_tgt:c_tgt + bnt, 0:M_CONV], out_cat,
                      preferred_element_type=f32)                             # (bnt, 24)
        d = ztg - xdt3_
        sq = d * d
        ll = -INV2SIG * jnp.dot(
            jnp.dot(cst[c_grp:c_grp + CB, 0:bnt], sq, preferred_element_type=f32),
            cst[c_rsum:c_rsum + RD, 0:NUM_RULE], preferred_element_type=f32)  # (CB, R)

        m = jnp.max(prior, axis=-1, keepdims=True)
        lse = m + jnp.log(jnp.sum(jnp.exp(prior - m), axis=-1, keepdims=True))
        post = ll + (prior - lse)

        # TODO(synk): dist.Categorical().sample(post, t=tau) likely adds Gumbel noise; the
        # deterministic zero-noise relaxation softmax(post / tau) is used here.
        pt = post * (1.0 / TAU)
        pm = jnp.max(pt, axis=-1, keepdims=True)
        e = jnp.exp(pt - pm)
        fsm = e * pl.reciprocal(jnp.sum(e, axis=-1, keepdims=True), approx=True)

        # zt_prior = sum_r zt[b, r] * f[b, r]
        f_exp = jnp.dot(jnp.dot(cst[c_rrep:c_rrep + bnt, 0:CB], fsm,
                                preferred_element_type=f32),
                        cst[c_crep:c_crep + NUM_RULE, 0:RD],
                        preferred_element_type=f32)                            # (bnt, 24)
        zt_sel = jnp.dot(ztg * f_exp, cst[c_bsum:c_bsum + RD, 0:CS],
                         preferred_element_type=f32)                           # (bnt, CS)

        # ---- single lane-padded output slab --------------------------------------------------
        out_ref[...] = jnp.zeros_like(out_ref)
        out_ref[0:bnt, 0:CS] = zt_sel
        out_ref[0:CB, 16:16 + NUM_RULE] = prior
        out_ref[0:CB, 32:32 + NUM_RULE] = post
        out_ref[0:CB, 48:48 + NUM_RULE] = fsm

    operands = [data_slab, const_slab, bias_slab, enc_w1, enc_w2, enc_w3, comb_w, conv_w]
    out = pl.pallas_call(
        kernel,
        grid=(1,),
        in_specs=[pl.BlockSpec(a.shape, lambda i: (0, 0)) for a in operands],
        out_specs=pl.BlockSpec((OUT_ROWS, OUT_LANES), lambda i: (0, 0)),
        out_shape=jax.ShapeDtypeStruct((OUT_ROWS, OUT_LANES), jnp.float32),
        compiler_params=pltpu.CompilerParams(dimension_semantics=("arbitrary",)),
    )(*operands)

    zt = out[0:bnt, 0:CS].reshape(NUM_CONCEPT, B, nt, CS)
    prior = out[0:CB, 16:16 + NUM_RULE].reshape(NUM_CONCEPT, B, NUM_RULE)
    post = out[0:CB, 32:32 + NUM_RULE].reshape(NUM_CONCEPT, B, NUM_RULE)
    fsm = out[0:CB, 48:48 + NUM_RULE].reshape(NUM_CONCEPT, B, NUM_RULE)

    results = {
        'f_post': jnp.transpose(post, (1, 0, 2)),                    # (B, C, R)
        'f_prior': jnp.transpose(prior, (1, 0, 2)),
        'f': jnp.transpose(fsm, (1, 0, 2)),
        'zt_prior': jnp.transpose(zt, (1, 2, 0, 3))[..., None],      # (B, nt, C, d, 1)
        'f_ll': [], 'f_full': [], 'f_full_shuffle': [],              # unused in forward()
    }
    return results


# ---------------- plain-JAX reference of the module forward (numerical self-check) ---------
def reference_forward(params, x, mask_np):
    f32, bf16 = jnp.float32, jnp.bfloat16
    mask_np = np.asarray(mask_np)
    tgt_idx = np.where(mask_np == 1)[0]
    mask_f = jnp.asarray(mask_np, f32)
    rp = params['rule_parser']

    def bdot(a, b):
        return jnp.dot(a.astype(bf16), b.astype(bf16), preferred_element_type=f32)

    def mlp(h, layers):
        for li, (w, b) in enumerate(layers):
            h = bdot(h, w) + b
            if li < len(layers) - 1:
                h = jnp.maximum(h, 0.0)
        return h

    def rule_parser(xd):
        g = (xd * (1.0 - mask_f)[None, :, None]
             + rp['init_val'].reshape(NUM_NODE, CS)[None] * mask_f[None, :, None])
        g = g.reshape(B, NUM_ROW, NUM_COL, CS)
        row = mlp(g.reshape(B * NUM_ROW, NUM_COL * CS), rp['enc_row'])
        row = row.reshape(B, NUM_ROW, HIDDEN).mean(1)
        col = mlp(jnp.transpose(g, (0, 2, 1, 3)).reshape(B * NUM_COL, NUM_ROW * CS),
                  rp['enc_col'])
        col = col.reshape(B, NUM_COL, HIDDEN).mean(1)
        return mlp(jnp.concatenate([row, col], axis=-1), rp['comb'])

    def conv_pred(layers, xd_init):
        h = xd_init.reshape(B, NUM_ROW, NUM_COL, CS)
        for li, (w, bias) in enumerate(layers):
            cin, cout = w.shape[2], w.shape[3]
            p = _im2col_3x3(h).reshape(B * NUM_NODE, 9 * cin)
            o = bdot(p, w.reshape(9 * cin, cout)) + bias
            if li < len(layers) - 1:
                o = jnp.maximum(o, 0.0)
            h = o.reshape(B, NUM_ROW, NUM_COL, cout)
        return h.reshape(B, NUM_NODE, -1)

    outs = {'f_post': [], 'f_prior': [], 'f': [], 'zt_prior': []}
    for i in range(NUM_CONCEPT):
        xd = x[:, :, i, :].astype(f32)
        xdt = xd[:, tgt_idx, :]
        xd_init = xd * (1.0 - mask_f)[None, :, None]
        prior = rule_parser(xd)
        zt = jnp.stack([conv_pred(params['target_predictor'][r], xd_init)[:, tgt_idx, :]
                        for r in range(NUM_RULE)], axis=1)                    # (B, R, nt, d)
        diff = xdt[:, None] - zt
        ll = -jnp.sum(diff * diff, axis=(2, 3)) / (2.0 * Z_SIGMA * Z_SIGMA)
        post = ll + jax.nn.log_softmax(prior, axis=-1)
        f = jax.nn.softmax(post / TAU, axis=-1)
        zt_sel = jnp.sum(zt * f[:, :, None, None], axis=1)
        outs['f_post'].append(post[:, None])
        outs['f_prior'].append(prior[:, None])
        outs['f'].append(f[:, None])
        outs['zt_prior'].append(zt_sel[:, :, None, :, None])
    return {k: jnp.concatenate(v, axis=(2 if k == 'zt_prior' else 1))
            for k, v in outs.items()}


# ---------------- deterministic parameter init ----------------------------------------------
def _init_linear(key, fan_in, fan_out):
    kw, kb = jax.random.split(key)
    bound = 1.0 / math.sqrt(fan_in)
    w = jax.random.uniform(kw, (fan_in, fan_out), jnp.float32, -bound, bound)
    b = jax.random.uniform(kb, (fan_out,), jnp.float32, -bound, bound)
    return w, b


def _init_conv(key, cin, cout):
    kw, kb = jax.random.split(key)
    bound = 1.0 / math.sqrt(cin * 9)
    w = jax.random.uniform(kw, (3, 3, cin, cout), jnp.float32, -bound, bound)
    b = jax.random.uniform(kb, (cout,), jnp.float32, -bound, bound)
    return w, b


def init_params(key):
    counter = [0]

    def nk():
        counter[0] += 1
        return jax.random.fold_in(key, counter[0])

    rp = {
        'enc_row': [_init_linear(nk(), NUM_COL * CS, ENC_DIM),
                    _init_linear(nk(), ENC_DIM, ENC_DIM),
                    _init_linear(nk(), ENC_DIM, HIDDEN)],
        'enc_col': [_init_linear(nk(), NUM_ROW * CS, ENC_DIM),
                    _init_linear(nk(), ENC_DIM, ENC_DIM),
                    _init_linear(nk(), ENC_DIM, HIDDEN)],
        'comb': [_init_linear(nk(), 2 * HIDDEN, 64),
                 _init_linear(nk(), 64, 64),
                 _init_linear(nk(), 64, NUM_RULE)],
        'init_val': jnp.zeros((NUM_ROW, NUM_COL, CS), jnp.float32),
    }

    hidden_list = [CS] + PRED_INNER_DIM + [CS]
    tps = []
    for _ in range(NUM_RULE):
        layers = [_init_conv(nk(), hidden_list[li], hidden_list[li + 1])
                  for li in range(len(hidden_list) - 1)]
        tps.append(layers)

    return {'rule_parser': rp, 'target_predictor': tps}


# ---------------- main ------------------------------------------------------------------------
if __name__ == "__main__":
    key = jax.random.PRNGKey(0)
    params = init_params(key)

    x = jax.random.normal(jax.random.fold_in(key, 1000),
                          (B, NUM_NODE, NUM_CONCEPT, CS), dtype=jnp.float32)
    # last row of the 3x3 grid is the prediction target (nt = 3)
    mask = np.array([0, 0, 0, 0, 0, 0, 1, 1, 1], dtype=np.int32)
    nt = int(mask.sum())

    fwd = jax.jit(lambda p, xx: np_predictor_forward(p, xx, mask))
    results = fwd(params, x)
    jax.block_until_ready((results['f_post'], results['f_prior'],
                           results['f'], results['zt_prior']))

    assert results['f_post'].shape == (B, NUM_CONCEPT, NUM_RULE)
    assert results['f_prior'].shape == (B, NUM_CONCEPT, NUM_RULE)
    assert results['f'].shape == (B, NUM_CONCEPT, NUM_RULE)
    assert results['zt_prior'].shape == (B, nt, NUM_CONCEPT, CS, 1)
    assert bool(jnp.all(jnp.isfinite(results['f_post'])))
    assert bool(jnp.all(jnp.isfinite(results['zt_prior'])))

    # numerical self-check against a straightforward JAX port of the module forward
    ref = reference_forward(params, x, mask)
    for k in ('f_prior', 'f_post', 'f', 'zt_prior'):
        np.testing.assert_allclose(np.asarray(results[k]), np.asarray(ref[k]),
                                   rtol=3e-2, atol=3e-2)

    print("KERNEL_OK")
</pallas_src>

<mosaic_0001>
module attributes {stable_mosaic.version = 11 : i64} {
  func.func @kernel(%arg0: i32, %arg1: memref<88x128xf32, #tpu.memory_space<vmem>>, %arg2: memref<104x64xf32, #tpu.memory_space<vmem>>, %arg3: memref<16x512xf32, #tpu.memory_space<vmem>>, %arg4: memref<48x512xbf16, #tpu.memory_space<vmem>>, %arg5: memref<1024x512xbf16, #tpu.memory_space<vmem>>, %arg6: memref<512x128xbf16, #tpu.memory_space<vmem>>, %arg7: memref<256x64xbf16, #tpu.memory_space<vmem>>, %arg8: memref<864x48xbf16, #tpu.memory_space<vmem>>, %arg9: memref<16x128xf32, #tpu.memory_space<vmem>>) attributes {dimension_semantics = [#tpu.dimension_semantics<arbitrary>], iteration_bounds = array<i64: 1>, scalar_prefetch = 0 : i64, scratch_operands = 0 : i64, tpu.core_type = #tpu.core_type<tc>, window_params = [{pipeline_mode = #tpu.pipeline_mode<synchronous>, transform_indices = @transform_0, window_bounds = array<i64: 88, 128>}, {pipeline_mode = #tpu.pipeline_mode<synchronous>, transform_indices = @transform_1, window_bounds = array<i64: 104, 64>}, {pipeline_mode = #tpu.pipeline_mode<synchronous>, transform_indices = @transform_2, window_bounds = array<i64: 16, 512>}, {pipeline_mode = #tpu.pipeline_mode<synchronous>, transform_indices = @transform_3, window_bounds = array<i64: 48, 512>}, {pipeline_mode = #tpu.pipeline_mode<synchronous>, transform_indices = @transform_4, window_bounds = array<i64: 1024, 512>}, {pipeline_mode = #tpu.pipeline_mode<synchronous>, transform_indices = @transform_5, window_bounds = array<i64: 512, 128>}, {pipeline_mode = #tpu.pipeline_mode<synchronous>, transform_indices = @transform_6, window_bounds = array<i64: 256, 64>}, {pipeline_mode = #tpu.pipeline_mode<synchronous>, transform_indices = @transform_7, window_bounds = array<i64: 864, 48>}, {pipeline_mode = #tpu.pipeline_mode<synchronous>, transform_indices = @transform_8, window_bounds = array<i64: 16, 128>}]} {
    %c0 = arith.constant 0 : index
    %c0_0 = arith.constant 0 : index
    %0 = vector.load %arg1[%c0, %c0_0] : memref<88x128xf32, #tpu.memory_space<vmem>>, vector<16x24xf32>
    %c16 = arith.constant 16 : index
    %c0_1 = arith.constant 0 : index
    %1 = vector.load %arg1[%c16, %c0_1] : memref<88x128xf32, #tpu.memory_space<vmem>>, vector<16x24xf32>
    %c32 = arith.constant 32 : index
    %c0_2 = arith.constant 0 : index
    %2 = vector.load %arg1[%c32, %c0_2] : memref<88x128xf32, #tpu.memory_space<vmem>>, vector<40x72xf32>
    %c72 = arith.constant 72 : index
    %c0_3 = arith.constant 0 : index
    %3 = vector.load %arg1[%c72, %c0_3] : memref<88x128xf32, #tpu.memory_space<vmem>>, vector<12x24xf32>
    %c0_4 = arith.constant 0 : index
    %c0_5 = arith.constant 0 : index
    %4 = vector.load %arg4[%c0_4, %c0_5] : memref<48x512xbf16, #tpu.memory_space<vmem>>, vector<24x512xbf16>
    %c0_6 = arith.constant 0 : index
    %c0_7 = arith.constant 0 : index
    %5 = vector.load %arg3[%c0_6, %c0_7] : memref<16x512xf32, #tpu.memory_space<vmem>>, vector<1x512xf32>
    %c0_8 = arith.constant 0 : index
    %c0_9 = arith.constant 0 : index
    %6 = vector.load %arg5[%c0_8, %c0_9] : memref<1024x512xbf16, #tpu.memory_space<vmem>>, vector<512x512xbf16>
    %c1 = arith.constant 1 : index
    %c0_10 = arith.constant 0 : index
    %7 = vector.load %arg3[%c1, %c0_10] : memref<16x512xf32, #tpu.memory_space<vmem>>, vector<1x512xf32>
    %c0_11 = arith.constant 0 : index
    %c0_12 = arith.constant 0 : index
    %8 = vector.load %arg6[%c0_11, %c0_12] : memref<512x128xbf16, #tpu.memory_space<vmem>>, vector<512x64xbf16>
    %c2 = arith.constant 2 : index
    %c0_13 = arith.constant 0 : index
    %9 = vector.load %arg3[%c2, %c0_13] : memref<16x512xf32, #tpu.memory_space<vmem>>, vector<1x64xf32>
    %10 = arith.truncf %0 : vector<16x24xf32> to vector<16x24xbf16>
    %cst = arith.constant dense<0.000000e+00> : vector<16x512xf32>
    %11 = tpu.matmul %10, %4, %cst {dimension_numbers = #tpu.dot_dimension_numbers<[1], [0], [0], [1], [0, 0, 1, 1], [], []>} : vector<16x24xbf16>, vector<24x512xbf16>, vector<16x512xf32> -> vector<16x512xf32>
    %12 = vector.broadcast %5 : vector<1x512xf32> to vector<16x512xf32>
    %13 = arith.addf %11, %12 : vector<16x512xf32>
    %cst_14 = arith.constant 0.000000e+00 : f32
    %14 = vector.broadcast %cst_14 : f32 to vector<16x512xf32>
    %15 = arith.maximumf %13, %14 : vector<16x512xf32>
    %16 = arith.truncf %15 : vector<16x512xf32> to vector<16x512xbf16>
    %cst_15 = arith.constant dense<0.000000e+00> : vector<16x512xf32>
    %17 = tpu.matmul %16, %6, %cst_15 {dimension_numbers = #tpu.dot_dimension_numbers<[1], [0], [0], [1], [0, 0, 1, 1], [], []>} : vector<16x512xbf16>, vector<512x512xbf16>, vector<16x512xf32> -> vector<16x512xf32>
    %18 = vector.broadcast %7 : vector<1x512xf32> to vector<16x512xf32>
    %19 = arith.addf %17, %18 : vector<16x512xf32>
    %cst_16 = arith.constant 0.000000e+00 : f32
    %20 = vector.broadcast %cst_16 : f32 to vector<16x512xf32>
    %21 = arith.maximumf %19, %20 : vector<16x512xf32>
    %22 = arith.truncf %21 : vector<16x512xf32> to vector<16x512xbf16>
    %cst_17 = arith.constant dense<0.000000e+00> : vector<16x64xf32>
    %23 = tpu.matmul %22, %8, %cst_17 {dimension_numbers = #tpu.dot_dimension_numbers<[1], [0], [0], [1], [0, 0, 1, 1], [], []>} : vector<16x512xbf16>, vector<512x64xbf16>, vector<16x64xf32> -> vector<16x64xf32>
    %24 = vector.broadcast %9 : vector<1x64xf32> to vector<16x64xf32>
    %25 = arith.addf %23, %24 : vector<16x64xf32>
    %c24 = arith.constant 24 : index
    %c0_18 = arith.constant 0 : index
    %26 = vector.load %arg4[%c24, %c0_18] : memref<48x512xbf16, #tpu.memory_space<vmem>>, vector<24x512xbf16>
    %c3 = arith.constant 3 : index
    %c0_19 = arith.constant 0 : index
    %27 = vector.load %arg3[%c3, %c0_19] : memref<16x512xf32, #tpu.memory_space<vmem>>, vector<1x512xf32>
    %c512 = arith.constant 512 : index
    %c0_20 = arith.constant 0 : index
    %28 = vector.load %arg5[%c512, %c0_20] : memref<1024x512xbf16, #tpu.memory_space<vmem>>, vector<512x512xbf16>
    %c4 = arith.constant 4 : index
    %c0_21 = arith.constant 0 : index
    %29 = vector.load %arg3[%c4, %c0_21] : memref<16x512xf32, #tpu.memory_space<vmem>>, vector<1x512xf32>
    %c0_22 = arith.constant 0 : index
    %c64 = arith.constant 64 : index
    %30 = vector.load %arg6[%c0_22, %c64] : memref<512x128xbf16, #tpu.memory_space<vmem>>, vector<512x64xbf16>
    %c5 = arith.constant 5 : index
    %c0_23 = arith.constant 0 : index
    %31 = vector.load %arg3[%c5, %c0_23] : memref<16x512xf32, #tpu.memory_space<vmem>>, vector<1x64xf32>
    %32 = arith.truncf %1 : vector<16x24xf32> to vector<16x24xbf16>
    %cst_24 = arith.constant dense<0.000000e+00> : vector<16x512xf32>
    %33 = tpu.matmul %32, %26, %cst_24 {dimension_numbers = #tpu.dot_dimension_numbers<[1], [0], [0], [1], [0, 0, 1, 1], [], []>} : vector<16x24xbf16>, vector<24x512xbf16>, vector<16x512xf32> -> vector<16x512xf32>
    %34 = vector.broadcast %27 : vector<1x512xf32> to vector<16x512xf32>
    %35 = arith.addf %33, %34 : vector<16x512xf32>
    %cst_25 = arith.constant 0.000000e+00 : f32
    %36 = vector.broadcast %cst_25 : f32 to vector<16x512xf32>
    %37 = arith.maximumf %35, %36 : vector<16x512xf32>
    %38 = arith.truncf %37 : vector<16x512xf32> to vector<16x512xbf16>
    %cst_26 = arith.constant dense<0.000000e+00> : vector<16x512xf32>
    %39 = tpu.matmul %38, %28, %cst_26 {dimension_numbers = #tpu.dot_dimension_numbers<[1], [0], [0], [1], [0, 0, 1, 1], [], []>} : vector<16x512xbf16>, vector<512x512xbf16>, vector<16x512xf32> -> vector<16x512xf32>
    %40 = vector.broadcast %29 : vector<1x512xf32> to vector<16x512xf32>
    %41 = arith.addf %39, %40 : vector<16x512xf32>
    %cst_27 = arith.constant 0.000000e+00 : f32
    %42 = vector.broadcast %cst_27 : f32 to vector<16x512xf32>
    %43 = arith.maximumf %41, %42 : vector<16x512xf32>
    %44 = arith.truncf %43 : vector<16x512xf32> to vector<16x512xbf16>
    %cst_28 = arith.constant dense<0.000000e+00> : vector<16x64xf32>
    %45 = tpu.matmul %44, %30, %cst_28 {dimension_numbers = #tpu.dot_dimension_numbers<[1], [0], [0], [1], [0, 0, 1, 1], [], []>} : vector<16x512xbf16>, vector<512x64xbf16>, vector<16x64xf32> -> vector<16x64xf32>
    %46 = vector.broadcast %31 : vector<1x64xf32> to vector<16x64xf32>
    %47 = arith.addf %45, %46 : vector<16x64xf32>
    %c0_29 = arith.constant 0 : index
    %c0_30 = arith.constant 0 : index
    %48 = vector.load %arg2[%c0_29, %c0_30] : memref<104x64xf32, #tpu.memory_space<vmem>>, vector<4x16xf32>
    %cst_31 = arith.constant dense<0.000000e+00> : vector<4x64xf32>
    %49 = tpu.matmul %48, %25, %cst_31 {dimension_numbers = #tpu.dot_dimension_numbers<[1], [0], [0], [1], [0, 0, 1, 1], [], []>} : vector<4x16xf32>, vector<16x64xf32>, vector<4x64xf32> -> vector<4x64xf32>
    %cst_32 = arith.constant dense<0.000000e+00> : vector<4x64xf32>
    %50 = tpu.matmul %48, %47, %cst_32 {dimension_numbers = #tpu.dot_dimension_numbers<[1], [0], [0], [1], [0, 0, 1, 1], [], []>} : vector<4x16xf32>, vector<16x64xf32>, vector<4x64xf32> -> vector<4x64xf32>
    %51 = arith.truncf %49 : vector<4x64xf32> to vector<4x64xbf16>
    %c0_33 = arith.constant 0 : index
    %c0_34 = arith.constant 0 : index
    %52 = vector.load %arg7[%c0_33, %c0_34] : memref<256x64xbf16, #tpu.memory_space<vmem>>, vector<64x64xbf16>
    %cst_35 = arith.constant dense<0.000000e+00> : vector<4x64xf32>
    %53 = tpu.matmul %51, %52, %cst_35 {dimension_numbers = #tpu.dot_dimension_numbers<[1], [0], [0], [1], [0, 0, 1, 1], [], []>} : vector<4x64xbf16>, vector<64x64xbf16>, vector<4x64xf32> -> vector<4x64xf32>
    %54 = arith.truncf %50 : vector<4x64xf32> to vector<4x64xbf16>
    %c64_36 = arith.constant 64 : index
    %c0_37 = arith.constant 0 : index
    %55 = vector.load %arg7[%c64_36, %c0_37] : memref<256x64xbf16, #tpu.memory_space<vmem>>, vector<64x64xbf16>
    %cst_38 = arith.constant dense<0.000000e+00> : vector<4x64xf32>
    %56 = tpu.matmul %54, %55, %cst_38 {dimension_numbers = #tpu.dot_dimension_numbers<[1], [0], [0], [1], [0, 0, 1, 1], [], []>} : vector<4x64xbf16>, vector<64x64xbf16>, vector<4x64xf32> -> vector<4x64xf32>
    %57 = arith.addf %53, %56 : vector<4x64xf32>
    %c6 = arith.constant 6 : index
    %c0_39 = arith.constant 0 : index
    %58 = vector.load %arg3[%c6, %c0_39] : memref<16x512xf32, #tpu.memory_space<vmem>>, vector<1x64xf32>
    %59 = vector.broadcast %58 : vector<1x64xf32> to vector<4x64xf32>
    %60 = arith.addf %57, %59 : vector<4x64xf32>
    %cst_40 = arith.constant 0.000000e+00 : f32
    %61 = vector.broadcast %cst_40 : f32 to vector<4x64xf32>
    %62 = arith.maximumf %60, %61 : vector<4x64xf32>
    %63 = arith.truncf %62 : vector<4x64xf32> to vector<4x64xbf16>
    %c128 = arith.constant 128 : index
    %c0_41 = arith.constant 0 : index
    %64 = vector.load %arg7[%c128, %c0_41] : memref<256x64xbf16, #tpu.memory_space<vmem>>, vector<64x64xbf16>
    %cst_42 = arith.constant dense<0.000000e+00> : vector<4x64xf32>
    %65 = tpu.matmul %63, %64, %cst_42 {dimension_numbers = #tpu.dot_dimension_numbers<[1], [0], [0], [1], [0, 0, 1, 1], [], []>} : vector<4x64xbf16>, vector<64x64xbf16>, vector<4x64xf32> -> vector<4x64xf32>
    %c7 = arith.constant 7 : index
    %c0_43 = arith.constant 0 : index
    %66 = vector.load %arg3[%c7, %c0_43] : memref<16x512xf32, #tpu.memory_space<vmem>>, vector<1x64xf32>
    %67 = vector.broadcast %66 : vector<1x64xf32> to vector<4x64xf32>
    %68 = arith.addf %65, %67 : vector<4x64xf32>
    %cst_44 = arith.constant 0.000000e+00 : f32
    %69 = vector.broadcast %cst_44 : f32 to vector<4x64xf32>
    %70 = arith.maximumf %68, %69 : vector<4x64xf32>
    %71 = arith.truncf %70 : vector<4x64xf32> to vector<4x64xbf16>
    %c192 = arith.constant 192 : index
    %c0_45 = arith.constant 0 : index
    %72 = vector.load %arg7[%c192, %c0_45] : memref<256x64xbf16, #tpu.memory_space<vmem>>, vector<64x3xbf16>
    %cst_46 = arith.constant dense<0.000000e+00> : vector<4x3xf32>
    %73 = tpu.matmul %71, %72, %cst_46 {dimension_numbers = #tpu.dot_dimension_numbers<[1], [0], [0], [1], [0, 0, 1, 1], [], []>} : vector<4x64xbf16>, vector<64x3xbf16>, vector<4x3xf32> -> vector<4x3xf32>
    %c8 = arith.constant 8 : index
    %c0_47 = arith.constant 0 : index
    %74 = vector.load %arg3[%c8, %c0_47] : memref<16x512xf32, #tpu.memory_space<vmem>>, vector<1x3xf32>
    %75 = vector.broadcast %74 : vector<1x3xf32> to vector<4x3xf32>
    %76 = arith.addf %73, %75 : vector<4x3xf32>
    %77 = arith.truncf %2 : vector<40x72xf32> to vector<40x72xbf16>
    %c0_48 = arith.constant 0 : index
    %c0_49 = arith.constant 0 : index
    %78 = vector.load %arg8[%c0_48, %c0_49] : memref<864x48xbf16, #tpu.memory_space<vmem>>, vector<72x48xbf16>
    %cst_50 = arith.constant dense<0.000000e+00> : vector<40x48xf32>
    %79 = tpu.matmul %77, %78, %cst_50 {dimension_numbers = #tpu.dot_dimension_numbers<[1], [0], [0], [1], [0, 0, 1, 1], [], []>} : vector<40x72xbf16>, vector<72x48xbf16>, vector<40x48xf32> -> vector<40x48xf32>
    %c9 = arith.constant 9 : index
    %c0_51 = arith.constant 0 : index
    %80 = vector.load %arg3[%c9, %c0_51] : memref<16x512xf32, #tpu.memory_space<vmem>>, vector<1x48xf32>
    %81 = vector.broadcast %80 : vector<1x48xf32> to vector<40x48xf32>
    %82 = arith.addf %79, %81 : vector<40x48xf32>
    %cst_52 = arith.constant 0.000000e+00 : f32
    %83 = vector.broadcast %cst_52 : f32 to vector<40x48xf32>
    %84 = arith.maximumf %82, %83 : vector<40x48xf32>
    %85 = arith.truncf %84 : vector<40x48xf32> to vector<40x48xbf16>
    %c504 = arith.constant 504 : index
    %c0_53 = arith.constant 0 : index
    %86 = vector.load %arg8[%c504, %c0_53] : memref<864x48xbf16, #tpu.memory_space<vmem>>, vector<360x40xbf16>
    %cst_54 = arith.constant dense<0.000000e+00> : vector<360x48xf32>
    %87 = tpu.matmul %86, %85, %cst_54 {dimension_numbers = #tpu.dot_dimension_numbers<[1], [0], [0], [1], [0, 0, 1, 1], [], []>} : vector<360x40xbf16>, vector<40x48xbf16>, vector<360x48xf32> -> vector<360x48xf32>
    %88 = arith.truncf %87 : vector<360x48xf32> to vector<360x48xbf16>
    %89 = vector.extract_strided_slice %88 {offsets = [0, 0], sizes = [40, 48], strides = [1, 1]} : vector<360x48xbf16> to vector<40x48xbf16>
    %c72_55 = arith.constant 72 : index
    %c0_56 = arith.constant 0 : index
    %90 = vector.load %arg8[%c72_55, %c0_56] : memref<864x48xbf16, #tpu.memory_space<vmem>>, vector<48x24xbf16>
    %cst_57 = arith.constant dense<0.000000e+00> : vector<40x24xf32>
    %91 = tpu.matmul %89, %90, %cst_57 {dimension_numbers = #tpu.dot_dimension_numbers<[1], [0], [0], [1], [0, 0, 1, 1], [], []>} : vector<40x48xbf16>, vector<48x24xbf16>, vector<40x24xf32> -> vector<40x24xf32>
    %92 = vector.extract_strided_slice %88 {offsets = [40, 0], sizes = [40, 48], strides = [1, 1]} : vector<360x48xbf16> to vector<40x48xbf16>
    %c120 = arith.constant 120 : index
    %c0_58 = arith.constant 0 : index
    %93 = vector.load %arg8[%c120, %c0_58] : memref<864x48xbf16, #tpu.memory_space<vmem>>, vector<48x24xbf16>
    %cst_59 = arith.constant dense<0.000000e+00> : vector<40x24xf32>
    %94 = tpu.matmul %92, %93, %cst_59 {dimension_numbers = #tpu.dot_dimension_numbers<[1], [0], [0], [1], [0, 0, 1, 1], [], []>} : vector<40x48xbf16>, vector<48x24xbf16>, vector<40x24xf32> -> vector<40x24xf32>
    %95 = vector.extract_strided_slice %88 {offsets = [80, 0], sizes = [40, 48], strides = [1, 1]} : vector<360x48xbf16> to vector<40x48xbf16>
    %c168 = arith.constant 168 : index
    %c0_60 = arith.constant 0 : index
    %96 = vector.load %arg8[%c168, %c0_60] : memref<864x48xbf16, #tpu.memory_space<vmem>>, vector<48x24xbf16>
    %cst_61 = arith.constant dense<0.000000e+00> : vector<40x24xf32>
    %97 = tpu.matmul %95, %96, %cst_61 {dimension_numbers = #tpu.dot_dimension_numbers<[1], [0], [0], [1], [0, 0, 1, 1], [], []>} : vector<40x48xbf16>, vector<48x24xbf16>, vector<40x24xf32> -> vector<40x24xf32>
    %98 = vector.extract_strided_slice %88 {offsets = [120, 0], sizes = [40, 48], strides = [1, 1]} : vector<360x48xbf16> to vector<40x48xbf16>
    %c216 = arith.constant 216 : index
    %c0_62 = arith.constant 0 : index
    %99 = vector.load %arg8[%c216, %c0_62] : memref<864x48xbf16, #tpu.memory_space<vmem>>, vector<48x24xbf16>
    %cst_63 = arith.constant dense<0.000000e+00> : vector<40x24xf32>
    %100 = tpu.matmul %98, %99, %cst_63 {dimension_numbers = #tpu.dot_dimension_numbers<[1], [0], [0], [1], [0, 0, 1, 1], [], []>} : vector<40x48xbf16>, vector<48x24xbf16>, vector<40x24xf32> -> vector<40x24xf32>
    %101 = vector.extract_strided_slice %88 {offsets = [160, 0], sizes = [40, 48], strides = [1, 1]} : vector<360x48xbf16> to vector<40x48xbf16>
    %c264 = arith.constant 264 : index
    %c0_64 = arith.constant 0 : index
    %102 = vector.load %arg8[%c264, %c0_64] : memref<864x48xbf16, #tpu.memory_space<vmem>>, vector<48x24xbf16>
    %cst_65 = arith.constant dense<0.000000e+00> : vector<40x24xf32>
    %103 = tpu.matmul %101, %102, %cst_65 {dimension_numbers = #tpu.dot_dimension_numbers<[1], [0], [0], [1], [0, 0, 1, 1], [], []>} : vector<40x48xbf16>, vector<48x24xbf16>, vector<40x24xf32> -> vector<40x24xf32>
    %104 = vector.extract_strided_slice %88 {offsets = [200, 0], sizes = [40, 48], strides = [1, 1]} : vector<360x48xbf16> to vector<40x48xbf16>
    %c312 = arith.constant 312 : index
    %c0_66 = arith.constant 0 : index
    %105 = vector.load %arg8[%c312, %c0_66] : memref<864x48xbf16, #tpu.memory_space<vmem>>, vector<48x24xbf16>
    %cst_67 = arith.constant dense<0.000000e+00> : vector<40x24xf32>
    %106 = tpu.matmul %104, %105, %cst_67 {dimension_numbers = #tpu.dot_dimension_numbers<[1], [0], [0], [1], [0, 0, 1, 1], [], []>} : vector<40x48xbf16>, vector<48x24xbf16>, vector<40x24xf32> -> vector<40x24xf32>
    %107 = vector.extract_strided_slice %88 {offsets = [240, 0], sizes = [40, 48], strides = [1, 1]} : vector<360x48xbf16> to vector<40x48xbf16>
    %c360 = arith.constant 360 : index
    %c0_68 = arith.constant 0 : index
    %108 = vector.load %arg8[%c360, %c0_68] : memref<864x48xbf16, #tpu.memory_space<vmem>>, vector<48x24xbf16>
    %cst_69 = arith.constant dense<0.000000e+00> : vector<40x24xf32>
    %109 = tpu.matmul %107, %108, %cst_69 {dimension_numbers = #tpu.dot_dimension_numbers<[1], [0], [0], [1], [0, 0, 1, 1], [], []>} : vector<40x48xbf16>, vector<48x24xbf16>, vector<40x24xf32> -> vector<40x24xf32>
    %110 = vector.extract_strided_slice %88 {offsets = [280, 0], sizes = [40, 48], strides = [1, 1]} : vector<360x48xbf16> to vector<40x48xbf16>
    %c408 = arith.constant 408 : index
    %c0_70 = arith.constant 0 : index
    %111 = vector.load %arg8[%c408, %c0_70] : memref<864x48xbf16, #tpu.memory_space<vmem>>, vector<48x24xbf16>
    %cst_71 = arith.constant dense<0.000000e+00> : vector<40x24xf32>
    %112 = tpu.matmul %110, %111, %cst_71 {dimension_numbers = #tpu.dot_dimension_numbers<[1], [0], [0], [1], [0, 0, 1, 1], [], []>} : vector<40x48xbf16>, vector<48x24xbf16>, vector<40x24xf32> -> vector<40x24xf32>
    %113 = vector.extract_strided_slice %88 {offsets = [320, 0], sizes = [40, 48], strides = [1, 1]} : vector<360x48xbf16> to vector<40x48xbf16>
    %c456 = arith.constant 456 : index
    %c0_72 = arith.constant 0 : index
    %114 = vector.load %arg8[%c456, %c0_72] : memref<864x48xbf16, #tpu.memory_space<vmem>>, vector<48x24xbf16>
    %cst_73 = arith.constant dense<0.000000e+00> : vector<40x24xf32>
    %115 = tpu.matmul %113, %114, %cst_73 {dimension_numbers = #tpu.dot_dimension_numbers<[1], [0], [0], [1], [0, 0, 1, 1], [], []>} : vector<40x48xbf16>, vector<48x24xbf16>, vector<40x24xf32> -> vector<40x24xf32>
    %116 = arith.addf %91, %94 : vector<40x24xf32>
    %117 = arith.addf %97, %100 : vector<40x24xf32>
    %118 = arith.addf %116, %117 : vector<40x24xf32>
    %119 = arith.addf %103, %106 : vector<40x24xf32>
    %120 = arith.addf %109, %112 : vector<40x24xf32>
    %121 = arith.addf %119, %120 : vector<40x24xf32>
    %122 = arith.addf %118, %121 : vector<40x24xf32>
    %123 = arith.addf %122, %115 : vector<40x24xf32>
    %c10 = arith.constant 10 : index
    %c0_74 = arith.constant 0 : index
    %124 = vector.load %arg3[%c10, %c0_74] : memref<16x512xf32, #tpu.memory_space<vmem>>, vector<1x24xf32>
    %125 = vector.broadcast %124 : vector<1x24xf32> to vector<40x24xf32>
    %126 = arith.addf %123, %125 : vector<40x24xf32>
    %c8_75 = arith.constant 8 : index
    %c0_76 = arith.constant 0 : index
    %127 = vector.load %arg2[%c8_75, %c0_76] : memref<104x64xf32, #tpu.memory_space<vmem>>, vector<12x40xf32>
    %cst_77 = arith.constant dense<0.000000e+00> : vector<12x24xf32>
    %128 = tpu.matmul %127, %126, %cst_77 {dimension_numbers = #tpu.dot_dimension_numbers<[1], [0], [0], [1], [0, 0, 1, 1], [], []>} : vector<12x40xf32>, vector<40x24xf32>, vector<12x24xf32> -> vector<12x24xf32>
    %129 = arith.subf %128, %3 : vector<12x24xf32>
    %130 = arith.mulf %129, %129 : vector<12x24xf32>
    %c24_78 = arith.constant 24 : index
    %c0_79 = arith.constant 0 : index
    %131 = vector.load %arg2[%c24_78, %c0_79] : memref<104x64xf32, #tpu.memory_space<vmem>>, vector<4x12xf32>
    %cst_80 = arith.constant dense<0.000000e+00> : vector<4x24xf32>
    %132 = tpu.matmul %131, %130, %cst_80 {dimension_numbers = #tpu.dot_dimension_numbers<[1], [0], [0], [1], [0, 0, 1, 1], [], []>} : vector<4x12xf32>, vector<12x24xf32>, vector<4x24xf32> -> vector<4x24xf32>
    %c32_81 = arith.constant 32 : index
    %c0_82 = arith.constant 0 : index
    %133 = vector.load %arg2[%c32_81, %c0_82] : memref<104x64xf32, #tpu.memory_space<vmem>>, vector<24x3xf32>
    %cst_83 = arith.constant dense<0.000000e+00> : vector<4x3xf32>
    %134 = tpu.matmul %132, %133, %cst_83 {dimension_numbers = #tpu.dot_dimension_numbers<[1], [0], [0], [1], [0, 0, 1, 1], [], []>} : vector<4x24xf32>, vector<24x3xf32>, vector<4x3xf32> -> vector<4x3xf32>
    %cst_84 = arith.constant -5.000000e-01 : f32
    %135 = vector.broadcast %cst_84 : f32 to vector<4x3xf32>
    %136 = arith.mulf %135, %134 : vector<4x3xf32>
    %cst_85 = arith.constant dense<0xFF800000> : vector<4xf32>
    %137 = vector.multi_reduction <maximumf>, %76, %cst_85 [1] : vector<4x3xf32> to vector<4xf32>
    %138 = vector.shape_cast %137 : vector<4xf32> to vector<4x1xf32>
    %139 = vector.broadcast %138 : vector<4x1xf32> to vector<4x3xf32>
    %140 = arith.subf %76, %139 : vector<4x3xf32>
    %141 = math.exp %140 : vector<4x3xf32>
    %cst_86 = arith.constant dense<0.000000e+00> : vector<4xf32>
    %142 = vector.multi_reduction <add>, %141, %cst_86 [1] : vector<4x3xf32> to vector<4xf32>
    %143 = vector.shape_cast %142 : vector<4xf32> to vector<4x1xf32>
    %144 = math.log %143 : vector<4x1xf32>
    %145 = arith.addf %138, %144 : vector<4x1xf32>
    %146 = vector.broadcast %145 : vector<4x1xf32> to vector<4x3xf32>
    %147 = arith.subf %76, %146 : vector<4x3xf32>
    %148 = arith.addf %136, %147 : vector<4x3xf32>
    %cst_87 = arith.constant 1.000000e+00 : f32
    %149 = vector.broadcast %cst_87 : f32 to vector<4x3xf32>
    %150 = arith.mulf %148, %149 : vector<4x3xf32>
    %cst_88 = arith.constant dense<0xFF800000> : vector<4xf32>
    %151 = vector.multi_reduction <maximumf>, %150, %cst_88 [1] : vector<4x3xf32> to vector<4xf32>
    %152 = vector.shape_cast %151 : vector<4xf32> to vector<4x1xf32>
    %153 = vector.broadcast %152 : vector<4x1xf32> to vector<4x3xf32>
    %154 = arith.subf %150, %153 : vector<4x3xf32>
    %155 = math.exp %154 : vector<4x3xf32>
    %cst_89 = arith.constant dense<0.000000e+00> : vector<4xf32>
    %156 = vector.multi_reduction <add>, %155, %cst_89 [1] : vector<4x3xf32> to vector<4xf32>
    %157 = vector.shape_cast %156 : vector<4xf32> to vector<4x1xf32>
    %158 = tpu.reciprocal %157 {approx = true} : vector<4x1xf32> -> vector<4x1xf32>
    %159 = vector.broadcast %158 : vector<4x1xf32> to vector<4x3xf32>
    %160 = arith.mulf %155, %159 : vector<4x3xf32>
    %c56 = arith.constant 56 : index
    %c0_90 = arith.constant 0 : index
    %161 = vector.load %arg2[%c56, %c0_90] : memref<104x64xf32, #tpu.memory_space<vmem>>, vector<12x4xf32>
    %cst_91 = arith.constant dense<0.000000e+00> : vector<12x3xf32>
    %162 = tpu.matmul %161, %160, %cst_91 {dimension_numbers = #tpu.dot_dimension_numbers<[1], [0], [0], [1], [0, 0, 1, 1], [], []>} : vector<12x4xf32>, vector<4x3xf32>, vector<12x3xf32> -> vector<12x3xf32>
    %c72_92 = arith.constant 72 : index
    %c0_93 = arith.constant 0 : index
    %163 = vector.load %arg2[%c72_92, %c0_93] : memref<104x64xf32, #tpu.memory_space<vmem>>, vector<3x24xf32>
    %cst_94 = arith.constant dense<0.000000e+00> : vector<12x24xf32>
    %164 = tpu.matmul %162, %163, %cst_94 {dimension_numbers = #tpu.dot_dimension_numbers<[1], [0], [0], [1], [0, 0, 1, 1], [], []>} : vector<12x3xf32>, vector<3x24xf32>, vector<12x24xf32> -> vector<12x24xf32>
    %165 = arith.mulf %128, %164 : vector<12x24xf32>
    %c80 = arith.constant 80 : index
    %c0_95 = arith.constant 0 : index
    %166 = vector.load %arg2[%c80, %c0_95] : memref<104x64xf32, #tpu.memory_space<vmem>>, vector<24x8xf32>
    %cst_96 = arith.constant dense<0.000000e+00> : vector<12x8xf32>
    %167 = tpu.matmul %165, %166, %cst_96 {dimension_numbers = #tpu.dot_dimension_numbers<[1], [0], [0], [1], [0, 0, 1, 1], [], []>} : vector<12x24xf32>, vector<24x8xf32>, vector<12x8xf32> -> vector<12x8xf32>
    %cst_97 = arith.constant 0.000000e+00 : f32
    %168 = vector.broadcast %cst_97 : f32 to vector<16x128xf32>
    %c0_98 = arith.constant 0 : index
    %c0_99 = arith.constant 0 : index
    %169 = vector.load %arg9[%c0_98, %c0_99] : memref<16x128xf32, #tpu.memory_space<vmem>>, vector<16x128xf32>
    tpu.vector_store %arg9[%c0_98, %c0_99], %168 {strides = array<i32>} : memref<16x128xf32, #tpu.memory_space<vmem>>, vector<16x128xf32>,
    %c0_100 = arith.constant 0 : index
    %c0_101 = arith.constant 0 : index
    %170 = vector.load %arg9[%c0_100, %c0_101] : memref<16x128xf32, #tpu.memory_space<vmem>>, vector<12x8xf32>
    tpu.vector_store %arg9[%c0_100, %c0_101], %167 {strides = array<i32>} : memref<16x128xf32, #tpu.memory_space<vmem>>, vector<12x8xf32>,
    %c0_102 = arith.constant 0 : index
    %c16_103 = arith.constant 16 : index
    %171 = vector.load %arg9[%c0_102, %c16_103] : memref<16x128xf32, #tpu.memory_space<vmem>>, vector<4x3xf32>
    tpu.vector_store %arg9[%c0_102, %c16_103], %76 {strides = array<i32>} : memref<16x128xf32, #tpu.memory_space<vmem>>, vector<4x3xf32>,
    %c0_104 = arith.constant 0 : index
    %c32_105 = arith.constant 32 : index
    %172 = vector.load %arg9[%c0_104, %c32_105] : memref<16x128xf32, #tpu.memory_space<vmem>>, vector<4x3xf32>
    tpu.vector_store %arg9[%c0_104, %c32_105], %148 {strides = array<i32>} : memref<16x128xf32, #tpu.memory_space<vmem>>, vector<4x3xf32>,
    %c0_106 = arith.constant 0 : index
    %c48 = arith.constant 48 : index
    %173 = vector.load %arg9[%c0_106, %c48] : memref<16x128xf32, #tpu.memory_space<vmem>>, vector<4x3xf32>
    tpu.vector_store %arg9[%c0_106, %c48], %160 {strides = array<i32>} : memref<16x128xf32, #tpu.memory_space<vmem>>, vector<4x3xf32>,
    return
  }
  func.func @transform_0(%arg0: i32) -> (i32, i32) {
    %c0_i32 = arith.constant 0 : i32
    %c0_i32_0 = arith.constant 0 : i32
    %c0_i32_1 = arith.constant 0 : i32
    return %c0_i32, %c0_i32_0 : i32, i32
  }
  func.func @transform_1(%arg0: i32) -> (i32, i32) {
    %c0_i32 = arith.constant 0 : i32
    %c0_i32_0 = arith.constant 0 : i32
    %c0_i32_1 = arith.constant 0 : i32
    return %c0_i32, %c0_i32_0 : i32, i32
  }
  func.func @transform_2(%arg0: i32) -> (i32, i32) {
    %c0_i32 = arith.constant 0 : i32
    %c0_i32_0 = arith.constant 0 : i32
    %c0_i32_1 = arith.constant 0 : i32
    return %c0_i32, %c0_i32_0 : i32, i32
  }
  func.func @transform_3(%arg0: i32) -> (i32, i32) {
    %c0_i32 = arith.constant 0 : i32
    %c0_i32_0 = arith.constant 0 : i32
    %c0_i32_1 = arith.constant 0 : i32
    return %c0_i32, %c0_i32_0 : i32, i32
  }
  func.func @transform_4(%arg0: i32) -> (i32, i32) {
    %c0_i32 = arith.constant 0 : i32
    %c0_i32_0 = arith.constant 0 : i32
    %c0_i32_1 = arith.constant 0 : i32
    return %c0_i32, %c0_i32_0 : i32, i32
  }
  func.func @transform_5(%arg0: i32) -> (i32, i32) {
    %c0_i32 = arith.constant 0 : i32
    %c0_i32_0 = arith.constant 0 : i32
    %c0_i32_1 = arith.constant 0 : i32
    return %c0_i32, %c0_i32_0 : i32, i32
  }
  func.func @transform_6(%arg0: i32) -> (i32, i32) {
    %c0_i32 = arith.constant 0 : i32
    %c0_i32_0 = arith.constant 0 : i32
    %c0_i32_1 = arith.constant 0 : i32
    return %c0_i32, %c0_i32_0 : i32, i32
  }
  func.func @transform_7(%arg0: i32) -> (i32, i32) {
    %c0_i32 = arith.constant 0 : i32
    %c0_i32_0 = arith.constant 0 : i32
    %c0_i32_1 = arith.constant 0 : i32
    return %c0_i32, %c0_i32_0 : i32, i32
  }
  func.func @transform_8(%arg0: i32) -> (i32, i32) {
    %c0_i32 = arith.constant 0 : i32
    %c0_i32_0 = arith.constant 0 : i32
    %c0_i32_1 = arith.constant 0 : i32
    return %c0_i32, %c0_i32_0 : i32, i32
  }
}

</mosaic_0001>

<bundles_post_ra>
// kernel: _lambda_.1
= control target key start
LH: loop header
LB: loop body
LE: loop exit
PB: predicated region body
PF: predicated region fallthrough
CT: control target
= control target key end

     0   :  { %v6973_v1 = vmov 0   ;;  %vm299_vm0 = vcmask 1043456   ;;  %vm295_vm1 = vcmask 195584   ;;  %s6974_s18 = smov 64   ;;  %vm2857_vm2 = vcmask 130048   ;;  %s6978_s16 = smov 16   ;;  %s8894_s3 = inlined_call_operand.vmem [shape: bf16[48,512], index: 3, kind: input, shape index: {}]   ;;  %s8895_s0 = inlined_call_operand.vmem [shape: f32[88,128], index: 0, kind: input, shape index: {}]   ;;  %s8896_s4 = inlined_call_operand.vmem [shape: bf16[1024,512], index: 4, kind: input, shape index: {}]   ;;  %s8897_s5 = inlined_call_operand.vmem [shape: bf16[512,128], index: 5, kind: input, shape index: {}]   ;;  %s8898_s2 = inlined_call_operand.vmem [shape: f32[16,512], index: 2, kind: input, shape index: {}]   ;;  %s8899_s1 = inlined_call_operand.vmem [shape: f32[104,64], index: 1, kind: input, shape index: {}]   ;;  %s8900_s6 = inlined_call_operand.vmem [shape: bf16[256,64], index: 6, kind: input, shape index: {}]   ;;  %s8901_s7 = inlined_call_operand.vmem [shape: bf16[864,48], index: 7, kind: input, shape index: {}]   ;;  %s8902_s8 = inlined_call_operand.vmem [shape: f32[16,128], index: 8, kind: output, shape index: {}]  }
   0x1   :  { %v6458_v0 = vld [vmem:[%s8894_s3 + $0x4] ss:$16 sps:$4 sm:$0xff]   ;;  %344 = vmatprep.mubr.bf16.mxu0 %v6973_v1  ;;  %387 = vmatprep.mubr.bf16.mxu1 %v6973_v1  ;;  %v6460_v2 = vld [vmem:[%s8894_s3] ss:$16 sps:$4 sm:$0xff]   ;;  %v31_v7 = vld [vmem:[%s8895_s0 + $0x8] sm:$0xff]  ;;  %vm6976_vm3 = vmmov 0  }
   0x2   :  { %v45_v3 = vld [vmem:[%s8894_s3 + $0x20] sm:$0xff]  ;;  %312 = vmatprep.subr.bf16.mxu0 %v6458_v0  ;;  %v6463_v8 = vld [vmem:[%s8894_s3 + $0xc] ss:$16 sps:$4 sm:$0xff]   ;;  %v6465_v9 = vld [vmem:[%s8894_s3 + $0x8] ss:$16 sps:$4 sm:$0xff]   ;;  %vm3043_vm4 = vcmask 523264  }
   0x3   :  { %v30_v4 = vld [vmem:[%s8895_s0] sm:$0xff]  ;;  %v5321_v5 = vcombine.high %v45_v3, %v45_v3  ;;  %v5320_v6 = vcombine.low %v45_v3, %v45_v3  ;;  %313 = vmatpush1.bf16.msra.mxu0 %v6460_v2  ;;  %v46_v10 = vld [vmem:[%s8894_s3 + $0x28] sm:$0xff]  ;;  %355 = vmatprep.subr.bf16.mxu1 %v6463_v8  ;;  %vm3352_vm5 = vcmask 588800   ;;  %vm3587_vm6 = vcmask 326656   ;;  %s6980_s28 = smov 32   ;;  %s6981_s12 = smov 48  }
   0x4   :  { %v5323_v12 = vcombine.high %v46_v10, %v46_v10  ;;  %v5322_v13 = vcombine.low %v46_v10, %v46_v10  ;;  %v6470_v14 = vld [vmem:[%s8896_s4 + $0x4] ss:$16 sps:$4 sm:$0xff]   ;;  %v243_v15 = vpack.c.bf16 %v31_v7, %v30_v4  ;;  %356 = vmatpush1.bf16.msra.mxu1 %v6465_v9  ;;  %v6468_v17 = vld [vmem:[%s8896_s4] ss:$16 sps:$4 sm:$0xff]   ;;  %v6473_v18 = vld [vmem:[%s8896_s4 + $0xc] ss:$16 sps:$4 sm:$0xff]  }
   0x5   :  { %5324 = vmatprep.subr.msk.bf16.mxu0 %vm299_vm0, %v5321_v5  ;;  %v301_v11 = vsel %vm299_vm0, %v5320_v6, 0  ;;  %v6476_v19 = vld [vmem:[%s8896_s4 + $0x24] ss:$16 sps:$4 sm:$0xff]   ;;  %v6471_v20 = vld [vmem:[%s8896_s4 + $0x8] ss:$16 sps:$4 sm:$0xff]   ;;  %vm5002_vm7 = vcmask 19456  }
   0x6   :  { %5326 = vmatprep.subr.msk.bf16.mxu1 %vm299_vm0, %v5323_v12  ;;  %v307_v16 = vsel %vm299_vm0, %v5322_v13, 0  ;;  %v6474_v21 = vld [vmem:[%s8896_s4 + $0x20] ss:$16 sps:$4 sm:$0xff]   ;;  %v6479_v22 = vld [vmem:[%s8896_s4 + $0x2c] ss:$16 sps:$4 sm:$0xff]   ;;  %vm3938_vm8 = vcmask 392192  }
   0x7   :  { %315 = vmatpush1.bf16.msra.mxu0 %v301_v11  ;;  %v6482_v23 = vld [vmem:[%s8896_s4 + $0x44] ss:$16 sps:$4 sm:$0xff]   ;;  %v6477_v24 = vld [vmem:[%s8896_s4 + $0x28] ss:$16 sps:$4 sm:$0xff]   ;;  %v6480_v25 = vld [vmem:[%s8896_s4 + $0x40] ss:$16 sps:$4 sm:$0xff]  }
   0x8   :  { %1071 = vmatprep.subr.bf16.mxu0 %v6470_v14  ;;  %358 = vmatpush1.bf16.msra.mxu1 %v307_v16  ;;  %v6485_v26 = vld [vmem:[%s8896_s4 + $0x4c] ss:$16 sps:$4 sm:$0xff]   ;;  %v6488_v27 = vld [vmem:[%s8896_s4 + $0x64] ss:$16 sps:$4 sm:$0xff]   ;;  %v6483_v28 = vld [vmem:[%s8896_s4 + $0x48] ss:$16 sps:$4 sm:$0xff]  }
   0x9   :  { %1157 = vmatprep.subr.bf16.mxu1 %v6473_v18  ;;  %v6486_v29 = vld [vmem:[%s8896_s4 + $0x60] ss:$16 sps:$4 sm:$0xff]   ;;  %v6491_v30 = vld [vmem:[%s8896_s4 + $0x6c] ss:$16 sps:$4 sm:$0xff]   ;;  %v6494_v31 = vld [vmem:[%s8896_s4 + $0x84] ss:$16 sps:$4 sm:$0xff]  }
   0xa   :  { %5325 = vmatmul.mubr.msk.bf16.vlgmr.msra.gmra.mrb[0].mxu0 %vm295_vm1, %v243_v15  ;;  %v6489_v32 = vld [vmem:[%s8896_s4 + $0x68] ss:$16 sps:$4 sm:$0xff]   ;;  %v6492_v33 = vld [vmem:[%s8896_s4 + $0x80] ss:$16 sps:$4 sm:$0xff]   ;;  %v6497_v34 = vld [vmem:[%s8896_s4 + $0x8c] ss:$16 sps:$4 sm:$0xff]  }
   0xb   :  { %1072 = vmatpush1.bf16.msra.mxu0 %v6468_v17  ;;  %5327 = vmatmul.mubr.msk.bf16.vlgmr.msra.gmra.mrb[0].mxu1 %vm295_vm1, %v243_v15  ;;  %v6500_v35 = vld [vmem:[%s8896_s4 + $0xa4] ss:$16 sps:$4 sm:$0xff]   ;;  %v6495_v36 = vld [vmem:[%s8896_s4 + $0x88] ss:$16 sps:$4 sm:$0xff]   ;;  %v6498_v37 = vld [vmem:[%s8896_s4 + $0xa0] ss:$16 sps:$4 sm:$0xff]  }
   0xc   :  { %1073 = vmatprep.subr.bf16.mxu0 %v6476_v19  ;;  %1158 = vmatpush1.bf16.msra.mxu1 %v6471_v20  ;;  %v6503_v38 = vld [vmem:[%s8896_s4 + $0xac] ss:$16 sps:$4 sm:$0xff]   ;;  %v6506_v39 = vld [vmem:[%s8896_s4 + $0xc4] ss:$16 sps:$4 sm:$0xff]   ;;  %v6501_v40 = vld [vmem:[%s8896_s4 + $0xa8] ss:$16 sps:$4 sm:$0xff]   ;;  %v245_v19 = vlaneseq }
   0xd   :  { %1159 = vmatprep.subr.bf16.mxu1 %v6479_v22  ;;  %v6504_v41 = vld [vmem:[%s8896_s4 + $0xc0] ss:$16 sps:$4 sm:$0xff]   ;;  %v6509_v42 = vld [vmem:[%s8896_s4 + $0xcc] ss:$16 sps:$4 sm:$0xff]   ;;  %v6512_v43 = vld [vmem:[%s8896_s4 + $0xe4] ss:$16 sps:$4 sm:$0xff]  }
   0xe   :  { %v6507_v44 = vld [vmem:[%s8896_s4 + $0xc8] ss:$16 sps:$4 sm:$0xff]   ;;  %v6510_v45 = vld [vmem:[%s8896_s4 + $0xe0] ss:$16 sps:$4 sm:$0xff]   ;;  %v6515_v46 = vld [vmem:[%s8896_s4 + $0xec] ss:$16 sps:$4 sm:$0xff]  }
   0xf   :  { %1074 = vmatpush1.bf16.msra.mxu0 %v6474_v21  ;;  %v6518_v47 = vld [vmem:[%s8896_s4 + $0x104] ss:$16 sps:$4 sm:$0xff]   ;;  %v6513_v48 = vld [vmem:[%s8896_s4 + $0xe8] ss:$16 sps:$4 sm:$0xff]   ;;  %v6516_v49 = vld [vmem:[%s8896_s4 + $0x100] ss:$16 sps:$4 sm:$0xff]  }
  0x10   :  { %1075 = vmatprep.subr.bf16.mxu0 %v6482_v23  ;;  %1160 = vmatpush1.bf16.msra.mxu1 %v6477_v24  ;;  %v6521_v50 = vld [vmem:[%s8896_s4 + $0x10c] ss:$16 sps:$4 sm:$0xff]   ;;  %v6519_v51 = vld [vmem:[%s8896_s4 + $0x108] ss:$16 sps:$4 sm:$0xff]   ;;  %v6524_v52 = vld [vmem:[%s8896_s4 + $0x124] ss:$16 sps:$4 sm:$0xff]  }
  0x11   :  { %1161 = vmatprep.subr.bf16.mxu1 %v6485_v26  ;;  %v6522_v53 = vld [vmem:[%s8896_s4 + $0x120] ss:$16 sps:$4 sm:$0xff]   ;;  %v6527_v54 = vld [vmem:[%s8896_s4 + $0x12c] ss:$16 sps:$4 sm:$0xff]   ;;  %v6530_v55 = vld [vmem:[%s8896_s4 + $0x144] ss:$16 sps:$4 sm:$0xff]  }
  0x12   :  { %v6525_v56 = vld [vmem:[%s8896_s4 + $0x128] ss:$16 sps:$4 sm:$0xff]   ;;  %v6528_v57 = vld [vmem:[%s8896_s4 + $0x140] ss:$16 sps:$4 sm:$0xff]   ;;  %v6533_v58 = vld [vmem:[%s8896_s4 + $0x14c] ss:$16 sps:$4 sm:$0xff]  }
  0x13   :  { %1076 = vmatpush1.bf16.msra.mxu0 %v6480_v25  ;;  %v6536_v59 = vld [vmem:[%s8896_s4 + $0x164] ss:$16 sps:$4 sm:$0xff]   ;;  %v6531_v60 = vld [vmem:[%s8896_s4 + $0x148] ss:$16 sps:$4 sm:$0xff]   ;;  %v6534_v61 = vld [vmem:[%s8896_s4 + $0x160] ss:$16 sps:$4 sm:$0xff]  }
  0x14   :  { %1077 = vmatprep.subr.bf16.mxu0 %v6488_v27  ;;  %1162 = vmatpush1.bf16.msra.mxu1 %v6483_v28  ;;  %v6539_v62 = vld [vmem:[%s8896_s4 + $0x16c] ss:$16 sps:$4 sm:$0xff]   ;;  %v6542_v63 = vld [vmem:[%s8896_s4 + $0x184] ss:$16 sps:$4 sm:$0xff]   ;;  %v6537_v0 = vld [vmem:[%s8896_s4 + $0x168] ss:$16 sps:$4 sm:$0xff]  }
  0x15   :  { %1163 = vmatprep.subr.bf16.mxu1 %v6491_v30  ;;  %v6540_v2 = vld [vmem:[%s8896_s4 + $0x180] ss:$16 sps:$4 sm:$0xff]   ;;  %v6545_v3 = vld [vmem:[%s8896_s4 + $0x18c] ss:$16 sps:$4 sm:$0xff]   ;;  %v6548_v4 = vld [vmem:[%s8896_s4 + $0x1a4] ss:$16 sps:$4 sm:$0xff]  }
  0x16   :  { %v6543_v5 = vld [vmem:[%s8896_s4 + $0x188] ss:$16 sps:$4 sm:$0xff]   ;;  %v6546_v6 = vld [vmem:[%s8896_s4 + $0x1a0] ss:$16 sps:$4 sm:$0xff]   ;;  %v6551_v7 = vld [vmem:[%s8896_s4 + $0x1ac] ss:$16 sps:$4 sm:$0xff]  }
  0x17   :  { %1078 = vmatpush1.bf16.msra.mxu0 %v6486_v29  ;;  %v6549_v8 = vld [vmem:[%s8896_s4 + $0x1a8] ss:$16 sps:$4 sm:$0xff]   ;;  %v6554_v9 = vld [vmem:[%s8896_s4 + $0x1c4] ss:$16 sps:$4 sm:$0xff]   ;;  %v6557_v10 = vld [vmem:[%s8896_s4 + $0x1cc] ss:$16 sps:$4 sm:$0xff]  }
  0x18   :  { %1079 = vmatprep.subr.bf16.mxu0 %v6494_v31  ;;  %1164 = vmatpush1.bf16.msra.mxu1 %v6489_v32  ;;  %v6552_v11 = vld [vmem:[%s8896_s4 + $0x1c0] ss:$16 sps:$4 sm:$0xff]   ;;  %v6555_v12 = vld [vmem:[%s8896_s4 + $0x1c8] ss:$16 sps:$4 sm:$0xff]   ;;  %v6560_v13 = vld [vmem:[%s8896_s4 + $0x1e4] ss:$16 sps:$4 sm:$0xff]  }
  0x19   :  { %1165 = vmatprep.subr.bf16.mxu1 %v6497_v34  ;;  %v6563_v14 = vld [vmem:[%s8896_s4 + $0x1ec] ss:$16 sps:$4 sm:$0xff]   ;;  %v6558_v15 = vld [vmem:[%s8896_s4 + $0x1e0] ss:$16 sps:$4 sm:$0xff]   ;;  %v6561_v16 = vld [vmem:[%s8896_s4 + $0x1e8] ss:$16 sps:$4 sm:$0xff]  }
  0x1a   :  { %v6566_v17 = vld [vmem:[%s8896_s4 + $0x204] ss:$16 sps:$4 sm:$0xff]   ;;  %v6569_v18 = vld [vmem:[%s8896_s4 + $0x20c] ss:$16 sps:$4 sm:$0xff]   ;;  %v246_v20 = vshrl.u32 %v245_v19, 7  ;;  %vm6979_vm9 = vmmov 1  }
  0x1b   :  { %1080 = vmatpush1.bf16.msra.mxu0 %v6492_v33  ;;  %v47_v22 = vld [vmem:[%s8898_s2] ss:$8 sm:$0xf]  ;;  %vm6408_vm10 = vmpackc.low %vm299_vm0, %vm6979_vm9  ;;  %vm4848_vm11 = vcmask 97280   ;;  %vm5030_vm12 = vcmask 31744   ;;  %vm5123_vm13 = vcmask 1042432  }
  0x1c   :  { %1081 = vmatprep.subr.bf16.mxu0 %v6500_v35  ;;  %1166 = vmatpush1.bf16.msra.mxu1 %v6495_v36  ;;  %v7257_v21 = vsub.s32 0, %v246_v20  ;;  %v7262_v23 = vsub.s32 1, %v246_v20  ;;  %v7264_v24 = vsub.s32 2, %v246_v20  ;;  %v7267_v26 = vsub.s32 3, %v246_v20  ;;  %v6600_v19 = vld [vmem:[%s8896_s4 + $0x2c0] ss:$16 sps:$4 sm:$0xff]  }
  0x1d   :  { %1167 = vmatprep.subr.bf16.mxu1 %v6503_v38  ;;  %v6603_v20 = vld [vmem:[%s8896_s4 + $0x2c8] ss:$16 sps:$4 sm:$0xff]   ;;  %vm5116_vm14 = vcmask 23552   ;;  %vm5292_vm15 = vcmask 60416  }
  0x1e   :  { %v248_v25 = vrot.slane %v47_v22, %v7257_v21  ;;  %v252_v27 = vrot.slane %v47_v22, %v7262_v23  ;;  %v256_v29 = vrot.slane %v47_v22, %v7264_v24  ;;  %v260_v32 = vrot.slane %v47_v22, %v7267_v26  ;;  %v6608_v22 = vld [vmem:[%s8896_s4 + $0x2e4] ss:$16 sps:$4 sm:$0xff]  }
  0x1f   :  { %1082 = vmatpush1.bf16.msra.mxu0 %v6498_v37 }
  0x20   :  { %1083 = vmatprep.subr.bf16.mxu0 %v6506_v39  ;;  %1168 = vmatpush1.bf16.msra.mxu1 %v6501_v40 }
  0x21   :  { %1169 = vmatprep.subr.bf16.mxu1 %v6509_v42 }
  0x23   :  { %1084 = vmatpush1.bf16.msra.mxu0 %v6504_v41 }
  0x24   :  { %1085 = vmatprep.subr.bf16.mxu0 %v6512_v43  ;;  %1170 = vmatpush1.bf16.msra.mxu1 %v6507_v44 }
  0x25   :  { %1171 = vmatprep.subr.bf16.mxu1 %v6515_v46 }
  0x27   :  { %1086 = vmatpush1.bf16.msra.mxu0 %v6510_v45 }
  0x28   :  { %1087 = vmatprep.subr.bf16.mxu0 %v6518_v47  ;;  %1172 = vmatpush1.bf16.msra.mxu1 %v6513_v48 }
  0x29   :  { %1173 = vmatprep.subr.bf16.mxu1 %v6521_v50 }
  0x2b   :  { %1088 = vmatpush1.bf16.msra.mxu0 %v6516_v49 }
  0x2c   :  { %1089 = vmatprep.subr.bf16.mxu0 %v6524_v52  ;;  %1174 = vmatpush1.bf16.msra.mxu1 %v6519_v51 }
  0x2d   :  { %1175 = vmatprep.subr.bf16.mxu1 %v6527_v54  ;;  %v6564_v54 = vld [vmem:[%s8896_s4 + $0x200] ss:$16 sps:$4 sm:$0xff]  }
  0x2f   :  { %1090 = vmatpush1.bf16.msra.mxu0 %v6522_v53 }
  0x30   :  { %1091 = vmatprep.subr.bf16.mxu0 %v6530_v55  ;;  %1176 = vmatpush1.bf16.msra.mxu1 %v6525_v56  ;;  %v6567_v55 = vld [vmem:[%s8896_s4 + $0x208] ss:$16 sps:$4 sm:$0xff]  }
  0x31   :  { %1177 = vmatprep.subr.bf16.mxu1 %v6533_v58  ;;  %v6575_v58 = vld [vmem:[%s8896_s4 + $0x22c] ss:$16 sps:$4 sm:$0xff]  }
  0x33   :  { %1092 = vmatpush1.bf16.msra.mxu0 %v6528_v57  ;;  %v6572_v57 = vld [vmem:[%s8896_s4 + $0x224] ss:$16 sps:$4 sm:$0xff]  }
  0x34   :  { %1093 = vmatprep.subr.bf16.mxu0 %v6536_v59  ;;  %1178 = vmatpush1.bf16.msra.mxu1 %v6531_v60 }
  0x35   :  { %1179 = vmatprep.subr.bf16.mxu1 %v6539_v62  ;;  %v6570_v62 = vld [vmem:[%s8896_s4 + $0x220] ss:$16 sps:$4 sm:$0xff]  }
  0x37   :  { %1094 = vmatpush1.bf16.msra.mxu0 %v6534_v61 }
  0x38   :  { %1095 = vmatprep.subr.bf16.mxu0 %v6542_v63  ;;  %1180 = vmatpush1.bf16.msra.mxu1 %v6537_v0  ;;  %v6573_v63 = vld [vmem:[%s8896_s4 + $0x228] ss:$16 sps:$4 sm:$0xff]   ;;  %v6578_v0 = vld [vmem:[%s8896_s4 + $0x244] ss:$16 sps:$4 sm:$0xff]  }
  0x39   :  { %1181 = vmatprep.subr.bf16.mxu1 %v6545_v3  ;;  %v6576_v3 = vld [vmem:[%s8896_s4 + $0x240] ss:$16 sps:$4 sm:$0xff]  }
  0x3b   :  { %1096 = vmatpush1.bf16.msra.mxu0 %v6540_v2  ;;  %v6581_v2 = vld [vmem:[%s8896_s4 + $0x24c] ss:$16 sps:$4 sm:$0xff]  }
  0x3c   :  { %1097 = vmatprep.subr.bf16.mxu0 %v6548_v4  ;;  %1182 = vmatpush1.bf16.msra.mxu1 %v6543_v5  ;;  %v6579_v4 = vld [vmem:[%s8896_s4 + $0x248] ss:$16 sps:$4 sm:$0xff]   ;;  %v6584_v5 = vld [vmem:[%s8896_s4 + $0x264] ss:$16 sps:$4 sm:$0xff]  }
  0x3d   :  { %1183 = vmatprep.subr.bf16.mxu1 %v6551_v7  ;;  %v6582_v7 = vld [vmem:[%s8896_s4 + $0x260] ss:$16 sps:$4 sm:$0xff]  }
  0x3f   :  { %1098 = vmatpush1.bf16.msra.mxu0 %v6546_v6  ;;  %v6587_v6 = vld [vmem:[%s8896_s4 + $0x26c] ss:$16 sps:$4 sm:$0xff]  }
  0x40   :  { %1184 = vmatpush1.bf16.msra.mxu1 %v6549_v8  ;;  %1099 = vmatprep.subr.bf16.mxu0 %v6554_v9  ;;  %v6585_v8 = vld [vmem:[%s8896_s4 + $0x268] ss:$16 sps:$4 sm:$0xff]   ;;  %v6590_v9 = vld [vmem:[%s8896_s4 + $0x284] ss:$16 sps:$4 sm:$0xff]  }
  0x41   :  { %1185 = vmatprep.subr.bf16.mxu1 %v6557_v10  ;;  %v6593_v10 = vld [vmem:[%s8896_s4 + $0x28c] ss:$16 sps:$4 sm:$0xff]  }
  0x43   :  { %1100 = vmatpush1.bf16.msra.mxu0 %v6552_v11  ;;  %v6588_v11 = vld [vmem:[%s8896_s4 + $0x280] ss:$16 sps:$4 sm:$0xff]  }
  0x44   :  { %1186 = vmatpush1.bf16.msra.mxu1 %v6555_v12  ;;  %1101 = vmatprep.subr.bf16.mxu0 %v6560_v13  ;;  %v6591_v12 = vld [vmem:[%s8896_s4 + $0x288] ss:$16 sps:$4 sm:$0xff]   ;;  %v6596_v13 = vld [vmem:[%s8896_s4 + $0x2a4] ss:$16 sps:$4 sm:$0xff]  }
  0x45   :  { %1187 = vmatprep.subr.bf16.mxu1 %v6563_v14  ;;  %v6599_v14 = vld [vmem:[%s8896_s4 + $0x2ac] ss:$16 sps:$4 sm:$0xff]  }
  0x47   :  { %1102 = vmatpush1.bf16.msra.mxu0 %v6558_v15  ;;  %v6594_v15 = vld [vmem:[%s8896_s4 + $0x2a0] ss:$16 sps:$4 sm:$0xff]  }
  0x48   :  { %1188 = vmatpush1.bf16.msra.mxu1 %v6561_v16  ;;  %1114 = vmatprep.subr.bf16.mxu0 %v6566_v17  ;;  %v6597_v16 = vld [vmem:[%s8896_s4 + $0x2a8] ss:$16 sps:$4 sm:$0xff]   ;;  %v6602_v17 = vld [vmem:[%s8896_s4 + $0x2c4] ss:$16 sps:$4 sm:$0xff]  }
  0x49   :  { %1200 = vmatprep.subr.bf16.mxu1 %v6569_v18  ;;  %v6605_v18 = vld [vmem:[%s8896_s4 + $0x2cc] ss:$16 sps:$4 sm:$0xff]  }
  0xdd   :  { %v346_v28 = vpop.f32.mrb[0].mxu0 }
  0xde   :  { %v347_v30 = vadd.f32 %v346_v28, %v248_v25  ;;  %v348_v31 = vpop.f32.mrb[1].mxu0  ;;  %v389_v37 = vpop.f32.mrb[0].mxu1  ;;  %v6609_v28 = vld [vmem:[%s8896_s4 + $0x2e8] ss:$16 sps:$4 sm:$0xff]  }
  0xdf   :  { %v349_v33 = vadd.f32 %v348_v31, %v252_v27  ;;  %v350_v34 = vpop.f32.mrb[2].mxu0  ;;  %v390_v39 = vadd.f32 %v389_v37, %v256_v29  ;;  %v391_v40 = vpop.f32.mrb[1].mxu1  ;;  %v6612_v31 = vld [vmem:[%s8896_s4 + $0x300] ss:$16 sps:$4 sm:$0xff]   ;;  %v6626_v37 = vld [vmem:[%s8896_s4 + $0x344] ss:$16 sps:$4 sm:$0xff]  }
  0xe0   :  { %v351_v35 = vadd.f32 %v350_v34, %v248_v25  ;;  %v352_v36 = vpop.f32.mrb[3].mxu0  ;;  %v398_v41 = vmax.f32 %v347_v30, 0.0  ;;  %v392_v43 = vadd.f32 %v391_v40, %v260_v32  ;;  %v393_v44 = vpop.f32.mrb[2].mxu1  ;;  %v6611_v25 = vld [vmem:[%s8896_s4 + $0x2ec] ss:$16 sps:$4 sm:$0xff]  }
  0xe1   :  { %v353_v38 = vadd.f32 %v352_v36, %v252_v27  ;;  %v399_v45 = vmax.f32 %v349_v33, 0.0  ;;  %v400_v47 = vmax.f32 %v390_v39, 0.0  ;;  %v394_v48 = vadd.f32 %v393_v44, %v256_v29  ;;  %v395_v49 = vpop.f32.mrb[3].mxu1  ;;  %v6606_v27 = vld [vmem:[%s8896_s4 + $0x2e0] ss:$16 sps:$4 sm:$0xff]  }
  0xe2   :  { %v402_v42 = vmax.f32 %v351_v35, 0.0  ;;  %v401_v51 = vmax.f32 %v392_v43, 0.0  ;;  %v396_v52 = vadd.f32 %v395_v49, %v260_v32  ;;  %v6614_v29 = vld [vmem:[%s8896_s4 + $0x304] ss:$16 sps:$4 sm:$0xff]   ;;  %v6617_v30 = vld [vmem:[%s8896_s4 + $0x30c] ss:$16 sps:$4 sm:$0xff]  }
  0xe3   :  { %v403_v46 = vmax.f32 %v353_v38, 0.0  ;;  %v404_v56 = vmax.f32 %v394_v48, 0.0  ;;  %v6615_v32 = vld [vmem:[%s8896_s4 + $0x308] ss:$16 sps:$4 sm:$0xff]   ;;  %v6620_v33 = vld [vmem:[%s8896_s4 + $0x324] ss:$16 sps:$4 sm:$0xff]  }
  0xe4   :  { %v406_v50 = vpack.c.bf16 %v402_v42, %v398_v41  ;;  %v405_v59 = vmax.f32 %v396_v52, 0.0  ;;  %v6623_v34 = vld [vmem:[%s8896_s4 + $0x32c] ss:$16 sps:$4 sm:$0xff]   ;;  %v6618_v35 = vld [vmem:[%s8896_s4 + $0x320] ss:$16 sps:$4 sm:$0xff]  }
  0xe5   :  { %v407_v53 = vpack.c.bf16 %v403_v46, %v399_v45  ;;  %v7284_v60 = vpack.c.bf16 %v404_v56, %v400_v47  ;;  %v6621_v36 = vld [vmem:[%s8896_s4 + $0x328] ss:$16 sps:$4 sm:$0xff]   ;;  %v6629_v38 = vld [vmem:[%s8896_s4 + $0x34c] ss:$16 sps:$4 sm:$0xff]   ;;  %v6624_v39 = vld [vmem:[%s8896_s4 + $0x340] ss:$16 sps:$4 sm:$0xff]  }
  0xe6   :  { %v409_v61 = vpack.c.bf16 %v405_v59, %v401_v51  ;;  %v6627_v40 = vld [vmem:[%s8896_s4 + $0x348] ss:$16 sps:$4 sm:$0xff]   ;;  %v6632_v41 = vld [vmem:[%s8896_s4 + $0x364] ss:$16 sps:$4 sm:$0xff]   ;;  %v6635_v42 = vld [vmem:[%s8896_s4 + $0x36c] ss:$16 sps:$4 sm:$0xff]  }
  0xe7   :  { %1103 = vmatprep.mubr.bf16.mxu0 %v407_v53  ;;  %1189 = vmatprep.mubr.bf16.mxu1 %v407_v53  ;;  %v6630_v43 = vld [vmem:[%s8896_s4 + $0x360] ss:$16 sps:$4 sm:$0xff]   ;;  %v6633_v44 = vld [vmem:[%s8896_s4 + $0x368] ss:$16 sps:$4 sm:$0xff]   ;;  %v6638_v45 = vld [vmem:[%s8896_s4 + $0x384] ss:$16 sps:$4 sm:$0xff]  }
  0xe8   :  { %1104 = vmatmul.mubr.bf16.vlgmr.msra.gmra.mrb[4].mxu0 %v406_v50  ;;  %1190 = vmatmul.mubr.bf16.vlgmr.msra.gmra.mrb[4].mxu1 %v406_v50  ;;  %v6641_v46 = vld [vmem:[%s8896_s4 + $0x38c] ss:$16 sps:$4 sm:$0xff]   ;;  %v6636_v47 = vld [vmem:[%s8896_s4 + $0x380] ss:$16 sps:$4 sm:$0xff]   ;;  %v6639_v48 = vld [vmem:[%s8896_s4 + $0x388] ss:$16 sps:$4 sm:$0xff]  }
  0xe9   :  { %1115 = vmatpush1.bf16.msra.mxu0 %v6564_v54  ;;  %1201 = vmatpush1.bf16.msra.mxu1 %v6567_v55  ;;  %v6644_v49 = vld [vmem:[%s8896_s4 + $0x3a4] ss:$16 sps:$4 sm:$0xff]   ;;  %v6647_v50 = vld [vmem:[%s8896_s4 + $0x3ac] ss:$16 sps:$4 sm:$0xff]   ;;  %v6642_v51 = vld [vmem:[%s8896_s4 + $0x3a0] ss:$16 sps:$4 sm:$0xff]  }
  0xea   :  { %1116 = vmatprep.subr.bf16.mxu0 %v6572_v57  ;;  %1202 = vmatprep.subr.bf16.mxu1 %v6575_v58  ;;  %v6645_v52 = vld [vmem:[%s8896_s4 + $0x3a8] ss:$16 sps:$4 sm:$0xff]   ;;  %v6650_v53 = vld [vmem:[%s8896_s4 + $0x3c4] ss:$16 sps:$4 sm:$0xff]   ;;  %v6653_v54 = vld [vmem:[%s8896_s4 + $0x3cc] ss:$16 sps:$4 sm:$0xff]  }
  0xeb   :  { %1146 = vmatprep.mubr.bf16.mxu0 %v409_v61  ;;  %1232 = vmatprep.mubr.bf16.mxu1 %v409_v61  ;;  %v6648_v55 = vld [vmem:[%s8896_s4 + $0x3c0] ss:$16 sps:$4 sm:$0xff]   ;;  %v6651_v56 = vld [vmem:[%s8896_s4 + $0x3c8] ss:$16 sps:$4 sm:$0xff]   ;;  %v6656_v57 = vld [vmem:[%s8896_s4 + $0x3e4] ss:$16 sps:$4 sm:$0xff]  }
  0xec   :  { %v6659_v58 = vld [vmem:[%s8896_s4 + $0x3ec] ss:$16 sps:$4 sm:$0xff]   ;;  %v6654_v59 = vld [vmem:[%s8896_s4 + $0x3e0] ss:$16 sps:$4 sm:$0xff]   ;;  %v6657_v61 = vld [vmem:[%s8896_s4 + $0x3e8] ss:$16 sps:$4 sm:$0xff]  }
  0xed   :  { %1117 = vmatpush1.bf16.msra.mxu0 %v6570_v62  ;;  %1203 = vmatpush1.bf16.msra.mxu1 %v6573_v63  ;;  %v7463_v62 = vld [vmem:[%s8897_s5 + $0x40] sm:$0xff]  }
  0xee   :  { %1118 = vmatprep.subr.bf16.mxu0 %v6578_v0  ;;  %1204 = vmatprep.subr.bf16.mxu1 %v6581_v2  ;;  %v7468_v63 = vld [vmem:[%s8897_s5 + $0xc0] sm:$0xff]  }
  0xef   :  { %v7473_v0 = vld [vmem:[%s8897_s5] sm:$0xff]   ;;  %2694 = vrot.lane.b32.xlu0 %v7463_v62, %s6974_s18  ;;  %2726 = vrot.lane.b32.xlu1 %v7468_v63, %s6974_s18 }
  0xf0   :  { %v7478_v2 = vld [vmem:[%s8897_s5 + $0x80] sm:$0xff]  }
  0xf1   :  { %1119 = vmatpush1.bf16.msra.mxu0 %v6576_v3  ;;  %1205 = vmatpush1.bf16.msra.mxu1 %v6579_v4  ;;  %v7485_v3 = vld [vmem:[%s8897_s5 + $0x48] sm:$0xff]  }
  0xf2   :  { %1120 = vmatprep.subr.bf16.mxu0 %v6584_v5  ;;  %1206 = vmatprep.subr.bf16.mxu1 %v6587_v6  ;;  %v7490_v4 = vld [vmem:[%s8897_s5 + $0xc8] sm:$0xff]  }
  0xf3   :  { %v7499_v5 = vld [vmem:[%s8897_s5 + $0x8] sm:$0xff]   ;;  %2678 = vrot.lane.b32.xlu0 %v7473_v0, %s6974_s18  ;;  %2710 = vrot.lane.b32.xlu1 %v7478_v2, %s6974_s18 }
  0xf4   :  { %v7504_v6 = vld [vmem:[%s8897_s5 + $0x88] sm:$0xff]  }
  0xf5   :  { %1121 = vmatpush1.bf16.msra.mxu0 %v6582_v7  ;;  %1207 = vmatpush1.bf16.msra.mxu1 %v6585_v8  ;;  %v7516_v7 = vld [vmem:[%s8897_s5 + $0xd0] sm:$0xff]  }
  0xf6   :  { %1122 = vmatprep.subr.bf16.mxu0 %v6590_v9  ;;  %1208 = vmatprep.subr.bf16.mxu1 %v6593_v10  ;;  %v7523_v8 = vld [vmem:[%s8897_s5 + $0x10] sm:$0xff]   ;;  %v7535_v10 = vld [vmem:[%s8897_s5 + $0x58] sm:$0xff]  }
  0xf7   :  { %v7528_v9 = vld [vmem:[%s8897_s5 + $0x90] sm:$0xff]   ;;  %2696 = vrot.lane.b32.xlu0 %v7485_v3, %s6974_s18  ;;  %2680 = vrot.lane.b32.xlu1 %v7499_v5, %s6974_s18 }
  0xf9   :  { %1123 = vmatpush1.bf16.msra.mxu0 %v6588_v11  ;;  %1209 = vmatpush1.bf16.msra.mxu1 %v6591_v12  ;;  %v7540_v11 = vld [vmem:[%s8897_s5 + $0xd8] sm:$0xff]  }
  0xfa   :  { %1124 = vmatprep.subr.bf16.mxu0 %v6596_v13  ;;  %1210 = vmatprep.subr.bf16.mxu1 %v6599_v14  ;;  %v7547_v12 = vld [vmem:[%s8897_s5 + $0x18] sm:$0xff]   ;;  %v7559_v14 = vld [vmem:[%s8897_s5 + $0x60] sm:$0xff]  }
  0xfb   :  { %v7552_v13 = vld [vmem:[%s8897_s5 + $0x98] sm:$0xff]   ;;  %2728 = vrot.lane.b32.xlu0 %v7490_v4, %s6974_s18  ;;  %2712 = vrot.lane.b32.xlu1 %v7504_v6, %s6974_s18 }
  0xfd   :  { %1125 = vmatpush1.bf16.msra.mxu0 %v6594_v15  ;;  %1211 = vmatpush1.bf16.msra.mxu1 %v6597_v16  ;;  %v7564_v15 = vld [vmem:[%s8897_s5 + $0xe0] sm:$0xff]  }
  0xfe   :  { %1126 = vmatprep.subr.bf16.mxu0 %v6602_v17  ;;  %1212 = vmatprep.subr.bf16.mxu1 %v6605_v18  ;;  %v7571_v16 = vld [vmem:[%s8897_s5 + $0x20] sm:$0xff]   ;;  %v7583_v18 = vld [vmem:[%s8897_s5 + $0x68] sm:$0xff]  }
  0xff   :  { %v7576_v17 = vld [vmem:[%s8897_s5 + $0xa0] sm:$0xff]   ;;  %2682 = vrot.lane.b32.xlu1 %v7523_v8, %s6974_s18 }
 0x101   :  { %1127 = vmatpush1.bf16.msra.mxu0 %v6600_v19  ;;  %1213 = vmatpush1.bf16.msra.mxu1 %v6603_v20  ;;  %v7588_v19 = vld [vmem:[%s8897_s5 + $0xe8] sm:$0xff]  }
 0x102   :  { %1128 = vmatprep.subr.bf16.mxu0 %v6608_v22  ;;  %1214 = vmatprep.subr.bf16.mxu1 %v6611_v25  ;;  %v7597_v20 = vld [vmem:[%s8897_s5 + $0x28] sm:$0xff]   ;;  %v7609_v25 = vld [vmem:[%s8897_s5 + $0x70] sm:$0xff]  }
 0x103   :  { %v7602_v22 = vld [vmem:[%s8897_s5 + $0xa8] sm:$0xff]   ;;  %2714 = vrot.lane.b32.xlu1 %v7528_v9, %s6974_s18 }
 0x105   :  { %1129 = vmatpush1.bf16.msra.mxu0 %v6606_v27  ;;  %1215 = vmatpush1.bf16.msra.mxu1 %v6609_v28  ;;  %v7614_v27 = vld [vmem:[%s8897_s5 + $0xf0] sm:$0xff]  }
 0x106   :  { %1130 = vmatprep.subr.bf16.mxu0 %v6614_v29  ;;  %1216 = vmatprep.subr.bf16.mxu1 %v6617_v30  ;;  %v7619_v28 = vld [vmem:[%s8897_s5 + $0x30] sm:$0xff]   ;;  %v7633_v30 = vld [vmem:[%s8897_s5 + $0x78] sm:$0xff]  }
 0x107   :  { %v7624_v29 = vld [vmem:[%s8897_s5 + $0xb0] sm:$0xff]   ;;  %2684 = vrot.lane.b32.xlu1 %v7547_v12, %s6974_s18 }
 0x109   :  { %1131 = vmatpush1.bf16.msra.mxu0 %v6612_v31  ;;  %1217 = vmatpush1.bf16.msra.mxu1 %v6615_v32  ;;  %v7638_v31 = vld [vmem:[%s8897_s5 + $0xf8] sm:$0xff]  }
 0x10a   :  { %1132 = vmatprep.subr.bf16.mxu0 %v6620_v33  ;;  %1218 = vmatprep.subr.bf16.mxu1 %v6623_v34  ;;  %v7643_v32 = vld [vmem:[%s8897_s5 + $0x38] sm:$0xff]   ;;  %v6694_v34 = vld [vmem:[%s8894_s3 + $0x34] ss:$16 sps:$4 sm:$0xff]  }
 0x10b   :  { %v7648_v33 = vld [vmem:[%s8897_s5 + $0xb8] sm:$0xff]   ;;  %2716 = vrot.lane.b32.xlu1 %v7552_v13, %s6974_s18 }
 0x10d   :  { %1133 = vmatpush1.bf16.msra.mxu0 %v6618_v35  ;;  %1219 = vmatpush1.bf16.msra.mxu1 %v6621_v36  ;;  %v6699_v35 = vld [vmem:[%s8894_s3 + $0x3c] ss:$16 sps:$4 sm:$0xff]   ;;  %v5315_v36 = vld [vmem:[%s8898_s2 + $0x1] ss:$8 sm:$0xf] }
 0x10e   :  { %1134 = vmatprep.subr.bf16.mxu0 %v6626_v37  ;;  %1220 = vmatprep.subr.bf16.mxu1 %v6629_v38  ;;  %v414_v37 = vrot.slane %v5315_v36, %v7257_v21  ;;  %v422_v38 = vrot.slane %v5315_v36, %v7264_v24 }
 0x10f   :  { %2686 = vrot.lane.b32.xlu1 %v7571_v16, %s6974_s18 }
 0x111   :  { %1135 = vmatpush1.bf16.msra.mxu0 %v6624_v39  ;;  %1221 = vmatpush1.bf16.msra.mxu1 %v6627_v40  ;;  %v418_v39 = vrot.slane %v5315_v36, %v7262_v23  ;;  %v426_v40 = vrot.slane %v5315_v36, %v7267_v26 }
 0x112   :  { %1136 = vmatprep.subr.bf16.mxu0 %v6632_v41  ;;  %1222 = vmatprep.subr.bf16.mxu1 %v6635_v42 }
 0x113   :  { %2718 = vrot.lane.b32.xlu1 %v7576_v17, %s6974_s18 }
 0x115   :  { %1137 = vmatpush1.bf16.msra.mxu0 %v6630_v43  ;;  %1223 = vmatpush1.bf16.msra.mxu1 %v6633_v44 }
 0x116   :  { %1138 = vmatprep.subr.bf16.mxu0 %v6638_v45  ;;  %1224 = vmatprep.subr.bf16.mxu1 %v6641_v46 }
 0x117   :  { %2688 = vrot.lane.b32.xlu1 %v7597_v20, %s6974_s18 }
 0x119   :  { %1139 = vmatpush1.bf16.msra.mxu0 %v6636_v47  ;;  %1225 = vmatpush1.bf16.msra.mxu1 %v6639_v48 }
 0x11a   :  { %1140 = vmatprep.subr.bf16.mxu0 %v6644_v49  ;;  %1226 = vmatprep.subr.bf16.mxu1 %v6647_v50 }
 0x11b   :  { %2720 = vrot.lane.b32.xlu1 %v7602_v22, %s6974_s18 }
 0x11d   :  { %1141 = vmatpush1.bf16.msra.mxu0 %v6642_v51  ;;  %1227 = vmatpush1.bf16.msra.mxu1 %v6645_v52 }
 0x11e   :  { %1142 = vmatprep.subr.bf16.mxu0 %v6650_v53  ;;  %1228 = vmatprep.subr.bf16.mxu1 %v6653_v54 }
 0x11f   :  { %2690 = vrot.lane.b32.xlu1 %v7619_v28, %s6974_s18 }
 0x121   :  { %1143 = vmatpush1.bf16.msra.mxu0 %v6648_v55  ;;  %1229 = vmatpush1.bf16.msra.mxu1 %v6651_v56 }
 0x122   :  { %1144 = vmatprep.subr.bf16.mxu0 %v6656_v57  ;;  %1230 = vmatprep.subr.bf16.mxu1 %v6659_v58 }
 0x123   :  { %2722 = vrot.lane.b32.xlu1 %v7624_v29, %s6974_s18 }
 0x125   :  { %1145 = vmatpush1.bf16.msra.mxu0 %v6654_v59  ;;  %1231 = vmatpush1.bf16.msra.mxu1 %v6657_v61 }
 0x126   :  { %5773 = vmatprep.subr.bf16.mxu0 %v7463_v62  ;;  %5795 = vmatprep.subr.bf16.mxu1 %v7468_v63 }
 0x127   :  { %2692 = vrot.lane.b32.xlu1 %v7643_v32, %s6974_s18 }
 0x128   :  { %1147 = vmatmul.mubr.bf16.vlgmr.msra.gmra.mrb[4].mxu0 %v7284_v60  ;;  %1233 = vmatmul.mubr.bf16.vlgmr.msra.gmra.mrb[4].mxu1 %v7284_v60  ;;  %v7511_v60 = vld [vmem:[%s8897_s5 + $0x50] sm:$0xff]  }
 0x129   :  { %5774 = vmatpush3.bf16.msra.mxu0 %v7473_v0  ;;  %5796 = vmatpush3.bf16.msra.mxu1 %v7478_v2  ;;  %v242_v0 = vld [vmem:[%s8898_s2 + $0x2] ss:$0 sm:$0xff] }
 0x12a   :  { %5775 = vmatprep.subr.bf16.mxu0 %v7485_v3  ;;  %5797 = vmatprep.subr.bf16.mxu1 %v7490_v4 }
 0x12b   :  { %2698 = vrot.lane.b32.xlu0 %v7511_v60, %s6974_s18  ;;  %2724 = vrot.lane.b32.xlu1 %v7648_v33, %s6974_s18 }
 0x12d   :  { %5776 = vmatpush3.bf16.msra.mxu0 %v7499_v5  ;;  %5798 = vmatpush3.bf16.msra.mxu1 %v7504_v6 }
 0x12e   :  { %5777 = vmatprep.subr.bf16.mxu0 %v7511_v60  ;;  %5799 = vmatprep.subr.bf16.mxu1 %v7516_v7 }
 0x12f   :  { %2730 = vrot.lane.b32.xlu0 %v7516_v7, %s6974_s18  ;;  %v5488_v7 = vld [vmem:[%s8898_s2 + $0x3] ss:$8 sm:$0xf] }
 0x131   :  { %5778 = vmatpush3.bf16.msra.mxu0 %v7523_v8  ;;  %5800 = vmatpush3.bf16.msra.mxu1 %v7528_v9 }
 0x132   :  { %5779 = vmatprep.subr.bf16.mxu0 %v7535_v10  ;;  %5801 = vmatprep.subr.bf16.mxu1 %v7540_v11 }
 0x133   :  { %2700 = vrot.lane.b32.xlu0 %v7535_v10, %s6974_s18 }
 0x135   :  { %5780 = vmatpush3.bf16.msra.mxu0 %v7547_v12  ;;  %5802 = vmatpush3.bf16.msra.mxu1 %v7552_v13  ;;  %v1673_v13 = vrot.slane %v5488_v7, %v7257_v21 }
 0x136   :  { %5781 = vmatprep.subr.bf16.mxu0 %v7559_v14  ;;  %5803 = vmatprep.subr.bf16.mxu1 %v7564_v15 }
 0x137   :  { %2732 = vrot.lane.b32.xlu0 %v7540_v11, %s6974_s18 }
 0x139   :  { %5782 = vmatpush3.bf16.msra.mxu0 %v7571_v16  ;;  %5804 = vmatpush3.bf16.msra.mxu1 %v7576_v17  ;;  %v1677_v16 = vrot.slane %v5488_v7, %v7262_v23  ;;  %v1681_v17 = vrot.slane %v5488_v7, %v7264_v24 }
 0x13a   :  { %5783 = vmatprep.subr.bf16.mxu0 %v7583_v18  ;;  %5805 = vmatprep.subr.bf16.mxu1 %v7588_v19 }
 0x13b   :  { %2702 = vrot.lane.b32.xlu0 %v7559_v14, %s6974_s18 }
 0x13d   :  { %5784 = vmatpush3.bf16.msra.mxu0 %v7597_v20  ;;  %5806 = vmatpush3.bf16.msra.mxu1 %v7602_v22 }
 0x13e   :  { %5785 = vmatprep.subr.bf16.mxu0 %v7609_v25  ;;  %5807 = vmatprep.subr.bf16.mxu1 %v7614_v27 }
 0x13f   :  { %2734 = vrot.lane.b32.xlu0 %v7564_v15, %s6974_s18 }
 0x141   :  { %5786 = vmatpush3.bf16.msra.mxu0 %v7619_v28  ;;  %5808 = vmatpush3.bf16.msra.mxu1 %v7624_v29 }
 0x142   :  { %5787 = vmatprep.subr.bf16.mxu0 %v7633_v30  ;;  %5809 = vmatprep.subr.bf16.mxu1 %v7638_v31 }
 0x143   :  { %2704 = vrot.lane.b32.xlu0 %v7583_v18, %s6974_s18  ;;  %v1685_v18 = vrot.slane %v5488_v7, %v7267_v26  ;;  %v6830_v7 = vld [vmem:[%s8896_s4 + $0x6a4] ss:$16 sps:$4 sm:$0xff]  }
 0x145   :  { %5788 = vmatpush3.bf16.msra.mxu0 %v7643_v32  ;;  %5810 = vmatpush3.bf16.msra.mxu1 %v7648_v33  ;;  %v6806_v32 = vld [vmem:[%s8896_s4 + $0x624] ss:$16 sps:$4 sm:$0xff]   ;;  %v6807_v33 = vld [vmem:[%s8896_s4 + $0x628] ss:$16 sps:$4 sm:$0xff]  }
 0x146   :  { %1735 = vmatprep.subr.bf16.mxu0 %v6694_v34  ;;  %1778 = vmatprep.subr.bf16.mxu1 %v6699_v35 }
 0x147   :  { %2736 = vrot.lane.b32.xlu0 %v7588_v19, %s6974_s18 }
 0x14b   :  { %2706 = vrot.lane.b32.xlu0 %v7609_v25, %s6974_s18 }
 0x14f   :  { %2738 = vrot.lane.b32.xlu0 %v7614_v27, %s6974_s18 }
 0x153   :  { %2708 = vrot.lane.b32.xlu0 %v7633_v30, %s6974_s18  ;;  %v6801_v30 = vld [vmem:[%s8896_s4 + $0x608] ss:$16 sps:$4 sm:$0xff]  }
 0x157   :  { %2740 = vrot.lane.b32.xlu0 %v7638_v31, %s6974_s18  ;;  %v6804_v31 = vld [vmem:[%s8896_s4 + $0x620] ss:$16 sps:$4 sm:$0xff]  }
 0x1fb   :  { %v1148_v41 = vpop.f32.mrb[4].mxu0  ;;  %v1234_v42 = vpop.f32.mrb[4].mxu1 }
 0x1fc   :  { %v6417_v43 = vadd.f32 %v1148_v41, %v414_v37  ;;  %v6421_v44 = vadd.f32 %v1234_v42, %v422_v38  ;;  %v1150_v45 = vpop.f32.mrb[5].mxu0  ;;  %v1236_v46 = vpop.f32.mrb[5].mxu1  ;;  %v1533_v42 = vld [vmem:[%s8894_s3 + $0x50] sm:$0xff] }
 0x1fd   :  { %v6418_v47 = vadd.f32 %v1150_v45, %v418_v39  ;;  %v6422_v48 = vadd.f32 %v1236_v46, %v426_v40  ;;  %v1152_v49 = vpop.f32.mrb[6].mxu0  ;;  %v1238_v50 = vpop.f32.mrb[6].mxu1 }
 0x1fe   :  { %v6419_v51 = vadd.f32 %v1152_v49, %v414_v37  ;;  %v6423_v52 = vadd.f32 %v1238_v50, %v422_v38  ;;  %v1154_v53 = vpop.f32.mrb[7].mxu0  ;;  %v1240_v54 = vpop.f32.mrb[7].mxu1  ;;  %v1243_v57 = vmax.f32 %v6417_v43, 0.0  ;;  %v1245_v58 = vmax.f32 %v6421_v44, 0.0  ;;  %v1534_v37 = vld [vmem:[%s8894_s3 + $0x58] sm:$0xff]  ;;  %v32_v50 = vld [vmem:[%s8895_s0 + $0x10] sm:$0xff] }
 0x1ff   :  { %v6420_v55 = vadd.f32 %v1154_v53, %v418_v39  ;;  %v6424_v56 = vadd.f32 %v1240_v54, %v426_v40  ;;  %v1244_v34 = vmax.f32 %v6418_v47, 0.0  ;;  %v1246_v35 = vmax.f32 %v6422_v48, 0.0  ;;  %v6692_v40 = vld [vmem:[%s8894_s3 + $0x30] ss:$16 sps:$4 sm:$0xff]   ;;  %v6697_v47 = vld [vmem:[%s8894_s3 + $0x38] ss:$16 sps:$4 sm:$0xff]  }
 0x200   :  { %v1247_v59 = vmax.f32 %v6419_v51, 0.0  ;;  %v1249_v61 = vmax.f32 %v6423_v52, 0.0  ;;  %v5495_v43 = vcombine.high %v1533_v42, %v1533_v42  ;;  %v5494_v44 = vcombine.low %v1533_v42, %v1533_v42  ;;  %v33_v51 = vld [vmem:[%s8895_s0 + $0x18] sm:$0xff]  ;;  %v6704_v53 = vld [vmem:[%s8896_s4 + $0x404] ss:$16 sps:$4 sm:$0xff]  }
 0x201   :  { %v1248_v36 = vmax.f32 %v6420_v55, 0.0  ;;  %v1250_v41 = vmax.f32 %v6424_v56, 0.0  ;;  %v5497_v48 = vcombine.high %v1534_v37, %v1534_v37  ;;  %v5496_v49 = vcombine.low %v1534_v37, %v1534_v37  ;;  %v6707_v55 = vld [vmem:[%s8896_s4 + $0x40c] ss:$16 sps:$4 sm:$0xff]   ;;  %v6717_v42 = vld [vmem:[%s8896_s4 + $0x448] ss:$16 sps:$4 sm:$0xff]  }
 0x202   :  { %v1251_v45 = vpack.c.bf16 %v1247_v59, %v1243_v57  ;;  %v1253_v46 = vpack.c.bf16 %v1249_v61, %v1245_v58  ;;  %v1724_v52 = vsel %vm299_vm0, %v5494_v44, 0  ;;  %v1668_v56 = vpack.c.bf16 %v33_v51, %v32_v50  ;;  %v6702_v57 = vld [vmem:[%s8896_s4 + $0x400] ss:$16 sps:$4 sm:$0xff]   ;;  %v6705_v58 = vld [vmem:[%s8896_s4 + $0x408] ss:$16 sps:$4 sm:$0xff]  }
 0x203   :  { %v1252_v38 = vpack.c.bf16 %v1248_v36, %v1244_v34  ;;  %v1254_v39 = vpack.c.bf16 %v1250_v41, %v1246_v35  ;;  %v1730_v54 = vsel %vm299_vm0, %v5496_v49, 0  ;;  %v6713_v59 = vld [vmem:[%s8896_s4 + $0x42c] ss:$16 sps:$4 sm:$0xff]   ;;  %v6708_v61 = vld [vmem:[%s8896_s4 + $0x420] ss:$16 sps:$4 sm:$0xff]  }
 0x204   :  { %v6711_v34 = vld [vmem:[%s8896_s4 + $0x428] ss:$16 sps:$4 sm:$0xff]   ;;  %v6716_v35 = vld [vmem:[%s8896_s4 + $0x444] ss:$16 sps:$4 sm:$0xff]   ;;  %v6719_v36 = vld [vmem:[%s8896_s4 + $0x44c] ss:$16 sps:$4 sm:$0xff]  }
 0x205   :  { %1479 = vmatprep.mubr.bf16.mxu0 %v1252_v38  ;;  %1520 = vmatprep.mubr.bf16.mxu1 %v1254_v39  ;;  %v6714_v41 = vld [vmem:[%s8896_s4 + $0x440] ss:$16 sps:$4 sm:$0xff]   ;;  %v6723_v38 = vld [vmem:[%s8896_s4 + $0x468] ss:$16 sps:$4 sm:$0xff]   ;;  %v6728_v39 = vld [vmem:[%s8896_s4 + $0x484] ss:$16 sps:$4 sm:$0xff]  }
 0x206   :  { %1480 = vmatmul.mubr.bf16.vlgmr.msra.gmra.mrb[8].mxu0 %v1251_v45  ;;  %1521 = vmatmul.mubr.bf16.vlgmr.msra.gmra.mrb[8].mxu1 %v1253_v46  ;;  %v6722_v45 = vld [vmem:[%s8896_s4 + $0x464] ss:$16 sps:$4 sm:$0xff]   ;;  %v6725_v46 = vld [vmem:[%s8896_s4 + $0x46c] ss:$16 sps:$4 sm:$0xff]   ;;  %v6720_v37 = vld [vmem:[%s8896_s4 + $0x460] ss:$16 sps:$4 sm:$0xff]  }
 0x207   :  { %1736 = vmatpush1.bf16.msra.mxu0 %v6692_v40  ;;  %1767 = vmatprep.mubr.bf16.mxu0 %v6973_v1  ;;  %v6731_v40 = vld [vmem:[%s8896_s4 + $0x48c] ss:$16 sps:$4 sm:$0xff]   ;;  %v6729_v44 = vld [vmem:[%s8896_s4 + $0x488] ss:$16 sps:$4 sm:$0xff]   ;;  %v6732_v49 = vld [vmem:[%s8896_s4 + $0x4a0] ss:$16 sps:$4 sm:$0xff]  }
 0x208   :  { %5498 = vmatprep.subr.msk.bf16.mxu0 %vm299_vm0, %v5495_v43  ;;  %1779 = vmatpush1.bf16.msra.mxu1 %v6697_v47  ;;  %v6726_v43 = vld [vmem:[%s8896_s4 + $0x480] ss:$16 sps:$4 sm:$0xff]   ;;  %v6734_v47 = vld [vmem:[%s8896_s4 + $0x4a4] ss:$16 sps:$4 sm:$0xff]   ;;  %v6735_v50 = vld [vmem:[%s8896_s4 + $0x4a8] ss:$16 sps:$4 sm:$0xff]  }
 0x209   :  { %5500 = vmatprep.subr.msk.bf16.mxu1 %vm299_vm0, %v5497_v48  ;;  %1810 = vmatprep.mubr.bf16.mxu1 %v6973_v1  ;;  %v6710_v1 = vld [vmem:[%s8896_s4 + $0x424] ss:$16 sps:$4 sm:$0xff]   ;;  %v6737_v48 = vld [vmem:[%s8896_s4 + $0x4ac] ss:$16 sps:$4 sm:$0xff]  }
 0x20a   :  { %v6740_v51 = vld [vmem:[%s8896_s4 + $0x4c4] ss:$16 sps:$4 sm:$0xff]  }
 0x20b   :  { %1738 = vmatpush1.bf16.msra.mxu0 %v1724_v52  ;;  %v6743_v52 = vld [vmem:[%s8896_s4 + $0x4cc] ss:$16 sps:$4 sm:$0xff]  }
 0x20c   :  { %1781 = vmatpush1.bf16.msra.mxu1 %v1730_v54  ;;  %2494 = vmatprep.subr.bf16.mxu0 %v6704_v53  ;;  %v6738_v53 = vld [vmem:[%s8896_s4 + $0x4c0] ss:$16 sps:$4 sm:$0xff]   ;;  %v6741_v54 = vld [vmem:[%s8896_s4 + $0x4c8] ss:$16 sps:$4 sm:$0xff]  }
 0x20d   :  { %2580 = vmatprep.subr.bf16.mxu1 %v6707_v55  ;;  %v6746_v55 = vld [vmem:[%s8896_s4 + $0x4e4] ss:$16 sps:$4 sm:$0xff]  }
 0x20e   :  { %5499 = vmatmul.mubr.msk.bf16.vlgmr.msra.gmra.mrb[12].mxu0 %vm295_vm1, %v1668_v56 }
 0x20f   :  { %5501 = vmatmul.mubr.msk.bf16.vlgmr.msra.gmra.mrb[12].mxu1 %vm295_vm1, %v1668_v56  ;;  %2495 = vmatpush1.bf16.msra.mxu0 %v6702_v57  ;;  %v6749_v56 = vld [vmem:[%s8896_s4 + $0x4ec] ss:$16 sps:$4 sm:$0xff]   ;;  %v6744_v57 = vld [vmem:[%s8896_s4 + $0x4e0] ss:$16 sps:$4 sm:$0xff]  }
 0x210   :  { %2581 = vmatpush1.bf16.msra.mxu1 %v6705_v58  ;;  %2496 = vmatprep.subr.bf16.mxu0 %v6710_v1  ;;  %v6747_v58 = vld [vmem:[%s8896_s4 + $0x4e8] ss:$16 sps:$4 sm:$0xff]   ;;  %v6752_v1 = vld [vmem:[%s8896_s4 + $0x504] ss:$16 sps:$4 sm:$0xff]  }
 0x211   :  { %2582 = vmatprep.subr.bf16.mxu1 %v6713_v59  ;;  %v6755_v59 = vld [vmem:[%s8896_s4 + $0x50c] ss:$16 sps:$4 sm:$0xff]  }
 0x213   :  { %2497 = vmatpush1.bf16.msra.mxu0 %v6708_v61  ;;  %v6750_v61 = vld [vmem:[%s8896_s4 + $0x500] ss:$16 sps:$4 sm:$0xff]  }
 0x214   :  { %2583 = vmatpush1.bf16.msra.mxu1 %v6711_v34  ;;  %2498 = vmatprep.subr.bf16.mxu0 %v6716_v35  ;;  %v6753_v34 = vld [vmem:[%s8896_s4 + $0x508] ss:$16 sps:$4 sm:$0xff]   ;;  %v6758_v35 = vld [vmem:[%s8896_s4 + $0x524] ss:$16 sps:$4 sm:$0xff]  }
 0x215   :  { %2584 = vmatprep.subr.bf16.mxu1 %v6719_v36  ;;  %v6761_v36 = vld [vmem:[%s8896_s4 + $0x52c] ss:$16 sps:$4 sm:$0xff]  }
 0x217   :  { %2499 = vmatpush1.bf16.msra.mxu0 %v6714_v41  ;;  %v6756_v41 = vld [vmem:[%s8896_s4 + $0x520] ss:$16 sps:$4 sm:$0xff]  }
 0x218   :  { %2585 = vmatpush1.bf16.msra.mxu1 %v6717_v42  ;;  %2500 = vmatprep.subr.bf16.mxu0 %v6722_v45  ;;  %v6759_v42 = vld [vmem:[%s8896_s4 + $0x528] ss:$16 sps:$4 sm:$0xff]   ;;  %v6764_v45 = vld [vmem:[%s8896_s4 + $0x544] ss:$16 sps:$4 sm:$0xff]  }
 0x219   :  { %2586 = vmatprep.subr.bf16.mxu1 %v6725_v46  ;;  %v6767_v46 = vld [vmem:[%s8896_s4 + $0x54c] ss:$16 sps:$4 sm:$0xff]  }
 0x21b   :  { %2501 = vmatpush1.bf16.msra.mxu0 %v6720_v37  ;;  %v6762_v37 = vld [vmem:[%s8896_s4 + $0x540] ss:$16 sps:$4 sm:$0xff]  }
 0x21c   :  { %2587 = vmatpush1.bf16.msra.mxu1 %v6723_v38  ;;  %2502 = vmatprep.subr.bf16.mxu0 %v6728_v39  ;;  %v6765_v38 = vld [vmem:[%s8896_s4 + $0x548] ss:$16 sps:$4 sm:$0xff]   ;;  %v6770_v39 = vld [vmem:[%s8896_s4 + $0x564] ss:$16 sps:$4 sm:$0xff]  }
 0x21d   :  { %2588 = vmatprep.subr.bf16.mxu1 %v6731_v40  ;;  %v6773_v40 = vld [vmem:[%s8896_s4 + $0x56c] ss:$16 sps:$4 sm:$0xff]  }
 0x21f   :  { %2503 = vmatpush1.bf16.msra.mxu0 %v6726_v43  ;;  %v6768_v43 = vld [vmem:[%s8896_s4 + $0x560] ss:$16 sps:$4 sm:$0xff]  }
 0x220   :  { %2589 = vmatpush1.bf16.msra.mxu1 %v6729_v44  ;;  %2504 = vmatprep.subr.bf16.mxu0 %v6734_v47  ;;  %v6771_v44 = vld [vmem:[%s8896_s4 + $0x568] ss:$16 sps:$4 sm:$0xff]   ;;  %v6776_v47 = vld [vmem:[%s8896_s4 + $0x584] ss:$16 sps:$4 sm:$0xff]  }
 0x221   :  { %2590 = vmatprep.subr.bf16.mxu1 %v6737_v48  ;;  %v6779_v48 = vld [vmem:[%s8896_s4 + $0x58c] ss:$16 sps:$4 sm:$0xff]  }
 0x223   :  { %2505 = vmatpush1.bf16.msra.mxu0 %v6732_v49  ;;  %v6774_v49 = vld [vmem:[%s8896_s4 + $0x580] ss:$16 sps:$4 sm:$0xff]  }
 0x224   :  { %2591 = vmatpush1.bf16.msra.mxu1 %v6735_v50  ;;  %2506 = vmatprep.subr.bf16.mxu0 %v6740_v51  ;;  %v6777_v50 = vld [vmem:[%s8896_s4 + $0x588] ss:$16 sps:$4 sm:$0xff]   ;;  %v6782_v51 = vld [vmem:[%s8896_s4 + $0x5a4] ss:$16 sps:$4 sm:$0xff]  }
 0x225   :  { %2592 = vmatprep.subr.bf16.mxu1 %v6743_v52  ;;  %v6785_v52 = vld [vmem:[%s8896_s4 + $0x5ac] ss:$16 sps:$4 sm:$0xff]  }
 0x227   :  { %2507 = vmatpush1.bf16.msra.mxu0 %v6738_v53  ;;  %v6780_v53 = vld [vmem:[%s8896_s4 + $0x5a0] ss:$16 sps:$4 sm:$0xff]  }
 0x228   :  { %2593 = vmatpush1.bf16.msra.mxu1 %v6741_v54  ;;  %2508 = vmatprep.subr.bf16.mxu0 %v6746_v55  ;;  %v6783_v54 = vld [vmem:[%s8896_s4 + $0x5a8] ss:$16 sps:$4 sm:$0xff]   ;;  %v6788_v55 = vld [vmem:[%s8896_s4 + $0x5c4] ss:$16 sps:$4 sm:$0xff]  }
 0x229   :  { %2594 = vmatprep.subr.bf16.mxu1 %v6749_v56  ;;  %v6791_v56 = vld [vmem:[%s8896_s4 + $0x5cc] ss:$16 sps:$4 sm:$0xff]  }
 0x22b   :  { %2509 = vmatpush1.bf16.msra.mxu0 %v6744_v57  ;;  %v6786_v57 = vld [vmem:[%s8896_s4 + $0x5c0] ss:$16 sps:$4 sm:$0xff]  }
 0x22c   :  { %2595 = vmatpush1.bf16.msra.mxu1 %v6747_v58  ;;  %2510 = vmatprep.subr.bf16.mxu0 %v6752_v1  ;;  %v6789_v58 = vld [vmem:[%s8896_s4 + $0x5c8] ss:$16 sps:$4 sm:$0xff]   ;;  %v6794_v1 = vld [vmem:[%s8896_s4 + $0x5e4] ss:$16 sps:$4 sm:$0xff]  }
 0x22d   :  { %2596 = vmatprep.subr.bf16.mxu1 %v6755_v59  ;;  %v6797_v59 = vld [vmem:[%s8896_s4 + $0x5ec] ss:$16 sps:$4 sm:$0xff]  }
 0x22f   :  { %2511 = vmatpush1.bf16.msra.mxu0 %v6750_v61  ;;  %v6792_v61 = vld [vmem:[%s8896_s4 + $0x5e0] ss:$16 sps:$4 sm:$0xff]  }
 0x230   :  { %2597 = vmatpush1.bf16.msra.mxu1 %v6753_v34  ;;  %2512 = vmatprep.subr.bf16.mxu0 %v6758_v35  ;;  %v6795_v34 = vld [vmem:[%s8896_s4 + $0x5e8] ss:$16 sps:$4 sm:$0xff]   ;;  %v6800_v35 = vld [vmem:[%s8896_s4 + $0x604] ss:$16 sps:$4 sm:$0xff]  }
 0x231   :  { %2598 = vmatprep.subr.bf16.mxu1 %v6761_v36  ;;  %v6803_v36 = vld [vmem:[%s8896_s4 + $0x60c] ss:$16 sps:$4 sm:$0xff]  }
 0x233   :  { %2513 = vmatpush1.bf16.msra.mxu0 %v6756_v41 }
 0x234   :  { %2599 = vmatpush1.bf16.msra.mxu1 %v6759_v42  ;;  %2514 = vmatprep.subr.bf16.mxu0 %v6764_v45 }
 0x235   :  { %2600 = vmatprep.subr.bf16.mxu1 %v6767_v46 }
 0x237   :  { %2515 = vmatpush1.bf16.msra.mxu0 %v6762_v37 }
 0x238   :  { %2601 = vmatpush1.bf16.msra.mxu1 %v6765_v38  ;;  %2516 = vmatprep.subr.bf16.mxu0 %v6770_v39 }
 0x239   :  { %2602 = vmatprep.subr.bf16.mxu1 %v6773_v40 }
 0x23b   :  { %2517 = vmatpush1.bf16.msra.mxu0 %v6768_v43 }
 0x23c   :  { %2603 = vmatpush1.bf16.msra.mxu1 %v6771_v44  ;;  %2518 = vmatprep.subr.bf16.mxu0 %v6776_v47 }
 0x23d   :  { %2604 = vmatprep.subr.bf16.mxu1 %v6779_v48 }
 0x23f   :  { %2519 = vmatpush1.bf16.msra.mxu0 %v6774_v49 }
 0x240   :  { %2605 = vmatpush1.bf16.msra.mxu1 %v6777_v50  ;;  %2520 = vmatprep.subr.bf16.mxu0 %v6782_v51 }
 0x241   :  { %2606 = vmatprep.subr.bf16.mxu1 %v6785_v52 }
 0x243   :  { %2521 = vmatpush1.bf16.msra.mxu0 %v6780_v53 }
 0x244   :  { %2607 = vmatpush1.bf16.msra.mxu1 %v6783_v54  ;;  %2522 = vmatprep.subr.bf16.mxu0 %v6788_v55 }
 0x245   :  { %2608 = vmatprep.subr.bf16.mxu1 %v6791_v56 }
 0x247   :  { %2523 = vmatpush1.bf16.msra.mxu0 %v6786_v57 }
 0x248   :  { %2609 = vmatpush1.bf16.msra.mxu1 %v6789_v58  ;;  %2524 = vmatprep.subr.bf16.mxu0 %v6794_v1  ;;  %v6798_v58 = vld [vmem:[%s8896_s4 + $0x600] ss:$16 sps:$4 sm:$0xff]  }
 0x249   :  { %2610 = vmatprep.subr.bf16.mxu1 %v6797_v59  ;;  %v6809_v59 = vld [vmem:[%s8896_s4 + $0x62c] ss:$16 sps:$4 sm:$0xff]  }
 0x24b   :  { %2525 = vmatpush1.bf16.msra.mxu0 %v6792_v61 }
 0x24c   :  { %2611 = vmatpush1.bf16.msra.mxu1 %v6795_v34  ;;  %2537 = vmatprep.subr.bf16.mxu0 %v6800_v35  ;;  %v6812_v34 = vld [vmem:[%s8896_s4 + $0x644] ss:$16 sps:$4 sm:$0xff]   ;;  %v6815_v35 = vld [vmem:[%s8896_s4 + $0x64c] ss:$16 sps:$4 sm:$0xff]  }
 0x24d   :  { %2623 = vmatprep.subr.bf16.mxu1 %v6803_v36  ;;  %v6810_v36 = vld [vmem:[%s8896_s4 + $0x640] ss:$16 sps:$4 sm:$0xff]  }
 0x2d9   :  { %v5789_v62 = vpop.f32.mrb[8].mxu0  ;;  %v5811_v63 = vpop.f32.mrb[8].mxu1 }
 0x2da   :  { %v5790_v2 = vpop.f32.mrb[9].mxu0  ;;  %v5812_v3 = vpop.f32.mrb[9].mxu1 }
 0x2db   :  { %v5791_v4 = vadd.f32 %v5790_v2, %v5789_v62  ;;  %v5813_v5 = vadd.f32 %v5812_v3, %v5811_v63  ;;  %v5792_v6 = vpop.f32.mrb[10].mxu0  ;;  %v5814_v60 = vpop.f32.mrb[10].mxu1  ;;  %v6813_v62 = vld [vmem:[%s8896_s4 + $0x648] ss:$16 sps:$4 sm:$0xff]   ;;  %v6818_v63 = vld [vmem:[%s8896_s4 + $0x664] ss:$16 sps:$4 sm:$0xff]  }
 0x2dc   :  { %v5793_v8 = vpop.f32.mrb[11].mxu0  ;;  %v5815_v9 = vpop.f32.mrb[11].mxu1  ;;  %v6816_v2 = vld [vmem:[%s8896_s4 + $0x660] ss:$16 sps:$4 sm:$0xff]   ;;  %v6819_v3 = vld [vmem:[%s8896_s4 + $0x668] ss:$16 sps:$4 sm:$0xff]  }
 0x2dd   :  { %v1482_v10 = vadd.f32 %v5791_v4, %v242_v0  ;;  %v5794_v11 = vadd.f32 %v5793_v8, %v5792_v6  ;;  %v5816_v12 = vadd.f32 %v5815_v9, %v5814_v60  ;;  %v6824_v4 = vld [vmem:[%s8896_s4 + $0x684] ss:$16 sps:$4 sm:$0xff]   ;;  %v6822_v6 = vld [vmem:[%s8896_s4 + $0x680] ss:$16 sps:$4 sm:$0xff]   ;;  %v6825_v60 = vld [vmem:[%s8896_s4 + $0x688] ss:$16 sps:$4 sm:$0xff]  }
 0x2de   :  { %v6833_v8 = vld [vmem:[%s8896_s4 + $0x6ac] ss:$16 sps:$4 sm:$0xff]   ;;  %v6828_v9 = vld [vmem:[%s8896_s4 + $0x6a0] ss:$16 sps:$4 sm:$0xff]  }
 0x2df   :  { %v7950_v14 = vadd.f32 %v5813_v5, %v1482_v10  ;;  %v1485_v15 = vadd.f32 %v5794_v11, %v242_v0  ;;  %v6821_v0 = vld [vmem:[%s8896_s4 + $0x66c] ss:$16 sps:$4 sm:$0xff]   ;;  %v6831_v10 = vld [vmem:[%s8896_s4 + $0x6a8] ss:$16 sps:$4 sm:$0xff]   ;;  %v6836_v11 = vld [vmem:[%s8896_s4 + $0x6c4] ss:$16 sps:$4 sm:$0xff]  }
 0x2e0   :  { %v6827_v5 = vld [vmem:[%s8896_s4 + $0x68c] ss:$16 sps:$4 sm:$0xff]  }
 0x2e1   :  { %v7955_v19 = vadd.f32 %v5816_v12, %v1485_v15  ;;  %v1769_v20 = vpop.f32.mrb[12].mxu0  ;;  %v6839_v12 = vld [vmem:[%s8896_s4 + $0x6cc] ss:$16 sps:$4 sm:$0xff]   ;;  %v6837_v15 = vld [vmem:[%s8896_s4 + $0x6c8] ss:$16 sps:$4 sm:$0xff]  }
 0x2e2   :  { %v1770_v22 = vadd.f32 %v1769_v20, %v1673_v13  ;;  %v1771_v25 = vpop.f32.mrb[13].mxu0  ;;  %v1812_v28 = vpop.f32.mrb[12].mxu1  ;;  %v6843_v20 = vld [vmem:[%s8896_s4 + $0x6e8] ss:$16 sps:$4 sm:$0xff]  }
 0x2e3   :  { %v6393_v41 = vpack.c.bf16 %v7955_v19, %v7950_v14  ;;  %v1772_v42 = vadd.f32 %v1771_v25, %v1677_v16  ;;  %v1773_v45 = vpop.f32.mrb[14].mxu0  ;;  %v1813_v46 = vadd.f32 %v1812_v28, %v1681_v17  ;;  %v1814_v37 = vpop.f32.mrb[13].mxu1  ;;  %v6851_v25 = vld [vmem:[%s8896_s4 + $0x70c] ss:$16 sps:$4 sm:$0xff]   ;;  %v6846_v28 = vld [vmem:[%s8896_s4 + $0x700] ss:$16 sps:$4 sm:$0xff]  }
 0x2e4   :  { %v1774_v38 = vadd.f32 %v1773_v45, %v1673_v13  ;;  %v1775_v39 = vpop.f32.mrb[15].mxu0  ;;  %v1815_v40 = vadd.f32 %v1814_v37, %v1685_v18  ;;  %v1816_v43 = vpop.f32.mrb[14].mxu1  ;;  %v1821_v29 = vmax.f32 %v1770_v22, 0.0  ;;  %v6834_v13 = vld [vmem:[%s8896_s4 + $0x6c0] ss:$16 sps:$4 sm:$0xff]   ;;  %v6897_v19 = vld [vmem:[%s8900_s6 + $0x28] sm:$0xff]  }
 0x2e5   :  { %v1776_v44 = vadd.f32 %v1775_v39, %v1677_v16  ;;  %v1823_v47 = vmax.f32 %v1813_v46, 0.0  ;;  %v1817_v27 = vadd.f32 %v1816_v43, %v1681_v17  ;;  %v1818_v48 = vpop.f32.mrb[15].mxu1  ;;  %v1822_v52 = vmax.f32 %v1772_v42, 0.0  ;;  %v6842_v16 = vld [vmem:[%s8896_s4 + $0x6e4] ss:$16 sps:$4 sm:$0xff]  }
 0x2e6   :  { %v1825_v49 = vmax.f32 %v1774_v38, 0.0  ;;  %v1824_v50 = vmax.f32 %v1815_v40, 0.0  ;;  %v1819_v51 = vadd.f32 %v1818_v48, %v1685_v18  ;;  %v6845_v17 = vld [vmem:[%s8896_s4 + $0x6ec] ss:$16 sps:$4 sm:$0xff]   ;;  %v6840_v18 = vld [vmem:[%s8896_s4 + $0x6e0] ss:$16 sps:$4 sm:$0xff]  }
 0x2e7   :  { %v1826_v53 = vmax.f32 %v1776_v44, 0.0  ;;  %v1827_v54 = vmax.f32 %v1817_v27, 0.0  ;;  %v6848_v22 = vld [vmem:[%s8896_s4 + $0x704] ss:$16 sps:$4 sm:$0xff]   ;;  %v6849_v42 = vld [vmem:[%s8896_s4 + $0x708] ss:$16 sps:$4 sm:$0xff]  }
 0x2e8   :  { %v1829_v55 = vpack.c.bf16 %v1825_v49, %v1821_v29  ;;  %v1828_v56 = vmax.f32 %v1819_v51, 0.0  ;;  %v6854_v45 = vld [vmem:[%s8896_s4 + $0x724] ss:$16 sps:$4 sm:$0xff]   ;;  %v6857_v46 = vld [vmem:[%s8896_s4 + $0x72c] ss:$16 sps:$4 sm:$0xff]  }
 0x2e9   :  { %v1830_v57 = vpack.c.bf16 %v1826_v53, %v1822_v52  ;;  %v7973_v1 = vpack.c.bf16 %v1827_v54, %v1823_v47  ;;  %v6852_v37 = vld [vmem:[%s8896_s4 + $0x720] ss:$16 sps:$4 sm:$0xff]   ;;  %v6855_v38 = vld [vmem:[%s8896_s4 + $0x728] ss:$16 sps:$4 sm:$0xff]   ;;  %v6860_v39 = vld [vmem:[%s8896_s4 + $0x744] ss:$16 sps:$4 sm:$0xff]  }
 0x2ea   :  { %v1832_v61 = vpack.c.bf16 %v1828_v56, %v1824_v50  ;;  %v6863_v40 = vld [vmem:[%s8896_s4 + $0x74c] ss:$16 sps:$4 sm:$0xff]   ;;  %v6858_v43 = vld [vmem:[%s8896_s4 + $0x740] ss:$16 sps:$4 sm:$0xff]   ;;  %v6861_v44 = vld [vmem:[%s8896_s4 + $0x748] ss:$16 sps:$4 sm:$0xff]  }
 0x2eb   :  { %2526 = vmatprep.mubr.bf16.mxu0 %v1830_v57  ;;  %2612 = vmatprep.mubr.bf16.mxu1 %v1830_v57  ;;  %v6866_v47 = vld [vmem:[%s8896_s4 + $0x764] ss:$16 sps:$4 sm:$0xff]   ;;  %v6869_v27 = vld [vmem:[%s8896_s4 + $0x76c] ss:$16 sps:$4 sm:$0xff]   ;;  %v6864_v48 = vld [vmem:[%s8896_s4 + $0x760] ss:$16 sps:$4 sm:$0xff]  }
 0x2ec   :  { %2527 = vmatmul.mubr.bf16.vlgmr.msra.gmra.mrb[16].mxu0 %v1829_v55  ;;  %2613 = vmatmul.mubr.bf16.vlgmr.msra.gmra.mrb[16].mxu1 %v1829_v55  ;;  %v6867_v29 = vld [vmem:[%s8896_s4 + $0x768] ss:$16 sps:$4 sm:$0xff]   ;;  %v6872_v49 = vld [vmem:[%s8896_s4 + $0x784] ss:$16 sps:$4 sm:$0xff]   ;;  %v6875_v50 = vld [vmem:[%s8896_s4 + $0x78c] ss:$16 sps:$4 sm:$0xff]  }
 0x2ed   :  { %2538 = vmatpush1.bf16.msra.mxu0 %v6798_v58  ;;  %2624 = vmatpush1.bf16.msra.mxu1 %v6801_v30  ;;  %v6870_v51 = vld [vmem:[%s8896_s4 + $0x780] ss:$16 sps:$4 sm:$0xff]   ;;  %v6873_v52 = vld [vmem:[%s8896_s4 + $0x788] ss:$16 sps:$4 sm:$0xff]   ;;  %v6878_v53 = vld [vmem:[%s8896_s4 + $0x7a4] ss:$16 sps:$4 sm:$0xff]   ;;  %v2695_v30 = vpop.permute.xlu0 %2694 }
 0x2ee   :  { %2539 = vmatprep.subr.bf16.mxu0 %v6806_v32  ;;  %2625 = vmatprep.subr.bf16.mxu1 %v6809_v59  ;;  %v6881_v54 = vld [vmem:[%s8896_s4 + $0x7ac] ss:$16 sps:$4 sm:$0xff]   ;;  %v6876_v55 = vld [vmem:[%s8896_s4 + $0x7a0] ss:$16 sps:$4 sm:$0xff]   ;;  %v6879_v56 = vld [vmem:[%s8896_s4 + $0x7a8] ss:$16 sps:$4 sm:$0xff]   ;;  %v2727_v32 = vpop.permute.xlu1 %2726 }
 0x2ef   :  { %2569 = vmatprep.mubr.bf16.mxu0 %v1832_v61  ;;  %2655 = vmatprep.mubr.bf16.mxu1 %v1832_v61  ;;  %v6884_v57 = vld [vmem:[%s8896_s4 + $0x7c4] ss:$16 sps:$4 sm:$0xff]   ;;  %v6887_v58 = vld [vmem:[%s8896_s4 + $0x7cc] ss:$16 sps:$4 sm:$0xff]   ;;  %v6882_v59 = vld [vmem:[%s8896_s4 + $0x7c0] ss:$16 sps:$4 sm:$0xff]  }
 0x2f0   :  { %v6885_v61 = vld [vmem:[%s8896_s4 + $0x7c8] ss:$16 sps:$4 sm:$0xff]   ;;  %v6895_v14 = vld [vmem:[%s8900_s6 + $0x20] sm:$0xff]  }
 0x2f1   :  { %2540 = vmatpush1.bf16.msra.mxu0 %v6804_v31  ;;  %2626 = vmatpush1.bf16.msra.mxu1 %v6807_v33  ;;  %v6890_v31 = vld [vmem:[%s8896_s4 + $0x7e4] ss:$16 sps:$4 sm:$0xff]   ;;  %v6893_v33 = vld [vmem:[%s8896_s4 + $0x7ec] ss:$16 sps:$4 sm:$0xff]  }
 0x2f2   :  { %2541 = vmatprep.subr.bf16.mxu0 %v6812_v34  ;;  %2627 = vmatprep.subr.bf16.mxu1 %v6815_v35  ;;  %v2679_v34 = vpop.permute.xlu0 %2678  ;;  %v2711_v35 = vpop.permute.xlu1 %2710 }
 0x2f5   :  { %2542 = vmatpush1.bf16.msra.mxu0 %v6810_v36  ;;  %2628 = vmatpush1.bf16.msra.mxu1 %v6813_v62  ;;  %v6888_v36 = vld [vmem:[%s8896_s4 + $0x7e0] ss:$16 sps:$4 sm:$0xff]   ;;  %v6891_v62 = vld [vmem:[%s8896_s4 + $0x7e8] ss:$16 sps:$4 sm:$0xff]  }
 0x2f6   :  { %2543 = vmatprep.subr.bf16.mxu0 %v6818_v63  ;;  %2629 = vmatprep.subr.bf16.mxu1 %v6821_v0  ;;  %v2697_v63 = vpop.permute.xlu0 %2696  ;;  %v2681_v0 = vpop.permute.xlu1 %2680 }
 0x2f9   :  { %2544 = vmatpush1.bf16.msra.mxu0 %v6816_v2  ;;  %2630 = vmatpush1.bf16.msra.mxu1 %v6819_v3 }
 0x2fa   :  { %2545 = vmatprep.subr.bf16.mxu0 %v6824_v4  ;;  %2631 = vmatprep.subr.bf16.mxu1 %v6827_v5  ;;  %v2729_v2 = vpop.permute.xlu0 %2728  ;;  %v2713_v3 = vpop.permute.xlu1 %2712 }
 0x2fd   :  { %2546 = vmatpush1.bf16.msra.mxu0 %v6822_v6  ;;  %2632 = vmatpush1.bf16.msra.mxu1 %v6825_v60 }
 0x2fe   :  { %2547 = vmatprep.subr.bf16.mxu0 %v6830_v7  ;;  %2633 = vmatprep.subr.bf16.mxu1 %v6833_v8  ;;  %v2699_v4 = vpop.permute.xlu0 %2698  ;;  %v2683_v5 = vpop.permute.xlu1 %2682 }
 0x301   :  { %2548 = vmatpush1.bf16.msra.mxu0 %v6828_v9  ;;  %2634 = vmatpush1.bf16.msra.mxu1 %v6831_v10 }
 0x302   :  { %2549 = vmatprep.subr.bf16.mxu0 %v6836_v11  ;;  %2635 = vmatprep.subr.bf16.mxu1 %v6839_v12  ;;  %v2731_v6 = vpop.permute.xlu0 %2730  ;;  %v2715_v60 = vpop.permute.xlu1 %2714 }
 0x305   :  { %2550 = vmatpush1.bf16.msra.mxu0 %v6834_v13  ;;  %2636 = vmatpush1.bf16.msra.mxu1 %v6837_v15 }
 0x306   :  { %2551 = vmatprep.subr.bf16.mxu0 %v6842_v16  ;;  %2637 = vmatprep.subr.bf16.mxu1 %v6845_v17  ;;  %v2701_v7 = vpop.permute.xlu0 %2700  ;;  %v2685_v8 = vpop.permute.xlu1 %2684 }
 0x309   :  { %2552 = vmatpush1.bf16.msra.mxu0 %v6840_v18  ;;  %2638 = vmatpush1.bf16.msra.mxu1 %v6843_v20 }
 0x30a   :  { %2553 = vmatprep.subr.bf16.mxu0 %v6848_v22  ;;  %2639 = vmatprep.subr.bf16.mxu1 %v6851_v25  ;;  %v2733_v9 = vpop.permute.xlu0 %2732 }
 0x30d   :  { %2554 = vmatpush1.bf16.msra.mxu0 %v6846_v28  ;;  %2640 = vmatpush1.bf16.msra.mxu1 %v6849_v42 }
 0x30e   :  { %2555 = vmatprep.subr.bf16.mxu0 %v6854_v45  ;;  %2641 = vmatprep.subr.bf16.mxu1 %v6857_v46  ;;  %v2703_v10 = vpop.permute.xlu0 %2702 }
 0x311   :  { %2556 = vmatpush1.bf16.msra.mxu0 %v6852_v37  ;;  %2642 = vmatpush1.bf16.msra.mxu1 %v6855_v38  ;;  %v6975_v38 = vmov 0.0|0.0  }
 0x312   :  { %2557 = vmatprep.subr.bf16.mxu0 %v6860_v39  ;;  %2643 = vmatprep.subr.bf16.mxu1 %v6863_v40  ;;  %v2735_v12 = vpop.permute.xlu0 %2734  ;;  %v5489_v39 = vld [vmem:[%s8898_s2 + $0x4] ss:$8 sm:$0xf] }
 0x313   :  { %v1837_v40 = vrot.slane %v5489_v39, %v7257_v21 }
 0x315   :  { %2558 = vmatpush1.bf16.msra.mxu0 %v6858_v43  ;;  %2644 = vmatpush1.bf16.msra.mxu1 %v6861_v44  ;;  %v1845_v43 = vrot.slane %v5489_v39, %v7264_v24  ;;  %v1841_v44 = vrot.slane %v5489_v39, %v7262_v23 }
 0x316   :  { %2559 = vmatprep.subr.bf16.mxu0 %v6866_v47  ;;  %2645 = vmatprep.subr.bf16.mxu1 %v6869_v27  ;;  %v2705_v15 = vpop.permute.xlu0 %2704  ;;  %v1849_v47 = vrot.slane %v5489_v39, %v7267_v26  ;;  %v6901_v39 = vld [vmem:[%s8900_s6 + $0x38] sm:$0xff]  }
 0x319   :  { %2560 = vmatpush1.bf16.msra.mxu0 %v6864_v48  ;;  %2646 = vmatpush1.bf16.msra.mxu1 %v6867_v29 }
 0x31a   :  { %2561 = vmatprep.subr.bf16.mxu0 %v6872_v49  ;;  %2647 = vmatprep.subr.bf16.mxu1 %v6875_v50  ;;  %v2737_v17 = vpop.permute.xlu0 %2736 }
 0x31d   :  { %2562 = vmatpush1.bf16.msra.mxu0 %v6870_v51  ;;  %2648 = vmatpush1.bf16.msra.mxu1 %v6873_v52 }
 0x31e   :  { %2563 = vmatprep.subr.bf16.mxu0 %v6878_v53  ;;  %2649 = vmatprep.subr.bf16.mxu1 %v6881_v54  ;;  %v2707_v20 = vpop.permute.xlu0 %2706 }
 0x321   :  { %2564 = vmatpush1.bf16.msra.mxu0 %v6876_v55  ;;  %2650 = vmatpush1.bf16.msra.mxu1 %v6879_v56 }
 0x322   :  { %2565 = vmatprep.subr.bf16.mxu0 %v6884_v57  ;;  %2651 = vmatprep.subr.bf16.mxu1 %v6887_v58  ;;  %v2739_v25 = vpop.permute.xlu0 %2738 }
 0x325   :  { %2566 = vmatpush1.bf16.msra.mxu0 %v6882_v59  ;;  %2652 = vmatpush1.bf16.msra.mxu1 %v6885_v61 }
 0x326   :  { %2567 = vmatprep.subr.bf16.mxu0 %v6890_v31  ;;  %2653 = vmatprep.subr.bf16.mxu1 %v6893_v33  ;;  %v2709_v42 = vpop.permute.xlu0 %2708 }
 0x329   :  { %2568 = vmatpush1.bf16.msra.mxu0 %v6888_v36  ;;  %2654 = vmatpush1.bf16.msra.mxu1 %v6891_v62 }
 0x32a   :  { %5817 = vmatprep.subr.bf16.mxu0 %v2695_v30  ;;  %5839 = vmatprep.subr.bf16.mxu1 %v2727_v32  ;;  %v2741_v46 = vpop.permute.xlu0 %2740 }
 0x32c   :  { %2570 = vmatmul.mubr.bf16.vlgmr.msra.gmra.mrb[16].mxu0 %v7973_v1  ;;  %2656 = vmatmul.mubr.bf16.vlgmr.msra.gmra.mrb[16].mxu1 %v7973_v1  ;;  %v2717_v1 = vpop.permute.xlu1 %2716 }
 0x32d   :  { %5818 = vmatpush3.bf16.msra.mxu0 %v2679_v34  ;;  %5840 = vmatpush3.bf16.msra.mxu1 %v2711_v35 }
 0x32e   :  { %5819 = vmatprep.subr.bf16.mxu0 %v2697_v63  ;;  %5841 = vmatprep.subr.bf16.mxu1 %v2729_v2  ;;  %v2856_v2 = vld [vmem:[%s8899_s1] sm:$0xf] }
 0x330   :  { %v2687_v11 = vpop.permute.xlu1 %2686 }
 0x331   :  { %5820 = vmatpush3.bf16.msra.mxu0 %v2681_v0  ;;  %5842 = vmatpush3.bf16.msra.mxu1 %v2713_v3  ;;  %v6977_v0 = vmov 0.0  }
 0x332   :  { %5821 = vmatprep.subr.bf16.mxu0 %v2699_v4  ;;  %5843 = vmatprep.subr.bf16.mxu1 %v2731_v6  ;;  %5289 = vst [vmem:[%s8902_s8 + $0x8] sm:$0xff] %v6977_v0  ;;  %5288 = vst [vmem:[%s8902_s8] sm:$0xff] %v6977_v0 }
 0x334   :  { %v2719_v13 = vpop.permute.xlu1 %2718 }
 0x335   :  { %5822 = vmatpush3.bf16.msra.mxu0 %v2683_v5  ;;  %5844 = vmatpush3.bf16.msra.mxu1 %v2715_v60  ;;  %v1667_v5 = vld [vmem:[%s8898_s2 + $0x5] ss:$0 sm:$0xff] }
 0x336   :  { %5823 = vmatprep.subr.bf16.mxu0 %v2701_v7  ;;  %5845 = vmatprep.subr.bf16.mxu1 %v2733_v9 }
 0x338   :  { %v2689_v16 = vpop.permute.xlu1 %2688 }
 0x339   :  { %5824 = vmatpush3.bf16.msra.mxu0 %v2685_v8  ;;  %5846 = vmatpush3.bf16.msra.mxu1 %v2717_v1 }
 0x33a   :  { %5825 = vmatprep.subr.bf16.mxu0 %v2703_v10  ;;  %5847 = vmatprep.subr.bf16.mxu1 %v2735_v12 }
 0x33c   :  { %v2721_v18 = vpop.permute.xlu1 %2720 }
 0x33d   :  { %5826 = vmatpush3.bf16.msra.mxu0 %v2687_v11  ;;  %5848 = vmatpush3.bf16.msra.mxu1 %v2719_v13 }
 0x33e   :  { %5827 = vmatprep.subr.bf16.mxu0 %v2705_v15  ;;  %5849 = vmatprep.subr.bf16.mxu1 %v2737_v17 }
 0x340   :  { %v2691_v22 = vpop.permute.xlu1 %2690 }
 0x341   :  { %5828 = vmatpush3.bf16.msra.mxu0 %v2689_v16  ;;  %5850 = vmatpush3.bf16.msra.mxu1 %v2721_v18 }
 0x342   :  { %5829 = vmatprep.subr.bf16.mxu0 %v2707_v20  ;;  %5851 = vmatprep.subr.bf16.mxu1 %v2739_v25  ;;  %v6896_v25 = vld [vmem:[%s8900_s6 + $0x8] sm:$0xff]  }
 0x344   :  { %v2723_v28 = vpop.permute.xlu1 %2722 }
 0x345   :  { %5830 = vmatpush3.bf16.msra.mxu0 %v2691_v22  ;;  %5852 = vmatpush3.bf16.msra.mxu1 %v2723_v28  ;;  %v6894_v22 = vld [vmem:[%s8900_s6] sm:$0xff]   ;;  %v6898_v28 = vld [vmem:[%s8900_s6 + $0x10] sm:$0xff]  }
 0x346   :  { %5831 = vmatprep.subr.bf16.mxu0 %v2709_v42  ;;  %5853 = vmatprep.subr.bf16.mxu1 %v2741_v46  ;;  %v6900_v42 = vld [vmem:[%s8900_s6 + $0x18] sm:$0xff]  }
 0x348   :  { %v2693_v45 = vpop.permute.xlu1 %2692 }
 0x349   :  { %5832 = vmatpush3.bf16.msra.mxu0 %v2693_v45 }
 0x34a   :  { %6392 = vmatprep.subr.bf16.mxu0 %v6975_v38 }
 0x34c   :  { %v2725_v37 = vpop.permute.xlu1 %2724 }
 0x34d   :  { %5854 = vmatpush3.bf16.msra.mxu1 %v2725_v37 }
 0x34e   :  { %6395 = vmatprep.subr.bf16.mxu1 %v6975_v38 }
 0x3ff   :  { %v2571_v27 = vpop.f32.mrb[16].mxu0  ;;  %v2657_v48 = vpop.f32.mrb[16].mxu1 }
 0x400   :  { %v6425_v29 = vadd.f32 %v2571_v27, %v1837_v40  ;;  %v6429_v49 = vadd.f32 %v2657_v48, %v1845_v43  ;;  %v2573_v50 = vpop.f32.mrb[17].mxu0  ;;  %v2659_v51 = vpop.f32.mrb[17].mxu1  ;;  %v6903_v27 = vld [vmem:[%s8900_s6 + $0x48] sm:$0xff]  }
 0x401   :  { %v6426_v52 = vadd.f32 %v2573_v50, %v1841_v44  ;;  %v6430_v53 = vadd.f32 %v2659_v51, %v1849_v47  ;;  %v2575_v54 = vpop.f32.mrb[18].mxu0  ;;  %v2661_v55 = vpop.f32.mrb[18].mxu1  ;;  %v6904_v50 = vld [vmem:[%s8900_s6 + $0x50] sm:$0xff]  }
 0x402   :  { %v6427_v56 = vadd.f32 %v2575_v54, %v1837_v40  ;;  %v6431_v57 = vadd.f32 %v2661_v55, %v1845_v43  ;;  %v2577_v58 = vpop.f32.mrb[19].mxu0  ;;  %v2663_v21 = vpop.f32.mrb[19].mxu1  ;;  %v2666_v32 = vmax.f32 %v6425_v29, 0.0  ;;  %v2668_v23 = vmax.f32 %v6429_v49, 0.0  ;;  %v6902_v43 = vld [vmem:[%s8900_s6 + $0x40] sm:$0xff]   ;;  %v6912_v54 = vld [vmem:[%s8900_s6 + $0x68] sm:$0xff]  }
 0x403   :  { %v6428_v30 = vadd.f32 %v2577_v58, %v1841_v44  ;;  %v6432_v24 = vadd.f32 %v2663_v21, %v1849_v47  ;;  %v2667_v61 = vmax.f32 %v6426_v52, 0.0  ;;  %v2669_v31 = vmax.f32 %v6430_v53, 0.0  ;;  %v6905_v52 = vld [vmem:[%s8900_s6 + $0x58] sm:$0xff]   ;;  %v6911_v53 = vld [vmem:[%s8900_s6 + $0x60] sm:$0xff]  }
 0x404   :  { %v2670_v59 = vmax.f32 %v6427_v56, 0.0  ;;  %v2672_v26 = vmax.f32 %v6431_v57, 0.0  ;;  %v3154_v56 = vld [vmem:[%s8898_s2 + $0x6] ss:$0 sm:$0xff] }
 0x405   :  { %v2671_v33 = vmax.f32 %v6428_v30, 0.0  ;;  %v2673_v34 = vmax.f32 %v6432_v24, 0.0 }
 0x406   :  { %v2674_v35 = vpack.c.bf16 %v2670_v59, %v2666_v32  ;;  %v2676_v36 = vpack.c.bf16 %v2672_v26, %v2668_v23  ;;  %v6906_v23 = vld [vmem:[%s8901_s7] sm:$0xff]   ;;  %v6907_v26 = vld [vmem:[%s8901_s7 + $0x8] sm:$0xff]  }
 0x407   :  { %v2675_v62 = vpack.c.bf16 %v2671_v33, %v2667_v61  ;;  %v2677_v63 = vpack.c.bf16 %v2673_v34, %v2669_v31  ;;  %v6908_v61 = vld [vmem:[%s8901_s7 + $0x10] sm:$0xff]   ;;  %v6909_v31 = vld [vmem:[%s8901_s7 + $0x18] sm:$0xff]   ;;  %v6910_v33 = vld [vmem:[%s8901_s7 + $0x20] ss:$0 sps:$4 sm:$0xff]  }
 0x408   :  { %v34_v34 = vld [vmem:[%s8895_s0 + $0x20] sm:$0xff] }
 0x409   :  { %2806 = vmatprep.mubr.bf16.mxu0 %v2675_v62  ;;  %2847 = vmatprep.mubr.bf16.mxu1 %v2677_v63  ;;  %v36_v63 = vld [vmem:[%s8895_s0 + $0x30] sm:$0xff] }
 0x40a   :  { %2807 = vmatmul.mubr.bf16.vlgmr.msra.gmra.mrb[20].mxu0 %v2674_v35  ;;  %2848 = vmatmul.mubr.bf16.vlgmr.msra.gmra.mrb[20].mxu1 %v2676_v36  ;;  %v35_v35 = vld [vmem:[%s8895_s0 + $0x28] sm:$0xff]  ;;  %v3363_v36 = vsel %vm299_vm0, %v6910_v33, 0 }
 0x40b   :  { %6394 = vmatpush3.bf16.msra.mxu0 %v6393_v41  ;;  %6004 = vmatprep.mubr.msk.f32.mxu0 %vm6976_vm3, %v6977_v0  ;;  %v6899_v41 = vld [vmem:[%s8900_s6 + $0x30] sm:$0xff]   ;;  %v3312_v62 = vpack.c.bf16 %v35_v35, %v34_v34  ;;  %v6939_v33 = vld [vmem:[%s8901_s7 + $0x44] sm:$0xff]  }
 0x40c   :  { %6011 = vmatprep.mubr.msk.f32.mxu1 %vm6976_vm3, %v6977_v0  ;;  %6014 = vmatprep.subr.bf16.mxu0 %v6977_v0  ;;  %v6929_v34 = vld [vmem:[%s8901_s7 + $0x16c] sm:$0xff]  }
 0x40d   :  { %v6940_v35 = vld [vmem:[%s8901_s7 + $0x4c] sm:$0xff]  }
 0x412   :  { %6005 = vmatmul.mubr.msk.f32.vlgmr.msra.gmra.mrb[24].mxu0 %vm2857_vm2, %v2856_v2 }
 0x413   :  { %6022 = vmatprep.mubr.msk.bf16.mxu0 %vm6976_vm3, %v6977_v0  ;;  %6015 = vmatpush3.bf16.msra.mxu0 %v6895_v14 }
 0x414   :  { %6016 = vmatprep.subr.bf16.mxu0 %v6977_v0 }
 0x417   :  { %6017 = vmatpush3.bf16.msra.mxu0 %v6897_v19  ;;  %v38_v19 = vld [vmem:[%s8895_s0 + $0x40] sm:$0xff] }
 0x418   :  { %6018 = vmatprep.subr.bf16.mxu0 %v6977_v0 }
 0x41b   :  { %6019 = vmatpush3.bf16.msra.mxu0 %v6899_v41  ;;  %v3314_v41 = vpack.c.bf16 %v38_v19, %v38_v19  ;;  %v6944_v19 = vld [vmem:[%s8901_s7 + $0x84] sm:$0xff]  }
 0x41c   :  { %6020 = vmatprep.subr.bf16.mxu0 %v6977_v0 }
 0x41f   :  { %6021 = vmatpush3.bf16.msra.mxu0 %v6901_v39 }
 0x420   :  { %6038 = vmatprep.subr.bf16.mxu0 %v6977_v0 }
 0x4dd   :  { %v5833_v3 = vpop.f32.mrb[20].mxu0  ;;  %v5855_v4 = vpop.f32.mrb[20].mxu1 }
 0x4de   :  { %v5834_v6 = vpop.f32.mrb[21].mxu0  ;;  %v5856_v60 = vpop.f32.mrb[21].mxu1 }
 0x4df   :  { %v5835_v7 = vadd.f32 %v5834_v6, %v5833_v3  ;;  %v5857_v8 = vadd.f32 %v5856_v60, %v5855_v4  ;;  %v5836_v9 = vpop.f32.mrb[22].mxu0  ;;  %v5858_v1 = vpop.f32.mrb[22].mxu1  ;;  %v6913_v3 = vld [vmem:[%s8900_s6 + $0x70] sm:$0xff]   ;;  %v6914_v4 = vld [vmem:[%s8900_s6 + $0x78] sm:$0xff]  }
 0x4e0   :  { %v5837_v10 = vpop.f32.mrb[23].mxu0  ;;  %v5859_v11 = vpop.f32.mrb[23].mxu1 }
 0x4e1   :  { %v2809_v12 = vadd.f32 %v5835_v7, %v1667_v5  ;;  %v5838_v13 = vadd.f32 %v5837_v10, %v5836_v9  ;;  %v5860_v15 = vadd.f32 %v5859_v11, %v5858_v1  ;;  %v3324_v11 = vld [vmem:[%s8898_s2 + $0x21] ss:$0 sm:$0xff] }
 0x4e3   :  { %v2850_v16 = vadd.f32 %v5857_v8, %v2809_v12  ;;  %v2812_v17 = vadd.f32 %v5838_v13, %v1667_v5  ;;  %v3166_v5 = vld [vmem:[%s8898_s2 + $0x7] ss:$0 sm:$0xff] }
 0x4e5   :  { %v2853_v18 = vadd.f32 %v5860_v15, %v2812_v17  ;;  %v2927_v45 = vpop.f32.mrb[24].mxu0 }
 0x4e6   :  { %v3001_v46 = vpack.c.bf16 %v2927_v45, %v2927_v45  ;;  %v6006_v37 = vpop.f32.mrb[25].mxu0 }
 0x4e7   :  { %v6396_v20 = vpack.c.bf16 %v2853_v18, %v2850_v16 }
 0x4e9   :  { %6397 = vmatpush3.bf16.msra.mxu1 %v6396_v20 }
 0x4ea   :  { %6026 = vmatprep.subr.bf16.mxu1 %v6977_v0 }
 0x4ec   :  { %6012 = vmatmul.mubr.msk.f32.vlgmr.msra.gmra.mrb[24].mxu1 %vm2857_vm2, %v2856_v2  ;;  %v37_v2 = vld [vmem:[%s8895_s0 + $0x38] sm:$0xff]  ;;  %vm5298_vm2 = vcmask 150656  }
 0x4ed   :  { %6027 = vmatpush3.bf16.msra.mxu1 %v6894_v22  ;;  %6034 = vmatprep.mubr.msk.bf16.mxu1 %vm6976_vm3, %v6977_v0  ;;  %v3313_v14 = vpack.c.bf16 %v37_v2, %v36_v63  ;;  %v6932_v63 = vld [vmem:[%s8901_s7 + $0x184] sm:$0xff]   ;;  %v6933_v2 = vld [vmem:[%s8901_s7 + $0x18c] sm:$0xff]  }
 0x4ee   :  { %6028 = vmatprep.subr.bf16.mxu1 %v6977_v0 }
 0x4f1   :  { %6029 = vmatpush3.bf16.msra.mxu1 %v6896_v25 }
 0x4f2   :  { %6030 = vmatprep.subr.bf16.mxu1 %v6977_v0 }
 0x4f5   :  { %6031 = vmatpush3.bf16.msra.mxu1 %v6898_v28 }
 0x4f6   :  { %6032 = vmatprep.subr.bf16.mxu1 %v6977_v0 }
 0x4f9   :  { %6033 = vmatpush3.bf16.msra.mxu1 %v6900_v42 }
 0x4fa   :  { %6050 = vmatprep.subr.bf16.mxu1 %v6977_v0 }
 0x4fc   :  { %6035 = vmatmul.mubr.msk.bf16.vlgmr.msra.gmra.mrb[28].mxu1 %vm3043_vm4, %v3001_v46 }
 0x4fd   :  { %6058 = vmatprep.mubr.msk.bf16.mxu1 %vm6976_vm3, %v6977_v0  ;;  %6051 = vmatpush3.bf16.msra.mxu1 %v6911_v53  ;;  %v6915_v53 = vld [vmem:[%s8901_s7 + $0xfc] sm:$0xff]  }
 0x4fe   :  { %6052 = vmatprep.subr.bf16.mxu1 %v6977_v0 }
 0x501   :  { %6053 = vmatpush3.bf16.msra.mxu1 %v6912_v54  ;;  %v6916_v54 = vld [vmem:[%s8901_s7 + $0x104] sm:$0xff]  }
 0x502   :  { %6054 = vmatprep.subr.bf16.mxu1 %v6977_v0 }
 0x505   :  { %6055 = vmatpush3.bf16.msra.mxu1 %v6913_v3  ;;  %v6945_v3 = vld [vmem:[%s8901_s7 + $0x8c] sm:$0xff]  }
 0x506   :  { %6056 = vmatprep.subr.bf16.mxu1 %v6977_v0 }
 0x509   :  { %6057 = vmatpush3.bf16.msra.mxu1 %v6914_v4  ;;  %v6946_v4 = vld [vmem:[%s8901_s7 + $0x94] sm:$0xff]  }
 0x50a   :  { %6084 = vmatprep.subr.bf16.mxu1 %v6977_v0 }
 0x5bf   :  { %v2997_v40 = vpop.f32.mrb[24].mxu1 }
 0x5c0   :  { %v3010_v44 = vpack.c.bf16 %v2997_v40, %v2997_v40  ;;  %v6013_v47 = vpop.f32.mrb[25].mxu1 }
 0x5c2   :  { %6023 = vmatmul.mubr.msk.bf16.vlgmr.msra.gmra.mrb[28].mxu0 %vm3043_vm4, %v3010_v44 }
 0x5c3   :  { %6039 = vmatpush3.bf16.msra.mxu0 %v6902_v43  ;;  %6046 = vmatprep.mubr.msk.bf16.mxu0 %vm6976_vm3, %v6977_v0 }
 0x5c4   :  { %6040 = vmatprep.subr.bf16.mxu0 %v6977_v0 }
 0x5c7   :  { %6041 = vmatpush3.bf16.msra.mxu0 %v6903_v27 }
 0x5c8   :  { %6042 = vmatprep.subr.bf16.mxu0 %v6977_v0 }
 0x5cb   :  { %6043 = vmatpush3.bf16.msra.mxu0 %v6904_v50 }
 0x5cc   :  { %6044 = vmatprep.subr.bf16.mxu0 %v6977_v0 }
 0x5cf   :  { %v3148_v48 = vpop.f32.mrb[28].mxu1  ;;  %6045 = vmatpush3.bf16.msra.mxu0 %v6905_v52 }
 0x5d0   :  { %v6036_v29 = vpop.f32.mrb[29].mxu1  ;;  %6062 = vmatprep.subr.bf16.mxu0 %v6977_v0 }
 0x5d1   :  { %v3151_v49 = vpop.f32.mrb[30].mxu1 }
 0x5d2   :  { %v6037_v51 = vpop.f32.mrb[31].mxu1 }
 0x695   :  { %v3081_v55 = vpop.f32.mrb[28].mxu0 }
 0x696   :  { %v3149_v57 = vadd.f32 %v3148_v48, %v3081_v55  ;;  %v6024_v58 = vpop.f32.mrb[29].mxu0  ;;  %v6917_v55 = vld [vmem:[%s8901_s7 + $0x10c] sm:$0xff]  }
 0x697   :  { %v3084_v21 = vpop.f32.mrb[30].mxu0  ;;  %v6920_v58 = vld [vmem:[%s8901_s7 + $0x124] sm:$0xff]  }
 0x698   :  { %v3155_v30 = vadd.f32 %v3154_v56, %v3149_v57  ;;  %v6025_v24 = vpop.f32.mrb[31].mxu0  ;;  %v6918_v56 = vld [vmem:[%s8901_s7 + $0x114] sm:$0xff]   ;;  %v6919_v57 = vld [vmem:[%s8901_s7 + $0x11c] sm:$0xff]   ;;  %v6921_v21 = vld [vmem:[%s8901_s7 + $0x12c] sm:$0xff]  }
 0x699   :  { %v6923_v24 = vld [vmem:[%s8901_s7 + $0x13c] sm:$0xff]  }
 0x69a   :  { %v3156_v32 = vmax.f32 %v3155_v30, 0.0  ;;  %v6922_v30 = vld [vmem:[%s8901_s7 + $0x134] sm:$0xff]  }
 0x69c   :  { %v3157_v59 = vpack.c.bf16 %v3156_v32, %v3156_v32  ;;  %v6924_v32 = vld [vmem:[%s8901_s7 + $0x144] sm:$0xff]  }
 0x69e   :  { %6047 = vmatmul.mubr.msk.bf16.vlgmr.msra.gmra.mrb[32].mxu0 %vm3043_vm4, %v3157_v59  ;;  %v6926_v59 = vld [vmem:[%s8901_s7 + $0x154] sm:$0xff]  }
 0x69f   :  { %6063 = vmatpush3.bf16.msra.mxu0 %v6906_v23  ;;  %6072 = vmatprep.mubr.msk.bf16.mxu0 %vm6976_vm3, %v6977_v0  ;;  %v6925_v23 = vld [vmem:[%s8901_s7 + $0x14c] sm:$0xff]  }
 0x6a0   :  { %6064 = vmatprep.subr.bf16.mxu0 %v6977_v0 }
 0x6a3   :  { %6065 = vmatpush3.bf16.msra.mxu0 %v6907_v26  ;;  %v6927_v26 = vld [vmem:[%s8901_s7 + $0x15c] sm:$0xff]  }
 0x6a4   :  { %6066 = vmatprep.subr.bf16.mxu0 %v6977_v0 }
 0x6a7   :  { %6067 = vmatpush3.bf16.msra.mxu0 %v6908_v61  ;;  %v6928_v61 = vld [vmem:[%s8901_s7 + $0x164] sm:$0xff]  }
 0x6a8   :  { %6068 = vmatprep.subr.bf16.mxu0 %v6977_v0 }
 0x6ab   :  { %6069 = vmatpush3.bf16.msra.mxu0 %v6909_v31  ;;  %v6938_v31 = vld [vmem:[%s8901_s7 + $0x3c] sm:$0xff]  }
 0x6ac   :  { %6070 = vmatprep.subr.bf16.mxu0 %v6977_v0 }
 0x6af   :  { %6071 = vmatpush3.bf16.msra.mxu0 %v3363_v36  ;;  %v6930_v36 = vld [vmem:[%s8901_s7 + $0x174] sm:$0xff]  }
 0x6b0   :  { %6182 = vmatprep.subr.bf16.mxu0 %v6977_v0 }
 0x6b2   :  { %6073 = vmatmul.mubr.msk.bf16.vlgmr.msra.gmra.mrb[36].mxu0 %vm3352_vm5, %v3312_v62  ;;  %v6931_v62 = vld [vmem:[%s8901_s7 + $0x17c] sm:$0xff]  }
 0x6b3   :  { %6076 = vmatprep.mubr.msk.bf16.mxu0 %vm6976_vm3, %v6977_v0  ;;  %6183 = vmatpush3.bf16.msra.mxu0 %v6938_v31 }
 0x6b4   :  { %6184 = vmatprep.subr.bf16.mxu0 %v6977_v0 }
 0x6b7   :  { %6185 = vmatpush3.bf16.msra.mxu0 %v6939_v33 }
 0x6b8   :  { %6186 = vmatprep.subr.bf16.mxu0 %v6977_v0 }
 0x6ba   :  { %6077 = vmatmul.mubr.msk.bf16.gmra.mrb[40].mxu0 %vm3352_vm5, %v3313_v14  ;;  %v6934_v14 = vld [vmem:[%s8901_s7 + $0x194] sm:$0xff]  }
 0x6bb   :  { %6080 = vmatprep.mubr.msk.bf16.mxu0 %vm6976_vm3, %v6977_v0  ;;  %6187 = vmatpush3.bf16.msra.mxu0 %v6940_v35 }
 0x6bc   :  { %6200 = vmatprep.subr.bf16.mxu0 %v6977_v0 }
 0x6c2   :  { %6081 = vmatmul.mubr.msk.bf16.gmra.mrb[44].mxu0 %vm3352_vm5, %v3314_v41  ;;  %v6935_v41 = vld [vmem:[%s8901_s7 + $0x19c] sm:$0xff]  }
 0x6c3   :  { %6188 = vmatprep.mubr.msk.bf16.mxu0 %vm6976_vm3, %v6977_v0 }
 0x771   :  { %v3228_v6 = vpop.f32.mrb[32].mxu0 }
 0x772   :  { %v3229_v60 = vadd.f32 %v3228_v6, %v3166_v5  ;;  %v6048_v7 = vpop.f32.mrb[33].mxu0  ;;  %v6936_v5 = vld [vmem:[%s8901_s7 + $0x1a4] sm:$0xff]   ;;  %v3244_v6 = vld [vmem:[%s8898_s2 + $0x20] ss:$0 sm:$0xff] }
 0x773   :  { %v3231_v8 = vpop.f32.mrb[34].mxu0 }
 0x774   :  { %v3234_v9 = vmax.f32 %v3229_v60, 0.0  ;;  %v6049_v1 = vpop.f32.mrb[35].mxu0 }
 0x776   :  { %v3235_v10 = vpack.c.bf16 %v3234_v9, %v3234_v9  ;;  %v6937_v9 = vld [vmem:[%s8901_s7 + $0x1ac] ss:$0 sps:$4 sm:$0xff]  }
 0x778   :  { %6059 = vmatmul.mubr.msk.bf16.vlgmr.msra.gmra.mrb[32].mxu1 %vm3043_vm4, %v3235_v10  ;;  %vm5309_vm4 = vcmask 413056  }
 0x779   :  { %6090 = vmatprep.mubr.msk.bf16.mxu1 %vm6976_vm3, %v6977_v0 }
 0x785   :  { %v3399_v12 = vpop.f32.mrb[36].mxu0 }
 0x786   :  { %v3400_v13 = vadd.f32 %v3399_v12, %v3324_v11  ;;  %v6074_v15 = vpop.f32.mrb[37].mxu0 }
 0x787   :  { %v3402_v16 = vpop.f32.mrb[38].mxu0 }
 0x788   :  { %v3403_v17 = vadd.f32 %v3402_v16, %v3324_v11  ;;  %v6075_v18 = vpop.f32.mrb[39].mxu0  ;;  %v3421_v20 = vmax.f32 %v3400_v13, 0.0 }
 0x78a   :  { %v3422_v22 = vmax.f32 %v3403_v17, 0.0 }
 0x78c   :  { %v3426_v25 = vpack.c.bf16 %v3422_v22, %v3421_v20 }
 0x78d   :  { %v3407_v28 = vpop.f32.mrb[40].mxu0 }
 0x78e   :  { %v3408_v42 = vadd.f32 %v3407_v28, %v3324_v11  ;;  %v6078_v45 = vpop.f32.mrb[41].mxu0  ;;  %6085 = vmatpush3.bf16.msra.mxu1 %v3426_v25 }
 0x78f   :  { %v3410_v46 = vpop.f32.mrb[42].mxu0  ;;  %6086 = vmatprep.subr.bf16.mxu1 %v6977_v0 }
 0x790   :  { %v3411_v37 = vadd.f32 %v3410_v46, %v3324_v11  ;;  %v6079_v39 = vpop.f32.mrb[43].mxu0  ;;  %v3423_v40 = vmax.f32 %v3408_v42, 0.0 }
 0x792   :  { %v3424_v43 = vmax.f32 %v3411_v37, 0.0 }
 0x794   :  { %v3427_v44 = vpack.c.bf16 %v3424_v43, %v3423_v40 }
 0x795   :  { %v3415_v47 = vpop.f32.mrb[44].mxu0 }
 0x796   :  { %v3416_v27 = vadd.f32 %v3415_v47, %v3324_v11  ;;  %v6082_v48 = vpop.f32.mrb[45].mxu0  ;;  %6087 = vmatpush3.bf16.msra.mxu1 %v3427_v44 }
 0x797   :  { %v3418_v29 = vpop.f32.mrb[46].mxu0  ;;  %6088 = vmatprep.subr.bf16.mxu1 %v6977_v0 }
 0x798   :  { %v3425_v49 = vmax.f32 %v3416_v27, 0.0  ;;  %v6083_v50 = vpop.f32.mrb[47].mxu0 }
 0x79a   :  { %v3428_v51 = vpack.c.bf16 %v3425_v49, %v3425_v49  ;;  %v6941_v49 = vld [vmem:[%s8901_s7 + $0x6c] sm:$0xff]  }
 0x79c   :  { %v3658_v52 = vsel %vm299_vm0, %v3428_v51, 0 }
 0x79d   :  { %6089 = vmatpush3.bf16.msra.mxu1 %v3658_v52 }
 0x79e   :  { %6308 = vmatprep.subr.bf16.mxu1 %v6977_v0 }
 0x7a0   :  { %6091 = vmatmul.mubr.msk.bf16.vlgmr.msra.gmra.mrb[36].mxu1 %vm3587_vm6, %v6915_v53  ;;  %v6942_v53 = vld [vmem:[%s8901_s7 + $0x74] sm:$0xff]  }
 0x7a1   :  { %6094 = vmatprep.mubr.msk.bf16.mxu1 %vm6976_vm3, %v6977_v0  ;;  %6309 = vmatpush3.bf16.msra.mxu1 %v6944_v19 }
 0x7a2   :  { %6310 = vmatprep.subr.bf16.mxu1 %v6977_v0 }
 0x7a5   :  { %6311 = vmatpush3.bf16.msra.mxu1 %v6945_v3 }
 0x7a6   :  { %6312 = vmatprep.subr.bf16.mxu1 %v6977_v0 }
 0x7a8   :  { %6095 = vmatmul.mubr.msk.bf16.gmra.mrb[40].mxu1 %vm3587_vm6, %v6916_v54 }
 0x7a9   :  { %6098 = vmatprep.mubr.msk.bf16.mxu1 %vm6976_vm3, %v6977_v0  ;;  %6313 = vmatpush3.bf16.msra.mxu1 %v6946_v4 }
 0x7b0   :  { %6099 = vmatmul.mubr.msk.bf16.gmra.mrb[44].mxu1 %vm3587_vm6, %v6917_v55 }
 0x7b1   :  { %6102 = vmatprep.mubr.msk.bf16.mxu1 %vm6976_vm3, %v6977_v0 }
 0x7b8   :  { %6103 = vmatmul.mubr.msk.bf16.gmra.mrb[48].mxu1 %vm3587_vm6, %v6918_v56 }
 0x7b9   :  { %6106 = vmatprep.mubr.msk.bf16.mxu1 %vm6976_vm3, %v6977_v0 }
 0x7c0   :  { %6107 = vmatmul.mubr.msk.bf16.gmra.mrb[52].mxu1 %vm3587_vm6, %v6919_v57 }
 0x7c1   :  { %6110 = vmatprep.mubr.msk.bf16.mxu1 %vm6976_vm3, %v6977_v0 }
 0x7c8   :  { %6111 = vmatmul.mubr.msk.bf16.gmra.mrb[56].mxu1 %vm3587_vm6, %v6920_v58  ;;  %v6943_v58 = vld [vmem:[%s8901_s7 + $0x7c] sm:$0xff]  }
 0x7c9   :  { %6114 = vmatprep.mubr.msk.bf16.mxu1 %vm6976_vm3, %v6977_v0 }
 0x7d0   :  { %6115 = vmatmul.mubr.msk.bf16.gmra.mrb[60].mxu1 %vm3587_vm6, %v6921_v21 }
 0x7d1   :  { %6118 = vmatprep.mubr.msk.bf16.mxu1 %vm6976_vm3, %v6977_v0 }
 0x7d8   :  { %6119 = vmatmul.mubr.msk.bf16.gmra.mrb[64].mxu1 %vm3587_vm6, %v6922_v30 }
 0x7d9   :  { %6122 = vmatprep.mubr.msk.bf16.mxu1 %vm6976_vm3, %v6977_v0 }
 0x7e0   :  { %6123 = vmatmul.mubr.msk.bf16.gmra.mrb[68].mxu1 %vm3587_vm6, %v6923_v24 }
 0x7e1   :  { %6126 = vmatprep.mubr.msk.bf16.mxu1 %vm6976_vm3, %v6977_v0 }
 0x7e8   :  { %6127 = vmatmul.mubr.msk.bf16.gmra.mrb[72].mxu1 %vm3587_vm6, %v6924_v32 }
 0x7e9   :  { %6130 = vmatprep.mubr.msk.bf16.mxu1 %vm6976_vm3, %v6977_v0 }
 0x7f0   :  { %6131 = vmatmul.mubr.msk.bf16.gmra.mrb[76].mxu1 %vm3587_vm6, %v6925_v23 }
 0x7f1   :  { %6134 = vmatprep.mubr.msk.bf16.mxu1 %vm6976_vm3, %v6977_v0 }
 0x7f8   :  { %6135 = vmatmul.mubr.msk.bf16.gmra.mrb[80].mxu1 %vm3587_vm6, %v6926_v59 }
 0x7f9   :  { %6138 = vmatprep.mubr.msk.bf16.mxu1 %vm6976_vm3, %v6977_v0 }
 0x800   :  { %6139 = vmatmul.mubr.msk.bf16.gmra.mrb[84].mxu1 %vm3587_vm6, %v6927_v26 }
 0x801   :  { %6142 = vmatprep.mubr.msk.bf16.mxu1 %vm6976_vm3, %v6977_v0 }
 0x808   :  { %6143 = vmatmul.mubr.msk.bf16.gmra.mrb[88].mxu1 %vm3587_vm6, %v6928_v61 }
 0x809   :  { %6146 = vmatprep.mubr.msk.bf16.mxu1 %vm6976_vm3, %v6977_v0 }
 0x810   :  { %6147 = vmatmul.mubr.msk.bf16.gmra.mrb[92].mxu1 %vm3587_vm6, %v6929_v34 }
 0x811   :  { %6150 = vmatprep.mubr.msk.bf16.mxu1 %vm6976_vm3, %v6977_v0 }
 0x818   :  { %6151 = vmatmul.mubr.msk.bf16.gmra.mrb[96].mxu1 %vm3587_vm6, %v6930_v36 }
 0x819   :  { %6154 = vmatprep.mubr.msk.bf16.mxu1 %vm6976_vm3, %v6977_v0 }
 0x820   :  { %6155 = vmatmul.mubr.msk.bf16.gmra.mrb[100].mxu1 %vm3587_vm6, %v6931_v62 }
 0x821   :  { %6158 = vmatprep.mubr.msk.bf16.mxu1 %vm6976_vm3, %v6977_v0 }
 0x828   :  { %6159 = vmatmul.mubr.msk.bf16.gmra.mrb[104].mxu1 %vm3587_vm6, %v6932_v63 }
 0x829   :  { %6162 = vmatprep.mubr.msk.bf16.mxu1 %vm6976_vm3, %v6977_v0 }
 0x830   :  { %6163 = vmatmul.mubr.msk.bf16.gmra.mrb[108].mxu1 %vm3587_vm6, %v6933_v2 }
 0x831   :  { %6166 = vmatprep.mubr.msk.bf16.mxu1 %vm6976_vm3, %v6977_v0 }
 0x838   :  { %6167 = vmatmul.mubr.msk.bf16.gmra.mrb[112].mxu1 %vm3587_vm6, %v6934_v14 }
 0x839   :  { %6170 = vmatprep.mubr.msk.bf16.mxu1 %vm6976_vm3, %v6977_v0 }
 0x840   :  { %6171 = vmatmul.mubr.msk.bf16.gmra.mrb[116].mxu1 %vm3587_vm6, %v6935_v41 }
 0x841   :  { %6174 = vmatprep.mubr.msk.bf16.mxu1 %vm6976_vm3, %v6977_v0 }
 0x848   :  { %6175 = vmatmul.mubr.msk.bf16.gmra.mrb[120].mxu1 %vm3587_vm6, %v6936_v5 }
 0x849   :  { %6178 = vmatprep.mubr.msk.bf16.mxu1 %vm6976_vm3, %v6977_v0 }
 0x84b   :  { %v3306_v60 = vpop.f32.mrb[32].mxu1 }
 0x84c   :  { %v8480_v7 = vadd.f32 %v3306_v60, %v3244_v6  ;;  %v6060_v8 = vpop.f32.mrb[33].mxu1  ;;  %v6947_v60 = vld [vmem:[%s8901_s7 + $0x9c] sm:$0xff]  }
 0x84d   :  { %v3309_v1 = vpop.f32.mrb[34].mxu1 }
 0x84e   :  { %v6061_v10 = vpop.f32.mrb[35].mxu1  ;;  %v5003_v11 = vsel %vm5002_vm7, %v8480_v7, -inf }
 0x84f   :  { %5004 = vmax.xlane.f32.xlu0 %v5003_v11  ;;  %v6948_v10 = vld [vmem:[%s8901_s7 + $0xa4] sm:$0xff]  }
 0x850   :  { %6179 = vmatmul.mubr.msk.bf16.gmra.mrb[124].mxu1 %vm3587_vm6, %v6937_v9 }
 0x851   :  { %6314 = vmatprep.mubr.msk.bf16.mxu1 %vm6976_vm3, %v6977_v0 }
 0x873   :  { %v8490_v12 = vpop.f32.mrb[36].mxu1 }
 0x874   :  { %v6092_v13 = vpop.f32.mrb[37].mxu1 }
 0x875   :  { %v8492_v15 = vpop.f32.mrb[38].mxu1 }
 0x876   :  { %v3876_v16 = vpack.c.bf16 %v8492_v15, %v8490_v12  ;;  %v6093_v17 = vpop.f32.mrb[39].mxu1  ;;  %v6962_v12 = vld [vmem:[%s8901_s7 + $0xb4] sm:$0xff]   ;;  %v6963_v15 = vld [vmem:[%s8901_s7 + $0xbc] sm:$0xff]  }
 0x87b   :  { %v8496_v18 = vpop.f32.mrb[40].mxu1 }
 0x87c   :  { %v6096_v20 = vpop.f32.mrb[41].mxu1 }
 0x87d   :  { %v8498_v22 = vpop.f32.mrb[42].mxu1 }
 0x87e   :  { %v3877_v25 = vpack.c.bf16 %v8498_v22, %v8496_v18  ;;  %v6097_v28 = vpop.f32.mrb[43].mxu1 }
 0x87f   :  { %v6949_v28 = vld [vmem:[%s8901_s7 + $0xac] sm:$0xff]  }
 0x883   :  { %v3710_v42 = vpop.f32.mrb[44].mxu1 }
 0x884   :  { %v6100_v45 = vpop.f32.mrb[45].mxu1 }
 0x885   :  { %v3713_v46 = vpop.f32.mrb[46].mxu1 }
 0x886   :  { %v8502_v37 = vpack.c.bf16 %v3713_v46, %v3710_v42  ;;  %v6101_v39 = vpop.f32.mrb[47].mxu1 }
 0x888   :  { %v3915_v48 = vrot.slane %v8502_v37, 4 }
 0x88b   :  { %v3718_v40 = vpop.f32.mrb[48].mxu1 }
 0x88c   :  { %v6104_v43 = vpop.f32.mrb[49].mxu1 }
 0x88d   :  { %v3721_v44 = vpop.f32.mrb[50].mxu1 }
 0x88e   :  { %v3879_v47 = vpack.c.bf16 %v3721_v44, %v3718_v40  ;;  %v6105_v27 = vpop.f32.mrb[51].mxu1 }
 0x890   :  { %v3916_v29 = vrot.slane %v3879_v47, 4 }
 0x892   :  { %v3917_v50 = vsel %vm299_vm0, %v3915_v48, %v3916_v29 }
 0x893   :  { %v3726_v51 = vpop.f32.mrb[52].mxu1  ;;  %6189 = vmatmul.mubr.msk.bf16.vlgmr.msra.gmra.mrb[48].mxu0 %vm3938_vm8, %v3917_v50 }
 0x894   :  { %v6108_v52 = vpop.f32.mrb[53].mxu1  ;;  %6192 = vmatprep.mubr.msk.bf16.mxu0 %vm6976_vm3, %v6977_v0  ;;  %6201 = vmatpush3.bf16.msra.mxu0 %v6941_v49 }
 0x895   :  { %v3729_v54 = vpop.f32.mrb[54].mxu1  ;;  %6202 = vmatprep.subr.bf16.mxu0 %v6977_v0 }
 0x896   :  { %v3880_v55 = vpack.c.bf16 %v3729_v54, %v3726_v51  ;;  %v6109_v56 = vpop.f32.mrb[55].mxu1 }
 0x898   :  { %v3918_v57 = vrot.slane %v3880_v55, 4  ;;  %6203 = vmatpush3.bf16.msra.mxu0 %v6942_v53 }
 0x899   :  { %6204 = vmatprep.subr.bf16.mxu0 %v6977_v0 }
 0x89a   :  { %v3919_v21 = vsel %vm299_vm0, %v3916_v29, %v3918_v57 }
 0x89b   :  { %v8521_v30 = vpop.f32.mrb[56].mxu1  ;;  %6193 = vmatmul.mubr.msk.bf16.gmra.mrb[52].mxu0 %vm3938_vm8, %v3919_v21 }
 0x89c   :  { %v6112_v24 = vpop.f32.mrb[57].mxu1  ;;  %6196 = vmatprep.mubr.msk.bf16.mxu0 %vm6976_vm3, %v6977_v0  ;;  %6205 = vmatpush3.bf16.msra.mxu0 %v6943_v58 }
 0x89d   :  { %v8526_v32 = vpop.f32.mrb[58].mxu1  ;;  %6218 = vmatprep.subr.bf16.mxu0 %v6977_v0 }
 0x89e   :  { %v3881_v23 = vpack.c.bf16 %v8526_v32, %v8521_v30  ;;  %v6113_v59 = vpop.f32.mrb[59].mxu1 }
 0x8a3   :  { %v8531_v26 = vpop.f32.mrb[60].mxu1  ;;  %6197 = vmatmul.mubr.msk.bf16.gmra.mrb[56].mxu0 %vm3938_vm8, %v3918_v57 }
 0x8a4   :  { %v6116_v61 = vpop.f32.mrb[61].mxu1  ;;  %6206 = vmatprep.mubr.msk.bf16.mxu0 %vm6976_vm3, %v6977_v0 }
 0x8a5   :  { %v8536_v31 = vpop.f32.mrb[62].mxu1 }
 0x8a6   :  { %v3882_v33 = vpack.c.bf16 %v8536_v31, %v8531_v26  ;;  %v6117_v34 = vpop.f32.mrb[63].mxu1 }
 0x8ab   :  { %v3750_v35 = vpop.f32.mrb[64].mxu1 }
 0x8ac   :  { %v6120_v36 = vpop.f32.mrb[65].mxu1 }
 0x8ad   :  { %v3753_v62 = vpop.f32.mrb[66].mxu1 }
 0x8ae   :  { %v8540_v63 = vpack.c.bf16 %v3753_v62, %v3750_v35  ;;  %v6121_v2 = vpop.f32.mrb[67].mxu1  ;;  %v6950_v35 = vld [vmem:[%s8901_s7 + $0xcc] sm:$0xff]  }
 0x8b0   :  { %v4019_v5 = vrot.slane %v8540_v63, 4 }
 0x8b3   :  { %v3758_v14 = vpop.f32.mrb[68].mxu1 }
 0x8b4   :  { %v6124_v19 = vpop.f32.mrb[69].mxu1 }
 0x8b5   :  { %v3761_v41 = vpop.f32.mrb[70].mxu1 }
 0x8b6   :  { %v3884_v3 = vpack.c.bf16 %v3761_v41, %v3758_v14  ;;  %v6125_v4 = vpop.f32.mrb[71].mxu1  ;;  %v6951_v14 = vld [vmem:[%s8901_s7 + $0xd4] sm:$0xff]  }
 0x8b8   :  { %v4020_v6 = vrot.slane %v3884_v3, 4 }
 0x8ba   :  { %v4021_v8 = vsel %vm299_vm0, %v4019_v5, %v4020_v6  ;;  %v6952_v5 = vld [vmem:[%s8901_s7 + $0xdc] sm:$0xff]  }
 0x8bb   :  { %v3766_v9 = vpop.f32.mrb[72].mxu1  ;;  %6207 = vmatmul.mubr.msk.bf16.vlgmr.msra.gmra.mrb[60].mxu0 %vm3938_vm8, %v4021_v8 }
 0x8bc   :  { %v6128_v1 = vpop.f32.mrb[73].mxu1  ;;  %6210 = vmatprep.mubr.msk.bf16.mxu0 %vm6976_vm3, %v6977_v0  ;;  %6219 = vmatpush3.bf16.msra.mxu0 %v6947_v60 }
 0x8bd   :  { %v3769_v11 = vpop.f32.mrb[74].mxu1  ;;  %6220 = vmatprep.subr.bf16.mxu0 %v6977_v0 }
 0x8be   :  { %v3885_v13 = vpack.c.bf16 %v3769_v11, %v3766_v9  ;;  %v6129_v17 = vpop.f32.mrb[75].mxu1 }
 0x8c0   :  { %v4022_v20 = vrot.slane %v3885_v13, 4  ;;  %6221 = vmatpush3.bf16.msra.mxu0 %v6948_v10 }
 0x8c1   :  { %6222 = vmatprep.subr.bf16.mxu0 %v6977_v0 }
 0x8c2   :  { %v4023_v42 = vsel %vm299_vm0, %v4020_v6, %v4022_v20 }
 0x8c3   :  { %v3774_v45 = vpop.f32.mrb[76].mxu1  ;;  %6211 = vmatmul.mubr.msk.bf16.gmra.mrb[64].mxu0 %vm3938_vm8, %v4023_v42 }
 0x8c4   :  { %v6132_v46 = vpop.f32.mrb[77].mxu1  ;;  %6214 = vmatprep.mubr.msk.bf16.mxu0 %vm6976_vm3, %v6977_v0  ;;  %6223 = vmatpush3.bf16.msra.mxu0 %v6949_v28 }
 0x8c5   :  { %v3777_v39 = vpop.f32.mrb[78].mxu1  ;;  %6236 = vmatprep.subr.bf16.mxu0 %v6977_v0 }
 0x8c6   :  { %v3886_v40 = vpack.c.bf16 %v3777_v39, %v3774_v45  ;;  %v6133_v43 = vpop.f32.mrb[79].mxu1 }
 0x8c8   :  { %6315 = vmatmul.mubr.msk.bf16.vlgmr.msra.gmra.mrb[128].mxu1 %vm3938_vm8, %v3886_v40 }
 0x8c9   :  { %6318 = vmatprep.mubr.msk.bf16.mxu1 %vm6976_vm3, %v6977_v0 }
 0x8cb   :  { %v3782_v44 = vpop.f32.mrb[80].mxu1  ;;  %6215 = vmatmul.mubr.msk.bf16.gmra.mrb[68].mxu0 %vm3938_vm8, %v4022_v20 }
 0x8cc   :  { %v6136_v47 = vpop.f32.mrb[81].mxu1  ;;  %6224 = vmatprep.mubr.msk.bf16.mxu0 %vm6976_vm3, %v6977_v0 }
 0x8cd   :  { %v3785_v27 = vpop.f32.mrb[82].mxu1 }
 0x8ce   :  { %v3887_v48 = vpack.c.bf16 %v3785_v27, %v3782_v44  ;;  %v6137_v29 = vpop.f32.mrb[83].mxu1 }
 0x8d0   :  { %6319 = vmatmul.mubr.msk.bf16.gmra.mrb[132].mxu1 %vm3938_vm8, %v3887_v48 }
 0x8d1   :  { %6322 = vmatprep.mubr.msk.bf16.mxu1 %vm6976_vm3, %v6977_v0 }
 0x8d3   :  { %v3790_v49 = vpop.f32.mrb[84].mxu1 }
 0x8d4   :  { %v6140_v50 = vpop.f32.mrb[85].mxu1 }
 0x8d5   :  { %v3793_v51 = vpop.f32.mrb[86].mxu1 }
 0x8d6   :  { %v3888_v52 = vpack.c.bf16 %v3793_v51, %v3790_v49  ;;  %v6141_v53 = vpop.f32.mrb[87].mxu1 }
 0x8d8   :  { %6323 = vmatmul.mubr.msk.bf16.gmra.mrb[136].mxu1 %vm3938_vm8, %v3888_v52  ;;  %v4122_v61 = vrot.slane %v3888_v52, 4  ;;  %v6953_v52 = vld [vmem:[%s8901_s7 + $0xe4] sm:$0xff]  }
 0x8db   :  { %v3798_v54 = vpop.f32.mrb[88].mxu1 }
 0x8dc   :  { %v6144_v55 = vpop.f32.mrb[89].mxu1  ;;  %v8573_v56 = vpop.xlane.xlu0 %5004 }
 0x8dd   :  { %v5006_v57 = vsub.f32 %v8480_v7, %v8573_v56  ;;  %v3801_v58 = vpop.f32.mrb[90].mxu1 }
 0x8de   :  { %v3889_v21 = vpack.c.bf16 %v3801_v58, %v3798_v54  ;;  %v6145_v24 = vpop.f32.mrb[91].mxu1 }
 0x8df   :  { %v5007_v59 = vmul.f32 1.442695, %v5006_v57  ;;  %v6954_v57 = vld [vmem:[%s8901_s7 + $0xec] sm:$0xff]  }
 0x8e0   :  { %v4123_v34 = vrot.slane %v3889_v21, 4 }
 0x8e1   :  { %6965 = vpow2.f32 %v5007_v59 }
 0x8e2   :  { %v4124_v36 = vsel %vm299_vm0, %v4122_v61, %v4123_v34  ;;  %v6955_v61 = vld [vmem:[%s8901_s7 + $0xf4] sm:$0xff]  }
 0x8e3   :  { %v3806_v62 = vpop.f32.mrb[92].mxu1  ;;  %6225 = vmatmul.mubr.msk.bf16.vlgmr.msra.gmra.mrb[72].mxu0 %vm3938_vm8, %v4124_v36 }
 0x8e4   :  { %v6148_v2 = vpop.f32.mrb[93].mxu1  ;;  %6228 = vmatprep.mubr.msk.bf16.mxu0 %vm6976_vm3, %v6977_v0  ;;  %6237 = vmatpush3.bf16.msra.mxu0 %v6950_v35 }
 0x8e5   :  { %v3809_v19 = vpop.f32.mrb[94].mxu1  ;;  %6238 = vmatprep.subr.bf16.mxu0 %v6977_v0 }
 0x8e6   :  { %v3890_v41 = vpack.c.bf16 %v3809_v19, %v3806_v62  ;;  %v6149_v3 = vpop.f32.mrb[95].mxu1 }
 0x8e8   :  { %v4125_v4 = vrot.slane %v3890_v41, 4  ;;  %6239 = vmatpush3.bf16.msra.mxu0 %v6951_v14 }
 0x8e9   :  { %6240 = vmatprep.subr.bf16.mxu0 %v6977_v0 }
 0x8ea   :  { %v4126_v6 = vsel %vm299_vm0, %v4123_v34, %v4125_v4 }
 0x8eb   :  { %v6966_v60 = vpop.eup %6965  ;;  %v8593_v8 = vpop.f32.mrb[96].mxu1  ;;  %6229 = vmatmul.mubr.msk.bf16.gmra.mrb[76].mxu0 %vm3938_vm8, %v4126_v6  ;;  %v6956_v6 = vld [vmem:[%s8901_s7 + $0x24] sm:$0xff]  }
 0x8ec   :  { %v6152_v9 = vpop.f32.mrb[97].mxu1  ;;  %v5009_v1 = vsel %vm5002_vm7, %v6966_v60, 0.0  ;;  %6232 = vmatprep.mubr.msk.bf16.mxu0 %vm6976_vm3, %v6977_v0  ;;  %6241 = vmatpush3.bf16.msra.mxu0 %v6952_v5 }
 0x8ed   :  { %v8599_v10 = vpop.f32.mrb[98].mxu1  ;;  %5010 = vadd.xlane.f32.xlu1 %v5009_v1  ;;  %6254 = vmatprep.subr.bf16.mxu0 %v6977_v0  ;;  %v6957_v1 = vld [vmem:[%s8901_s7 + $0x2c] sm:$0xff]  }
 0x8ee   :  { %v3891_v11 = vpack.c.bf16 %v8599_v10, %v8593_v8  ;;  %v6153_v13 = vpop.f32.mrb[99].mxu1 }
 0x8f3   :  { %v8604_v17 = vpop.f32.mrb[100].mxu1  ;;  %6233 = vmatmul.mubr.msk.bf16.gmra.mrb[80].mxu0 %vm3938_vm8, %v4125_v4 }
 0x8f4   :  { %v6156_v20 = vpop.f32.mrb[101].mxu1  ;;  %6242 = vmatprep.mubr.msk.bf16.mxu0 %vm6976_vm3, %v6977_v0 }
 0x8f5   :  { %v8609_v28 = vpop.f32.mrb[102].mxu1 }
 0x8f6   :  { %v3892_v42 = vpack.c.bf16 %v8609_v28, %v8604_v17  ;;  %v6157_v45 = vpop.f32.mrb[103].mxu1 }
 0x8f7   :  { %v6958_v45 = vld [vmem:[%s8901_s7 + $0x34] sm:$0xff]  }
 0x8fb   :  { %v3830_v46 = vpop.f32.mrb[104].mxu1 }
 0x8fc   :  { %v6160_v39 = vpop.f32.mrb[105].mxu1 }
 0x8fd   :  { %v3833_v40 = vpop.f32.mrb[106].mxu1  ;;  %v6959_v39 = vld [vmem:[%s8901_s7 + $0x54] sm:$0xff]  }
 0x8fe   :  { %v8613_v43 = vpack.c.bf16 %v3833_v40, %v3830_v46  ;;  %v6161_v44 = vpop.f32.mrb[107].mxu1  ;;  %5295 = vrot.lane.b32.xlu1 %v8480_v7, %s6978_s16  ;;  %v6960_v40 = vld [vmem:[%s8901_s7 + $0x5c] sm:$0xff]  }
 0x8ff   :  { %v6961_v44 = vld [vmem:[%s8901_s7 + $0x64] sm:$0xff]  }
 0x900   :  { %v4225_v50 = vrot.slane %v8613_v43, 4 }
 0x903   :  { %v3838_v47 = vpop.f32.mrb[108].mxu1 }
 0x904   :  { %v6164_v27 = vpop.f32.mrb[109].mxu1 }
 0x905   :  { %v3841_v48 = vpop.f32.mrb[110].mxu1 }
 0x906   :  { %v3894_v29 = vpack.c.bf16 %v3841_v48, %v3838_v47  ;;  %v6165_v49 = vpop.f32.mrb[111].mxu1 }
 0x908   :  { %v4226_v51 = vrot.slane %v3894_v29, 4 }
 0x90a   :  { %v4227_v53 = vsel %vm299_vm0, %v4225_v50, %v4226_v51 }
 0x90b   :  { %v3846_v54 = vpop.f32.mrb[112].mxu1  ;;  %6243 = vmatmul.mubr.msk.bf16.vlgmr.msra.gmra.mrb[84].mxu0 %vm3938_vm8, %v4227_v53 }
 0x90c   :  { %v6168_v55 = vpop.f32.mrb[113].mxu1  ;;  %6246 = vmatprep.mubr.msk.bf16.mxu0 %vm6976_vm3, %v6977_v0  ;;  %6255 = vmatpush3.bf16.msra.mxu0 %v6953_v52 }
 0x90d   :  { %v3849_v58 = vpop.f32.mrb[114].mxu1  ;;  %6256 = vmatprep.subr.bf16.mxu0 %v6977_v0 }
 0x90e   :  { %v3895_v21 = vpack.c.bf16 %v3849_v58, %v3846_v54  ;;  %v6169_v24 = vpop.f32.mrb[115].mxu1 }
 0x910   :  { %v4228_v59 = vrot.slane %v3895_v21, 4  ;;  %6257 = vmatpush3.bf16.msra.mxu0 %v6954_v57 }
 0x911   :  { %6258 = vmatprep.subr.bf16.mxu0 %v6977_v0 }
 0x912   :  { %v4229_v34 = vsel %vm299_vm0, %v4226_v51, %v4228_v59 }
 0x913   :  { %6247 = vmatmul.mubr.msk.bf16.gmra.mrb[88].mxu0 %vm3938_vm8, %v4229_v34  ;;  %v3854_v35 = vpop.f32.mrb[116].mxu1 }
 0x914   :  { %6250 = vmatprep.mubr.msk.bf16.mxu0 %vm6976_vm3, %v6977_v0  ;;  %v6172_v36 = vpop.f32.mrb[117].mxu1  ;;  %6259 = vmatpush3.bf16.msra.mxu0 %v6955_v61 }
 0x915   :  { %v3857_v62 = vpop.f32.mrb[118].mxu1  ;;  %6272 = vmatprep.subr.bf16.mxu0 %v6977_v0 }
 0x916   :  { %v3896_v2 = vpack.c.bf16 %v3857_v62, %v3854_v35  ;;  %v6173_v14 = vpop.f32.mrb[119].mxu1 }
 0x91b   :  { %6251 = vmatmul.mubr.msk.bf16.gmra.mrb[92].mxu0 %vm3938_vm8, %v4228_v59  ;;  %v3862_v19 = vpop.f32.mrb[120].mxu1 }
 0x91c   :  { %6260 = vmatprep.mubr.msk.bf16.mxu0 %vm6976_vm3, %v6977_v0  ;;  %v6176_v41 = vpop.f32.mrb[121].mxu1 }
 0x91d   :  { %v3865_v3 = vpop.f32.mrb[122].mxu1 }
 0x91e   :  { %v3897_v4 = vpack.c.bf16 %v3865_v3, %v3862_v19  ;;  %v6177_v5 = vpop.f32.mrb[123].mxu1 }
 0x923   :  { %6261 = vmatmul.mubr.msk.bf16.vlgmr.msra.gmra.mrb[96].mxu0 %vm3938_vm8, %v3896_v2  ;;  %v3870_v60 = vpop.f32.mrb[124].mxu1 }
 0x924   :  { %6264 = vmatprep.mubr.msk.bf16.mxu0 %vm6976_vm3, %v6977_v0  ;;  %v6180_v9 = vpop.f32.mrb[125].mxu1  ;;  %6273 = vmatpush3.bf16.msra.mxu0 %v6956_v6  ;;  %v3898_v46 = vpack.c.bf16 %v3870_v60, %v3870_v60 }
 0x925   :  { %v3873_v13 = vpop.f32.mrb[126].mxu1  ;;  %6274 = vmatprep.subr.bf16.mxu0 %v6977_v0 }
 0x926   :  { %v6181_v20 = vpop.f32.mrb[127].mxu1 }
 0x928   :  { %6275 = vmatpush3.bf16.msra.mxu0 %v6957_v1 }
 0x929   :  { %6276 = vmatprep.subr.bf16.mxu0 %v6977_v0 }
 0x92b   :  { %6265 = vmatmul.mubr.msk.bf16.gmra.mrb[100].mxu0 %vm3938_vm8, %v3897_v4 }
 0x92c   :  { %6268 = vmatprep.mubr.msk.bf16.mxu0 %vm6976_vm3, %v6977_v0  ;;  %6277 = vmatpush3.bf16.msra.mxu0 %v6958_v45 }
 0x92d   :  { %6290 = vmatprep.subr.bf16.mxu0 %v6977_v0 }
 0x933   :  { %6269 = vmatmul.mubr.msk.bf16.gmra.mrb[104].mxu0 %vm3938_vm8, %v3898_v46  ;;  %v4760_v46 = vld [vmem:[%s8899_s1 + $0x8] sm:$0xff] }
 0x934   :  { %6278 = vmatprep.mubr.msk.bf16.mxu0 %vm6976_vm3, %v6977_v0  ;;  %6354 = vmatprep.mubr.msk.f32.mxu1 %vm3587_vm6, %v4760_v46 }
 0x93b   :  { %6279 = vmatmul.mubr.msk.bf16.vlgmr.msra.gmra.mrb[108].mxu0 %vm3938_vm8, %v3876_v16  ;;  %v6964_v16 = vld [vmem:[%s8901_s7 + $0xc4] sm:$0xff]  }
 0x93c   :  { %6282 = vmatprep.mubr.msk.bf16.mxu0 %vm6976_vm3, %v6977_v0  ;;  %6291 = vmatpush3.bf16.msra.mxu0 %v6959_v39 }
 0x93d   :  { %6292 = vmatprep.subr.bf16.mxu0 %v6977_v0 }
 0x940   :  { %6293 = vmatpush3.bf16.msra.mxu0 %v6960_v40 }
 0x941   :  { %6294 = vmatprep.subr.bf16.mxu0 %v6977_v0 }
 0x943   :  { %6283 = vmatmul.mubr.msk.bf16.gmra.mrb[112].mxu0 %vm3938_vm8, %v3877_v25 }
 0x944   :  { %6286 = vmatprep.mubr.msk.bf16.mxu0 %vm6976_vm3, %v6977_v0  ;;  %6295 = vmatpush3.bf16.msra.mxu0 %v6961_v44 }
 0x945   :  { %6326 = vmatprep.subr.bf16.mxu0 %v6977_v0 }
 0x94b   :  { %6287 = vmatmul.mubr.msk.bf16.gmra.mrb[116].mxu0 %vm3938_vm8, %v8502_v37 }
 0x94c   :  { %6296 = vmatprep.mubr.msk.bf16.mxu0 %vm6976_vm3, %v6977_v0 }
 0x953   :  { %6297 = vmatmul.mubr.msk.bf16.vlgmr.msra.gmra.mrb[120].mxu0 %vm3938_vm8, %v3881_v23 }
 0x954   :  { %6300 = vmatprep.mubr.msk.bf16.mxu0 %vm6976_vm3, %v6977_v0  ;;  %6327 = vmatpush3.bf16.msra.mxu0 %v6962_v12 }
 0x955   :  { %6328 = vmatprep.subr.bf16.mxu0 %v6977_v0 }
 0x958   :  { %6329 = vmatpush3.bf16.msra.mxu0 %v6963_v15 }
 0x959   :  { %6330 = vmatprep.subr.bf16.mxu0 %v6977_v0 }
 0x95b   :  { %6301 = vmatmul.mubr.msk.bf16.gmra.mrb[124].mxu0 %vm3938_vm8, %v3882_v33 }
 0x95c   :  { %6304 = vmatprep.mubr.msk.bf16.mxu0 %vm6976_vm3, %v6977_v0  ;;  %6331 = vmatpush3.bf16.msra.mxu0 %v6964_v16 }
 0x963   :  { %6305 = vmatmul.mubr.msk.bf16.gmra.mrb[128].mxu0 %vm3938_vm8, %v8540_v63 }
 0x964   :  { %6332 = vmatprep.mubr.msk.bf16.mxu0 %vm6976_vm3, %v6977_v0 }
 0x966   :  { %v8716_v18 = vpop.f32.mrb[48].mxu0 }
 0x967   :  { %v6190_v22 = vpop.f32.mrb[49].mxu0 }
 0x968   :  { %v8718_v25 = vpop.f32.mrb[50].mxu0 }
 0x969   :  { %v6191_v37 = vpop.f32.mrb[51].mxu0 }
 0x96b   :  { %6333 = vmatmul.mubr.msk.bf16.vlgmr.msra.gmra.mrb[132].mxu0 %vm3938_vm8, %v3891_v11 }
 0x96c   :  { %6336 = vmatprep.mubr.msk.bf16.mxu0 %vm6976_vm3, %v6977_v0 }
 0x96e   :  { %v8726_v30 = vpop.f32.mrb[52].mxu0 }
 0x96f   :  { %v6194_v32 = vpop.f32.mrb[53].mxu0 }
 0x970   :  { %v8728_v23 = vpop.f32.mrb[54].mxu0 }
 0x971   :  { %v6195_v26 = vpop.f32.mrb[55].mxu0 }
 0x973   :  { %6337 = vmatmul.mubr.msk.bf16.gmra.mrb[136].mxu0 %vm3938_vm8, %v3892_v42 }
 0x974   :  { %6340 = vmatprep.mubr.msk.bf16.mxu0 %vm6976_vm3, %v6977_v0 }
 0x976   :  { %v8736_v31 = vpop.f32.mrb[56].mxu0 }
 0x977   :  { %v6198_v33 = vpop.f32.mrb[57].mxu0 }
 0x978   :  { %v4001_v63 = vpop.f32.mrb[58].mxu0 }
 0x979   :  { %v6199_v8 = vpop.f32.mrb[59].mxu0 }
 0x97b   :  { %6341 = vmatmul.mubr.msk.bf16.gmra.mrb[140].mxu0 %vm3938_vm8, %v8613_v43 }
 0x98e   :  { %v8740_v10 = vpop.f32.mrb[60].mxu0 }
 0x98f   :  { %v6208_v11 = vpop.f32.mrb[61].mxu0 }
 0x990   :  { %v8742_v47 = vpop.f32.mrb[62].mxu0 }
 0x991   :  { %v6209_v27 = vpop.f32.mrb[63].mxu0 }
 0x996   :  { %v8744_v17 = vpop.f32.mrb[64].mxu0 }
 0x997   :  { %v6212_v28 = vpop.f32.mrb[65].mxu0 }
 0x998   :  { %v8746_v42 = vpop.f32.mrb[66].mxu0 }
 0x999   :  { %v6213_v48 = vpop.f32.mrb[67].mxu0 }
 0x99b   :  { %v4634_v29 = vpop.f32.mrb[128].mxu1 }
 0x99c   :  { %v6316_v49 = vpop.f32.mrb[129].mxu1 }
 0x99d   :  { %v4637_v50 = vpop.f32.mrb[130].mxu1 }
 0x99e   :  { %v8748_v51 = vpop.f32.mrb[68].mxu0  ;;  %v6317_v52 = vpop.f32.mrb[131].mxu1 }
 0x99f   :  { %v6216_v53 = vpop.f32.mrb[69].mxu0 }
 0x9a0   :  { %v4104_v43 = vpop.f32.mrb[70].mxu0 }
 0x9a1   :  { %v6217_v54 = vpop.f32.mrb[71].mxu0 }
 0x9a3   :  { %v4642_v55 = vpop.f32.mrb[132].mxu1 }
 0x9a4   :  { %v6320_v57 = vpop.f32.mrb[133].mxu1 }
 0x9a5   :  { %v4645_v58 = vpop.f32.mrb[134].mxu1 }
 0x9a6   :  { %v6321_v21 = vpop.f32.mrb[135].mxu1 }
 0x9ab   :  { %v4650_v24 = vpop.f32.mrb[136].mxu1 }
 0x9ac   :  { %v6324_v59 = vpop.f32.mrb[137].mxu1 }
 0x9ad   :  { %v4653_v61 = vpop.f32.mrb[138].mxu1 }
 0x9ae   :  { %v6325_v34 = vpop.f32.mrb[139].mxu1 }
 0x9b6   :  { %v4188_v35 = vpop.f32.mrb[72].mxu0 }
 0x9b7   :  { %v8750_v36 = vadd.f32 %v4634_v29, %v4188_v35  ;;  %v6226_v62 = vpop.f32.mrb[73].mxu0 }
 0x9b8   :  { %v4191_v2 = vpop.f32.mrb[74].mxu0 }
 0x9b9   :  { %v8752_v14 = vadd.f32 %v4637_v50, %v4191_v2  ;;  %v6227_v19 = vpop.f32.mrb[75].mxu0 }
 0x9be   :  { %v4196_v41 = vpop.f32.mrb[76].mxu0 }
 0x9bf   :  { %v8754_v3 = vadd.f32 %v4642_v55, %v4196_v41  ;;  %v6230_v4 = vpop.f32.mrb[77].mxu0 }
 0x9c0   :  { %v4199_v5 = vpop.f32.mrb[78].mxu0 }
 0x9c1   :  { %v8756_v6 = vadd.f32 %v4645_v58, %v4199_v5  ;;  %v6231_v60 = vpop.f32.mrb[79].mxu0 }
 0x9c6   :  { %v4204_v9 = vpop.f32.mrb[80].mxu0 }
 0x9c7   :  { %v8758_v1 = vadd.f32 %v4650_v24, %v4204_v9  ;;  %v6234_v13 = vpop.f32.mrb[81].mxu0 }
 0x9c8   :  { %v4207_v20 = vpop.f32.mrb[82].mxu0 }
 0x9c9   :  { %v6235_v45 = vpop.f32.mrb[83].mxu0 }
 0x9de   :  { %v8764_v39 = vpop.f32.mrb[84].mxu0 }
 0x9df   :  { %v6244_v40 = vpop.f32.mrb[85].mxu0 }
 0x9e0   :  { %v8766_v44 = vpop.f32.mrb[86].mxu0 }
 0x9e1   :  { %v6245_v12 = vpop.f32.mrb[87].mxu0 }
 0x9e6   :  { %v8768_v15 = vpop.f32.mrb[88].mxu0 }
 0x9e7   :  { %v6248_v16 = vpop.f32.mrb[89].mxu0 }
 0x9e8   :  { %v8770_v22 = vpop.f32.mrb[90].mxu0 }
 0x9e9   :  { %v6249_v37 = vpop.f32.mrb[91].mxu0 }
 0x9ee   :  { %v8772_v32 = vpop.f32.mrb[92].mxu0 }
 0x9ef   :  { %v6252_v26 = vpop.f32.mrb[93].mxu0 }
 0x9f0   :  { %v4310_v33 = vpop.f32.mrb[94].mxu0 }
 0x9f1   :  { %v6253_v63 = vpop.f32.mrb[95].mxu0 }
 0x9f6   :  { %v4380_v8 = vpop.f32.mrb[96].mxu0 }
 0x9f7   :  { %v6262_v11 = vpop.f32.mrb[97].mxu0 }
 0x9f8   :  { %v4383_v27 = vpop.f32.mrb[98].mxu0 }
 0x9f9   :  { %v6263_v28 = vpop.f32.mrb[99].mxu0 }
 0x9fe   :  { %v8774_v48 = vpop.f32.mrb[100].mxu0 }
 0x9ff   :  { %v6266_v29 = vpop.f32.mrb[101].mxu0 }
 0xa00   :  { %v8776_v49 = vpop.f32.mrb[102].mxu0 }
 0xa01   :  { %v6267_v50 = vpop.f32.mrb[103].mxu0 }
 0xa06   :  { %v8778_v52 = vpop.f32.mrb[104].mxu0 }
 0xa07   :  { %v6270_v53 = vpop.f32.mrb[105].mxu0 }
 0xa08   :  { %v4399_v43 = vpop.f32.mrb[106].mxu0 }
 0xa09   :  { %v6271_v54 = vpop.f32.mrb[107].mxu0 }
 0xa0e   :  { %v4463_v55 = vpop.f32.mrb[108].mxu0 }
 0xa0f   :  { %v4464_v57 = vadd.f32 %v4463_v55, %v8716_v18  ;;  %v6280_v58 = vpop.f32.mrb[109].mxu0 }
 0xa10   :  { %v4466_v21 = vpop.f32.mrb[110].mxu0 }
 0xa11   :  { %v4467_v24 = vadd.f32 %v4466_v21, %v8718_v25  ;;  %v6281_v59 = vpop.f32.mrb[111].mxu0 }
 0xa16   :  { %v4471_v61 = vpop.f32.mrb[112].mxu0 }
 0xa17   :  { %v4472_v34 = vadd.f32 %v4471_v61, %v8726_v30  ;;  %v6284_v35 = vpop.f32.mrb[113].mxu0  ;;  %v4754_v61 = vld [vmem:[%s8898_s2 + $0x22] ss:$0 sm:$0xff] }
 0xa18   :  { %v4474_v62 = vpop.f32.mrb[114].mxu0 }
 0xa19   :  { %v4475_v2 = vadd.f32 %v4474_v62, %v8728_v23  ;;  %v6285_v19 = vpop.f32.mrb[115].mxu0 }
 0xa1e   :  { %v4479_v41 = vpop.f32.mrb[116].mxu0 }
 0xa1f   :  { %v4480_v4 = vadd.f32 %v4479_v41, %v8736_v31  ;;  %v6288_v5 = vpop.f32.mrb[117].mxu0 }
 0xa20   :  { %v4482_v60 = vpop.f32.mrb[118].mxu0 }
 0xa21   :  { %v6289_v9 = vpop.f32.mrb[119].mxu0 }
 0xa26   :  { %v4546_v18 = vpop.f32.mrb[120].mxu0 }
 0xa27   :  { %v4547_v13 = vadd.f32 %v4546_v18, %v8740_v10  ;;  %v6298_v20 = vpop.f32.mrb[121].mxu0 }
 0xa28   :  { %v4549_v25 = vpop.f32.mrb[122].mxu0 }
 0xa29   :  { %v4568_v45 = vadd.f32 %v4547_v13, %v4464_v57  ;;  %v4550_v46 = vadd.f32 %v4549_v25, %v8742_v47  ;;  %v6299_v30 = vpop.f32.mrb[123].mxu0 }
 0xa2b   :  { %v4569_v40 = vadd.f32 %v4550_v46, %v4467_v24 }
 0xa2e   :  { %v4554_v12 = vpop.f32.mrb[124].mxu0 }
 0xa2f   :  { %v4555_v23 = vadd.f32 %v4554_v12, %v8744_v17  ;;  %v6302_v16 = vpop.f32.mrb[125].mxu0 }
 0xa30   :  { %v4557_v37 = vpop.f32.mrb[126].mxu0 }
 0xa31   :  { %v4570_v26 = vadd.f32 %v4555_v23, %v4472_v34  ;;  %v4558_v31 = vadd.f32 %v4557_v37, %v8746_v42  ;;  %v6303_v33 = vpop.f32.mrb[127].mxu0  ;;  %v4925_v37 = vld [vmem:[%s8899_s1 + $0x20] sm:$0xff] }
 0xa32   :  { %v4847_v33 = vld [vmem:[%s8899_s1 + $0x18] sm:$0xf] }
 0xa33   :  { %v4571_v63 = vadd.f32 %v4558_v31, %v4475_v2 }
 0xa36   :  { %v4562_v11 = vpop.f32.mrb[128].mxu0 }
 0xa37   :  { %v4563_v10 = vadd.f32 %v4562_v11, %v8748_v51  ;;  %v6306_v28 = vpop.f32.mrb[129].mxu0  ;;  %v4927_v11 = vld [vmem:[%s8899_s1 + $0x30] sm:$0xff] }
 0xa38   :  { %v4565_v29 = vpop.f32.mrb[130].mxu0 }
 0xa39   :  { %v4572_v50 = vadd.f32 %v4563_v10, %v4480_v4  ;;  %v6307_v53 = vpop.f32.mrb[131].mxu0  ;;  %v5011_v29 = vpop.xlane.xlu1 %5010 }
 0xa3a   :  { %6967 = vlog2.f32 %v5011_v29 }
 0xa3e   :  { %v4717_v47 = vpop.f32.mrb[132].mxu0 }
 0xa3f   :  { %v4718_v43 = vadd.f32 %v4717_v47, %v8764_v39  ;;  %v6334_v54 = vpop.f32.mrb[133].mxu0 }
 0xa40   :  { %v4720_v55 = vpop.f32.mrb[134].mxu0 }
 0xa41   :  { %v4739_v17 = vadd.f32 %v4718_v43, %v8750_v36  ;;  %v4721_v57 = vadd.f32 %v4720_v55, %v8766_v44  ;;  %v6335_v58 = vpop.f32.mrb[135].mxu0 }
 0xa43   :  { %v4744_v42 = vadd.f32 %v4739_v17, %v4568_v45  ;;  %v4740_v21 = vadd.f32 %v4721_v57, %v8752_v14 }
 0xa45   :  { %v4749_v24 = vadd.f32 %v4744_v42, %v4380_v8  ;;  %v4745_v59 = vadd.f32 %v4740_v21, %v4569_v40 }
 0xa46   :  { %v4725_v51 = vpop.f32.mrb[136].mxu0 }
 0xa47   :  { %v4750_v34 = vadd.f32 %v4745_v59, %v4383_v27  ;;  %v4726_v39 = vadd.f32 %v4725_v51, %v8768_v15  ;;  %v6338_v35 = vpop.f32.mrb[137].mxu0  ;;  %v4755_v19 = vadd.f32 %v4754_v61, %v4749_v24  ;;  %v5115_v51 = vld [vmem:[%s8899_s1 + $0x48] sm:$0x7] }
 0xa48   :  { %v4728_v62 = vpop.f32.mrb[138].mxu0  ;;  %6378 = vmatprep.subr.msk.mxu0 %vm5123_vm13, %v5115_v51  ;;  %v5204_v35 = vld [vmem:[%s8899_s1 + $0x50] sm:$0xff] }
 0xa49   :  { %v4741_v36 = vadd.f32 %v4726_v39, %v8754_v3  ;;  %v4729_v44 = vadd.f32 %v4728_v62, %v8770_v22  ;;  %v6339_v2 = vpop.f32.mrb[139].mxu0  ;;  %v4756_v41 = vadd.f32 %v4754_v61, %v4750_v34  ;;  %6379 = vmatpush3.msk.msra.mxu0 %vm5123_vm13, %v5115_v51  ;;  %v5029_v39 = vld [vmem:[%s8899_s1 + $0x40] sm:$0xf]  ;;  %v5205_v62 = vld [vmem:[%s8899_s1 + $0x58] sm:$0xff] }
 0xa4b   :  { %v4746_v14 = vadd.f32 %v4741_v36, %v4570_v26  ;;  %v4742_v8 = vadd.f32 %v4729_v44, %v8756_v6  ;;  %v6398_v4 = vpack.c.bf16 %v4756_v41, %v4755_v19  ;;  %v4926_v26 = vld [vmem:[%s8899_s1 + $0x28] sm:$0xff]  ;;  %v6413_v36 = vpack.c.bf16 %v5205_v62, %v5204_v35  ;;  %v5206_v19 = vld [vmem:[%s8899_s1 + $0x60] sm:$0xff] }
 0xa4d   :  { %v4751_v5 = vadd.f32 %v4746_v14, %v8774_v48  ;;  %v4747_v60 = vadd.f32 %v4742_v8, %v4571_v63  ;;  %6399 = vmatprep.subr.bf16.mxu1 %v6398_v4  ;;  %v6411_v63 = vpack.c.bf16 %v4926_v26, %v4925_v37 }
 0xa4e   :  { %v4733_v27 = vpop.f32.mrb[140].mxu0  ;;  %6401 = vmatpush3.bf16.msra.mxu1 %v6398_v4 }
 0xa4f   :  { %v4752_v15 = vadd.f32 %v4747_v60, %v8776_v49  ;;  %v4734_v9 = vadd.f32 %v4733_v27, %v8772_v32  ;;  %v6342_v3 = vpop.f32.mrb[141].mxu0  ;;  %v4757_v20 = vadd.f32 %v4754_v61, %v4751_v5  ;;  %v4761_v49 = vld [vmem:[%s8899_s1 + $0x10] sm:$0xf]  ;;  %v39_v32 = vld [vmem:[%s8895_s0 + $0x48] sm:$0xff]  ;;  %v5296_v5 = vpop.permute.xlu1 %5295 }
 0xa50   :  { %v4736_v18 = vpop.f32.mrb[142].mxu0 }
 0xa51   :  { %v4743_v22 = vadd.f32 %v4734_v9, %v8758_v1  ;;  %v6343_v13 = vpop.f32.mrb[143].mxu0  ;;  %v4758_v25 = vadd.f32 %v4754_v61, %v4752_v15  ;;  %v40_v1 = vld [vmem:[%s8895_s0 + $0x50] sm:$0xf] }
 0xa53   :  { %v4748_v45 = vadd.f32 %v4743_v22, %v4572_v50  ;;  %v6402_v6 = vpack.c.bf16 %v4758_v25, %v4757_v20  ;;  %v6968_v50 = vpop.eup %6967 }
 0xa55   :  { %6403 = vmatprep.subr.bf16.mxu1 %v6402_v6  ;;  %v4753_v48 = vadd.f32 %v4748_v45, %v8778_v52 }
 0xa56   :  { %6405 = vmatpush3.bf16.msra.mxu1 %v6402_v6 }
 0xa57   :  { %v4759_v46 = vadd.f32 %v4754_v61, %v4753_v48 }
 0xa59   :  { %6352 = vmatprep.subr.mxu1 %v4759_v46 }
 0xa5a   :  { %6353 = vmatpush3.msra.mxu1 %v4759_v46 }
 0xa5b   :  { %6355 = vmatmul.mubr.msk.f32.vlgmr.msra.gmra.mrb[26].mxu1 %vm3587_vm6, %v4761_v49  ;;  %6406 = vmatprep.subr.bf16.mxu1 %v6975_v38 }
 0xa5c   :  { %6361 = vmatprep.mubr.msk.f32.mxu1 %vm6976_vm3, %v6977_v0 }
 0xb2e   :  { %v8819_v52 = vpop.f32.mrb[26].mxu1 }
 0xb2f   :  { %v4844_v30 = vsub.f32 %v8819_v52, %v40_v1  ;;  %v8822_v40 = vpop.f32.mrb[27].mxu1 }
 0xb30   :  { %v4843_v12 = vsub.f32 %v8822_v40, %v39_v32 }
 0xb31   :  { %v4846_v23 = vmul.f32 %v4844_v30, %v4844_v30 }
 0xb32   :  { %v4845_v16 = vmul.f32 %v4843_v12, %v4843_v12 }
 0xb34   :  { %v6407_v31 = vpack.c.bf16 %v4846_v23, %v4845_v16 }
 0xb36   :  { %6409 = vmatpush3.bf16.msk.msra.mxu1 %vm6408_vm10, %v6407_v31 }
 0xb37   :  { %6410 = vmatprep.subr.bf16.mxu1 %v6975_v38  ;;  %v5013_v38 = vmul.f32 0.6931472, %v6968_v50 }
 0xb39   :  { %6362 = vmatmul.mubr.msk.f32.vlgmr.msra.gmra.mrb[140].mxu1 %vm4848_vm11, %v4847_v33  ;;  %v5014_v53 = vadd.f32 %v5013_v38, %v8573_v56  ;;  %v5028_v56 = vld [vmem:[%s8899_s1 + $0x38] sm:$0xff] }
 0xb3a   :  { %6412 = vmatpush3.bf16.msra.mxu1 %v6411_v63  ;;  %6370 = vmatprep.mubr.msk.f32.mxu1 %vm6976_vm3, %v6977_v0  ;;  %vm5304_vm3 = vcmask 281856  }
 0xb3b   :  { %6368 = vmatprep.subr.mxu1 %v6977_v0  ;;  %v5015_v54 = vsub.f32 %v8480_v7, %v5014_v53 }
 0xb3e   :  { %6369 = vmatpush3.msra.mxu1 %v4927_v11 }
 0xc0c   :  { %v4921_v10 = vpop.f32.mrb[140].mxu1 }
 0xc0d   :  { %6371 = vmatmul.mubr.msk.f32.vlgmr.msra.gmra.mrb[142].mxu1 %vm295_vm1, %v4921_v10  ;;  %v6363_v28 = vpop.f32.mrb[141].mxu1 }
 0xc0e   :  { %6375 = vmatprep.mubr.msk.f32.mxu1 %vm5030_vm12, %v5028_v56 }
 0xce0   :  { %v4997_v47 = vpop.f32.mrb[142].mxu1 }
 0xce1   :  { %v5001_v43 = vmul.f32 -0.5, %v4997_v47  ;;  %v6372_v55 = vpop.f32.mrb[143].mxu1 }
 0xce3   :  { %v5016_v17 = vadd.f32 %v5015_v54, %v5001_v43 }
 0xce5   :  { %v5017_v57 = vsel %vm5002_vm7, %v5016_v17, -inf }
 0xce6   :  { %5018 = vmax.xlane.f32.xlu0 %v5017_v57 }
 0xd73   :  { %v5019_v58 = vpop.xlane.xlu0 %5018 }
 0xd74   :  { %v5020_v42 = vsub.f32 %v5016_v17, %v5019_v58 }
 0xd76   :  { %v5021_v21 = vmul.f32 1.442695, %v5020_v42 }
 0xd78   :  { %6969 = vpow2.f32 %v5021_v21 }
 0xd82   :  { %v6970_v24 = vpop.eup %6969 }
 0xd83   :  { %v5023_v59 = vsel %vm5002_vm7, %v6970_v24, 0.0 }
 0xd84   :  { %5024 = vadd.xlane.f32.xlu0 %v5023_v59 }
 0xd9a   :  { %5301 = vrot.lane.b32.xlu0 %v5016_v17, %s6980_s28 }
 0xe11   :  { %v5025_v7 = vpop.xlane.xlu0 %5024 }
 0xe12   :  { %6971 = vrcp.f32 %v5025_v7 }
 0xe15   :  { %v5302_v27 = vpop.permute.xlu0 %5301 }
 0xe1c   :  { %v6972_v61 = vpop.eup %6971 }
 0xe1d   :  { %v5027_v34 = vmul.f32 %v6972_v61, %v6970_v24 }
 0xe1f   :  { %5306 = vrot.lane.b32.xlu1 %v5027_v34, %s6981_s12  ;;  %6373 = vmatprep.subr.msk.mxu1 %vm299_vm0, %v5027_v34 }
 0xe20   :  { %6374 = vmatpush3.msk.msra.mxu1 %vm299_vm0, %v5027_v34  ;;  %vm5290_vm0 = vcmask 64512  }
 0xe21   :  { %6376 = vmatmul.mubr.msk.f32.vlgmr.msra.gmra.mrb[144].mxu1 %vm5030_vm12, %v5029_v39  ;;  %6414 = vmatprep.subr.bf16.mxu1 %v6413_v36 }
 0xe22   :  { %6416 = vmatpush3.bf16.msra.mxu1 %v6413_v36 }
 0xe23   :  { %6387 = vmatprep.subr.mxu1 %v5206_v19 }
 0xe26   :  { %6388 = vmatpush3.msra.mxu1 %v5206_v19 }
 0xe91   :  { %v5307_v15 = vpop.permute.xlu1 %5306 }
 0xef4   :  { %v6377_v44 = vpop.f32.mrb[144].mxu1 }
 0xef5   :  { %v5106_v2 = vpop.f32.mrb[145].mxu1 }
 0xef6   :  { %6380 = vmatprep.mubr.msk.f32.mxu0 %vm5116_vm14, %v5106_v2 }
 0xef7   :  { %6381 = vmatmul.mubr.msk.f32.vlgmr.msra.gmra.mrb[26].mxu0 %vm5116_vm14, %v6377_v44 }
 0xfca   :  { %v6382_v41 = vpop.f32.mrb[26].mxu0 }
 0xfcb   :  { %v5203_v14 = vmul.f32 %v6382_v41, %v8819_v52  ;;  %v5193_v8 = vpop.f32.mrb[27].mxu0 }
 0xfcc   :  { %v5202_v4 = vmul.f32 %v5193_v8, %v8822_v40 }
 0xfce   :  { %6389 = vmatprep.mubr.msk.f32.mxu1 %vm295_vm1, %v5202_v4 }
 0xfcf   :  { %6390 = vmatmul.mubr.msk.f32.vlgmr.msra.gmra.mrb[146].mxu1 %vm295_vm1, %v5203_v14 }
0x10a2   :  { %v6391_v60 = vpop.f32.mrb[146].mxu1 }
0x10a3   :  { %5293 = vst.msk [vmem:[%s8902_s8 + $0x8] sm:$0xf] %vm5292_vm15, %v6391_v60  ;;  %v5279_v0 = vpop.f32.mrb[147].mxu1 }
0x10a4   :  { %5291 = vst.msk [vmem:[%s8902_s8] sm:$0xff] %vm5290_vm0, %v5279_v0 }
0x10a5   :  { %5299 = vst.msk [vmem:[%s8902_s8] sm:$0xf] %vm5298_vm2, %v5296_v5 }
0x10a6   :  { %5305 = vst.msk [vmem:[%s8902_s8] sm:$0xf] %vm5304_vm3, %v5302_v27 }
0x10a7   :  { %5310 = vst.msk [vmem:[%s8902_s8] sm:$0xf] %vm5309_vm4, %v5307_v15 }

</bundles_post_ra>
